<compile_context>
chip_gen: v7x
topology: tpu7x:2x2x1
jax: 0.10.0
libtpu: 0.0.40
codegen_flags: <defaults>
</compile_context>

<pallas_src>
import functools

import jax
import jax.numpy as jnp
from jax import lax
from jax.experimental import pallas as pl
from jax.experimental.pallas import tpu as pltpu

_F_PAD = 128      # lane-padded width of the (tiny) input-feature dim
_OUT_LANES = 128  # lane-padded width of the final linear output


# ----------------------------- fused Pallas kernel -------------------------- #

def _fused_kernel(x_ref, slab_ref, o_ref, *, T, E, layout):
    """Autoencoder forward for one block of B sequences.

    x_ref:    (T, B, _F_PAD)    time-major input, features zero-padded to 128
    slab_ref: (R, 256)          all weights/biases packed into one aligned slab
    o_ref:    (T, B, _OUT_LANES)
    Gate order inside every packed 4H block is [i, f, o | g].
    """
    H1, H2 = 2 * E, E
    B = x_ref.shape[1]
    f32 = jnp.float32

    def ld(name):
        off, r, c = layout[name]
        return slab_ref[off:off + r, 0:c]          # static, tile-aligned slice

    wi1, wh1, b1 = ld("wi1"), ld("wh1"), ld("b1")
    wi2, wh2, b2 = ld("wi2"), ld("wh2"), ld("b2")
    wi3, wh3, b3 = ld("wi3"), ld("wh3"), ld("b3")
    wi4, wh4, b4 = ld("wi4"), ld("wh4"), ld("b4")
    wo, bo = ld("wo"), ld("bo")

    def mm(a, b):
        return jnp.dot(a, b, preferred_element_type=f32)

    def lstm_step(g, c, H):
        # g: (B, 4H) pre-activations, gate order [i, f, o | g]
        s = jax.nn.sigmoid(g[:, 0:3 * H])          # one EUP pass: i, f, o
        u = jnp.tanh(g[:, 3 * H:4 * H])            # one EUP pass: cell gate
        i, f, o = s[:, 0:H], s[:, H:2 * H], s[:, 2 * H:3 * H]
        c_new = f * c + i * u
        h_new = o * jnp.tanh(c_new)
        return h_new, c_new

    def zeros(H):
        return jnp.zeros((B, H), f32)

    # ------------- encoder: two stacked LSTMs, wavefront-interleaved ---------
    # TODO(synk): for H=32 layers the gate/c/h lane alignment still costs a few
    # XLU rotations per step; a quadrant-replicated c/h layout would remove them.
    h1, c1 = zeros(H1), zeros(H1)
    h2, c2 = zeros(H2), zeros(H2)
    for t in range(T):                              # static T -> fully unrolled
        g1 = mm(x_ref[t], wi1) + b1 + mm(h1, wh1)
        h1, c1 = lstm_step(g1, c1, H1)
        # layer-2 step t depends only on h1_t / h2_{t-1}; it is independent of
        # layer-1 step t+1, so the two chains overlap inside the unrolled block.
        g2 = mm(h1, wi2) + b2 + mm(h2, wh2)
        h2, c2 = lstm_step(g2, c2, H2)

    z = h2                                          # (B, E) latent code

    # ------------- decoder: constant input projection + two stacked LSTMs ----
    zp = mm(z, wi3) + b3                            # (B, 4E), same every step
    h3, c3 = zeros(H2), zeros(H2)
    h4, c4 = zeros(H1), zeros(H1)
    for t in range(T):
        g3 = zp + mm(h3, wh3)
        h3, c3 = lstm_step(g3, c3, H2)
        g4 = mm(h3, wi4) + b4 + mm(h4, wh4)
        h4, c4 = lstm_step(g4, c4, H1)
        # lane-dense per-step store: no (T,H) intermediate, no concatenate
        o_ref[t] = mm(h4, wo) + bo


# ------------------------------ jitted wrapper ------------------------------ #

@functools.lru_cache(maxsize=None)
def _build_forward(layout_items, seq_len, n_features, embedding_dim, b_blk):
    layout = dict(layout_items)
    kernel = functools.partial(_fused_kernel, T=seq_len, E=embedding_dim,
                               layout=layout)

    @jax.jit
    def forward(x, slab):
        x = x.astype(jnp.float32)
        single = x.ndim == 2
        if single:
            x = x[None]
        B, T = x.shape[0], seq_len
        Bp = ((B + b_blk - 1) // b_blk) * b_blk
        if Bp != B:
            x = jnp.concatenate(
                [x, jnp.zeros((Bp - B, T, n_features), jnp.float32)], axis=0)
        # time-major + lane-dense feature padding -> unmasked (8,128) tile loads
        x_tm = jnp.transpose(x, (1, 0, 2))
        x_tm = jnp.pad(x_tm, ((0, 0), (0, 0), (0, _F_PAD - n_features)))

        out_tm = pl.pallas_call(
            kernel,
            out_shape=jax.ShapeDtypeStruct((T, Bp, _OUT_LANES), jnp.float32),
            grid_spec=pltpu.PrefetchScalarGridSpec(
                num_scalar_prefetch=0,
                grid=(Bp // b_blk,),
                in_specs=[
                    pl.BlockSpec((T, b_blk, _F_PAD), lambda b: (0, b, 0)),
                    # constant block index -> the weight slab is DMA'd once
                    pl.BlockSpec(tuple(slab.shape), lambda b: (0, 0)),
                ],
                out_specs=pl.BlockSpec((T, b_blk, _OUT_LANES),
                                       lambda b: (0, b, 0)),
            ),
            compiler_params=pltpu.CompilerParams(
                dimension_semantics=("parallel",),        # megacore on v7x
                vmem_limit_bytes=32 * 1024 * 1024),       # safe on v5e/v6e/v7x
        )(x_tm, slab)

        out = jnp.transpose(out_tm, (1, 0, 2))[:B, :, :n_features]
        if single:
            out = out[0]
        return out

    return forward


def recurrent_autoencoder_forward(x, params, seq_len, n_features, embedding_dim,
                                  b_blk=8):
    """x: (seq_len, n_features) single sequence (module contract), or
       (B, seq_len, n_features) = B independent forward passes batched into
       the matmul M dimension."""
    # The PyTorch model's hidden_n.reshape((n_features, embedding_dim)) only
    # works for n_features == 1; we mirror that contract.
    assert n_features == 1, "RecurrentAutoencoder (like the PyTorch original) requires n_features == 1"
    layout_items = tuple(sorted((k, tuple(v)) for k, v in params["layout"].items()))
    fwd = _build_forward(layout_items, seq_len, n_features, embedding_dim, int(b_blk))
    return fwd(x, params["slab"])


# --------------------------- parameter plumbing ----------------------------- #

def _init_lstm_raw(key, input_dim, hidden_dim):
    """PyTorch nn.LSTM default init: uniform(-1/sqrt(H), 1/sqrt(H))."""
    k = 1.0 / float(hidden_dim) ** 0.5
    k1, k2, k3, k4 = jax.random.split(key, 4)
    w_ih = jax.random.uniform(k1, (4 * hidden_dim, input_dim), jnp.float32, -k, k)
    w_hh = jax.random.uniform(k2, (4 * hidden_dim, hidden_dim), jnp.float32, -k, k)
    b_ih = jax.random.uniform(k3, (4 * hidden_dim,), jnp.float32, -k, k)
    b_hh = jax.random.uniform(k4, (4 * hidden_dim,), jnp.float32, -k, k)
    return w_ih, w_hh, b_ih, b_hh


def _gate_reorder(w, hidden_dim):
    """Row blocks PyTorch-style [i;f;g;o] -> kernel order [i;f;o;g]."""
    H = hidden_dim
    return jnp.concatenate([w[0:H], w[H:2 * H], w[3 * H:4 * H], w[2 * H:3 * H]],
                           axis=0)


def _kernel_pack_lstm(raw, hidden_dim, in_rows_pad=None):
    w_ih, w_hh, b_ih, b_hh = raw
    wi = jnp.transpose(_gate_reorder(w_ih, hidden_dim))                  # (Din, 4H)
    wh = jnp.transpose(_gate_reorder(w_hh, hidden_dim))                  # (H, 4H)
    b = jnp.transpose(_gate_reorder((b_ih + b_hh)[:, None], hidden_dim))  # (1, 4H)
    if in_rows_pad is not None and in_rows_pad > wi.shape[0]:
        wi = jnp.zeros((in_rows_pad, wi.shape[1]),
                       jnp.float32).at[:wi.shape[0]].set(wi)
    return wi, wh, b


def _ref_pack_lstm(raw):
    w_ih, w_hh, b_ih, b_hh = raw
    return jnp.transpose(w_ih), jnp.transpose(w_hh), (b_ih + b_hh)[None, :]


def _pack_slab(entries):
    """Stack 2-D arrays into one slab: rows padded to multiples of 8, lanes to
    a common multiple of 128, so every in-kernel slice is (8,128)-tile aligned."""
    lanes = max(int(a.shape[1]) for _, a in entries)
    lanes = ((lanes + 127) // 128) * 128
    blocks, layout, off = [], {}, 0
    for name, a in entries:
        r, c = int(a.shape[0]), int(a.shape[1])
        rp = ((r + 7) // 8) * 8
        blocks.append(jnp.zeros((rp, lanes), jnp.float32).at[:r, :c].set(a))
        layout[name] = (off, r, c)
        off += rp
    return jnp.concatenate(blocks, axis=0), layout


def make_params(key, seq_len, n_features, embedding_dim):
    E, H = embedding_dim, 2 * embedding_dim
    keys = jax.random.split(key, 5)
    raw = {
        "enc_rnn1": _init_lstm_raw(keys[0], n_features, H),
        "enc_rnn2": _init_lstm_raw(keys[1], H, E),
        "dec_rnn1": _init_lstm_raw(keys[2], E, E),
        "dec_rnn2": _init_lstm_raw(keys[3], E, H),
    }
    kw, kb = jax.random.split(keys[4])
    klin = 1.0 / float(H) ** 0.5
    w_out = jax.random.uniform(kw, (n_features, H), jnp.float32, -klin, klin)
    b_out = jax.random.uniform(kb, (n_features,), jnp.float32, -klin, klin)

    # pure-JAX reference params (PyTorch gate order i,f,g,o)
    ref = {name: _ref_pack_lstm(raw[name]) for name in raw}
    ref["out_w"] = jnp.transpose(w_out)              # (2E, n_features)
    ref["out_b"] = b_out[None, :]                    # (1, n_features)

    # kernel weights: gate order [i,f,o|g]; first layer's input rows padded to 128
    wi1, wh1, b1 = _kernel_pack_lstm(raw["enc_rnn1"], H, in_rows_pad=_F_PAD)
    wi2, wh2, b2 = _kernel_pack_lstm(raw["enc_rnn2"], E)
    wi3, wh3, b3 = _kernel_pack_lstm(raw["dec_rnn1"], E)
    wi4, wh4, b4 = _kernel_pack_lstm(raw["dec_rnn2"], H)
    wo = jnp.zeros((H, _OUT_LANES), jnp.float32).at[:, :n_features].set(jnp.transpose(w_out))
    bo = jnp.zeros((1, _OUT_LANES), jnp.float32).at[:, :n_features].set(b_out[None, :])

    slab, layout = _pack_slab([
        ("wi1", wi1), ("wh1", wh1), ("b1", b1),
        ("wi2", wi2), ("wh2", wh2), ("b2", b2),
        ("wi3", wi3), ("wh3", wh3), ("b3", b3),
        ("wi4", wi4), ("wh4", wh4), ("b4", b4),
        ("wo", wo), ("bo", bo),
    ])
    return {"slab": slab, "layout": layout, "ref": ref}


# -------------------------- pure-JAX reference ------------------------------ #

def _lstm_ref(x, w_ih, w_hh, b):
    H = w_hh.shape[0]

    def step(carry, xt):
        h, c = carry
        g = xt @ w_ih + h @ w_hh + b[0]
        i = jax.nn.sigmoid(g[0 * H:1 * H])
        f = jax.nn.sigmoid(g[1 * H:2 * H])
        u = jnp.tanh(g[2 * H:3 * H])
        o = jax.nn.sigmoid(g[3 * H:4 * H])
        c = f * c + i * u
        h = o * jnp.tanh(c)
        return (h, c), h

    (_, _), ys = lax.scan(step, (jnp.zeros(H), jnp.zeros(H)), x)
    return ys


def reference_forward(x, ref_params, seq_len, n_features, embedding_dim):
    def single(xs):
        enc_in = xs.reshape(seq_len, n_features).astype(jnp.float32)
        y1 = _lstm_ref(enc_in, *ref_params["enc_rnn1"])
        y2 = _lstm_ref(y1, *ref_params["enc_rnn2"])
        z = y2[-1]                                               # (E,)
        d_in = jnp.broadcast_to(z[None, :], (seq_len, embedding_dim))
        y3 = _lstm_ref(d_in, *ref_params["dec_rnn1"])
        y4 = _lstm_ref(y3, *ref_params["dec_rnn2"])
        return y4 @ ref_params["out_w"] + ref_params["out_b"]

    if x.ndim == 2:
        return single(x)
    return jax.vmap(single)(x)


# ---------------------------------- main ------------------------------------ #

if __name__ == "__main__":
    seq_len, n_features, embedding_dim = 8, 1, 32
    batch = 16   # 16 independent sequences, grid=(2,) batch blocks of 8

    key = jax.random.PRNGKey(0)
    kp, kx = jax.random.split(key)
    params = make_params(kp, seq_len, n_features, embedding_dim)
    x = jax.random.normal(kx, (batch, seq_len, n_features), jnp.float32)

    # batched path (M-dim batching + parallel grid)
    out = recurrent_autoencoder_forward(x, params, seq_len, n_features, embedding_dim)
    out = jax.block_until_ready(out)
    ref = reference_forward(x, params["ref"], seq_len, n_features, embedding_dim)
    assert out.shape == (batch, seq_len, n_features), out.shape
    assert jnp.allclose(out, ref, atol=1e-3, rtol=1e-3)

    # single-sequence path (exact PyTorch-module contract)
    out1 = recurrent_autoencoder_forward(x[0], params, seq_len, n_features, embedding_dim)
    out1 = jax.block_until_ready(out1)
    ref1 = reference_forward(x[0], params["ref"], seq_len, n_features, embedding_dim)
    assert out1.shape == (seq_len, n_features), out1.shape
    assert jnp.allclose(out1, ref1, atol=1e-3, rtol=1e-3)

    print("KERNEL_OK")
</pallas_src>

<mosaic_0001>
module attributes {stable_mosaic.version = 11 : i64} {
  func.func @_fused_kernel(%arg0: i32, %arg1: memref<8x8x128xf32, #tpu.memory_space<vmem>>, %arg2: memref<552x256xf32, #tpu.memory_space<vmem>>, %arg3: memref<8x8x128xf32, #tpu.memory_space<vmem>>) attributes {dimension_semantics = [#tpu.dimension_semantics<parallel>], iteration_bounds = array<i64: 2>, scalar_prefetch = 0 : i64, scratch_operands = 0 : i64, tpu.core_type = #tpu.core_type<tc>, window_params = [{transform_indices = @transform_0, window_bounds = array<i64: 8, 8, 128>}, {pipeline_mode = #tpu.pipeline_mode<synchronous>, transform_indices = @transform_1, window_bounds = array<i64: 552, 256>}, {transform_indices = @transform_2, window_bounds = array<i64: 8, 8, 128>}]} {
    %c0 = arith.constant 0 : index
    %c0_0 = arith.constant 0 : index
    %0 = vector.load %arg2[%c0, %c0_0] : memref<552x256xf32, #tpu.memory_space<vmem>>, vector<128x256xf32>
    %c128 = arith.constant 128 : index
    %c0_1 = arith.constant 0 : index
    %1 = vector.load %arg2[%c128, %c0_1] : memref<552x256xf32, #tpu.memory_space<vmem>>, vector<64x256xf32>
    %c192 = arith.constant 192 : index
    %c0_2 = arith.constant 0 : index
    %2 = vector.load %arg2[%c192, %c0_2] : memref<552x256xf32, #tpu.memory_space<vmem>>, vector<1x256xf32>
    %c200 = arith.constant 200 : index
    %c0_3 = arith.constant 0 : index
    %3 = vector.load %arg2[%c200, %c0_3] : memref<552x256xf32, #tpu.memory_space<vmem>>, vector<64x128xf32>
    %c264 = arith.constant 264 : index
    %c0_4 = arith.constant 0 : index
    %4 = vector.load %arg2[%c264, %c0_4] : memref<552x256xf32, #tpu.memory_space<vmem>>, vector<32x128xf32>
    %c296 = arith.constant 296 : index
    %c0_5 = arith.constant 0 : index
    %5 = vector.load %arg2[%c296, %c0_5] : memref<552x256xf32, #tpu.memory_space<vmem>>, vector<1x128xf32>
    %c304 = arith.constant 304 : index
    %c0_6 = arith.constant 0 : index
    %6 = vector.load %arg2[%c304, %c0_6] : memref<552x256xf32, #tpu.memory_space<vmem>>, vector<32x128xf32>
    %c336 = arith.constant 336 : index
    %c0_7 = arith.constant 0 : index
    %7 = vector.load %arg2[%c336, %c0_7] : memref<552x256xf32, #tpu.memory_space<vmem>>, vector<32x128xf32>
    %c368 = arith.constant 368 : index
    %c0_8 = arith.constant 0 : index
    %8 = vector.load %arg2[%c368, %c0_8] : memref<552x256xf32, #tpu.memory_space<vmem>>, vector<1x128xf32>
    %c376 = arith.constant 376 : index
    %c0_9 = arith.constant 0 : index
    %9 = vector.load %arg2[%c376, %c0_9] : memref<552x256xf32, #tpu.memory_space<vmem>>, vector<32x256xf32>
    %c408 = arith.constant 408 : index
    %c0_10 = arith.constant 0 : index
    %10 = vector.load %arg2[%c408, %c0_10] : memref<552x256xf32, #tpu.memory_space<vmem>>, vector<64x256xf32>
    %c472 = arith.constant 472 : index
    %c0_11 = arith.constant 0 : index
    %11 = vector.load %arg2[%c472, %c0_11] : memref<552x256xf32, #tpu.memory_space<vmem>>, vector<1x256xf32>
    %c480 = arith.constant 480 : index
    %c0_12 = arith.constant 0 : index
    %12 = vector.load %arg2[%c480, %c0_12] : memref<552x256xf32, #tpu.memory_space<vmem>>, vector<64x128xf32>
    %c544 = arith.constant 544 : index
    %c0_13 = arith.constant 0 : index
    %13 = vector.load %arg2[%c544, %c0_13] : memref<552x256xf32, #tpu.memory_space<vmem>>, vector<1x128xf32>
    %cst = arith.constant 0.000000e+00 : f32
    %14 = vector.broadcast %cst : f32 to vector<8x64xf32>
    %cst_14 = arith.constant 0.000000e+00 : f32
    %15 = vector.broadcast %cst_14 : f32 to vector<8x64xf32>
    %cst_15 = arith.constant 0.000000e+00 : f32
    %16 = vector.broadcast %cst_15 : f32 to vector<8x32xf32>
    %cst_16 = arith.constant 0.000000e+00 : f32
    %17 = vector.broadcast %cst_16 : f32 to vector<8x32xf32>
    %c0_17 = arith.constant 0 : index
    %c0_18 = arith.constant 0 : index
    %c0_19 = arith.constant 0 : index
    %18 = vector.load %arg1[%c0_17, %c0_18, %c0_19] : memref<8x8x128xf32, #tpu.memory_space<vmem>>, vector<1x8x128xf32>
    %19 = vector.shape_cast %18 : vector<1x8x128xf32> to vector<8x128xf32>
    %cst_20 = arith.constant dense<0.000000e+00> : vector<8x256xf32>
    %20 = tpu.matmul %19, %0, %cst_20 {dimension_numbers = #tpu.dot_dimension_numbers<[1], [0], [0], [1], [0, 0, 1, 1], [], []>} : vector<8x128xf32>, vector<128x256xf32>, vector<8x256xf32> -> vector<8x256xf32>
    %21 = vector.broadcast %2 : vector<1x256xf32> to vector<8x256xf32>
    %22 = arith.addf %20, %21 : vector<8x256xf32>
    %cst_21 = arith.constant dense<0.000000e+00> : vector<8x256xf32>
    %23 = tpu.matmul %14, %1, %cst_21 {dimension_numbers = #tpu.dot_dimension_numbers<[1], [0], [0], [1], [0, 0, 1, 1], [], []>} : vector<8x64xf32>, vector<64x256xf32>, vector<8x256xf32> -> vector<8x256xf32>
    %24 = arith.addf %22, %23 : vector<8x256xf32>
    %25 = vector.extract_strided_slice %24 {offsets = [0, 0], sizes = [8, 192], strides = [1, 1]} : vector<8x256xf32> to vector<8x192xf32>
    %26 = arith.negf %25 : vector<8x192xf32>
    %27 = math.exp %26 : vector<8x192xf32>
    %cst_22 = arith.constant 1.000000e+00 : f32
    %28 = vector.broadcast %cst_22 : f32 to vector<8x192xf32>
    %29 = arith.addf %28, %27 : vector<8x192xf32>
    %30 = arith.divf %28, %29 : vector<8x192xf32>
    %31 = vector.extract_strided_slice %24 {offsets = [0, 192], sizes = [8, 64], strides = [1, 1]} : vector<8x256xf32> to vector<8x64xf32>
    %32 = math.tanh %31 : vector<8x64xf32>
    %33 = vector.extract_strided_slice %30 {offsets = [0, 0], sizes = [8, 64], strides = [1, 1]} : vector<8x192xf32> to vector<8x64xf32>
    %34 = vector.extract_strided_slice %30 {offsets = [0, 64], sizes = [8, 64], strides = [1, 1]} : vector<8x192xf32> to vector<8x64xf32>
    %35 = vector.extract_strided_slice %30 {offsets = [0, 128], sizes = [8, 64], strides = [1, 1]} : vector<8x192xf32> to vector<8x64xf32>
    %36 = arith.mulf %34, %15 : vector<8x64xf32>
    %37 = arith.mulf %33, %32 : vector<8x64xf32>
    %38 = arith.addf %36, %37 : vector<8x64xf32>
    %39 = math.tanh %38 : vector<8x64xf32>
    %40 = arith.mulf %35, %39 : vector<8x64xf32>
    %cst_23 = arith.constant dense<0.000000e+00> : vector<8x128xf32>
    %41 = tpu.matmul %40, %3, %cst_23 {dimension_numbers = #tpu.dot_dimension_numbers<[1], [0], [0], [1], [0, 0, 1, 1], [], []>} : vector<8x64xf32>, vector<64x128xf32>, vector<8x128xf32> -> vector<8x128xf32>
    %42 = vector.broadcast %5 : vector<1x128xf32> to vector<8x128xf32>
    %43 = arith.addf %41, %42 : vector<8x128xf32>
    %cst_24 = arith.constant dense<0.000000e+00> : vector<8x128xf32>
    %44 = tpu.matmul %16, %4, %cst_24 {dimension_numbers = #tpu.dot_dimension_numbers<[1], [0], [0], [1], [0, 0, 1, 1], [], []>} : vector<8x32xf32>, vector<32x128xf32>, vector<8x128xf32> -> vector<8x128xf32>
    %45 = arith.addf %43, %44 : vector<8x128xf32>
    %46 = vector.extract_strided_slice %45 {offsets = [0, 0], sizes = [8, 96], strides = [1, 1]} : vector<8x128xf32> to vector<8x96xf32>
    %47 = arith.negf %46 : vector<8x96xf32>
    %48 = math.exp %47 : vector<8x96xf32>
    %cst_25 = arith.constant 1.000000e+00 : f32
    %49 = vector.broadcast %cst_25 : f32 to vector<8x96xf32>
    %50 = arith.addf %49, %48 : vector<8x96xf32>
    %51 = arith.divf %49, %50 : vector<8x96xf32>
    %52 = vector.extract_strided_slice %45 {offsets = [0, 96], sizes = [8, 32], strides = [1, 1]} : vector<8x128xf32> to vector<8x32xf32>
    %53 = math.tanh %52 : vector<8x32xf32>
    %54 = vector.extract_strided_slice %51 {offsets = [0, 0], sizes = [8, 32], strides = [1, 1]} : vector<8x96xf32> to vector<8x32xf32>
    %55 = vector.extract_strided_slice %51 {offsets = [0, 32], sizes = [8, 32], strides = [1, 1]} : vector<8x96xf32> to vector<8x32xf32>
    %56 = vector.extract_strided_slice %51 {offsets = [0, 64], sizes = [8, 32], strides = [1, 1]} : vector<8x96xf32> to vector<8x32xf32>
    %57 = arith.mulf %55, %17 : vector<8x32xf32>
    %58 = arith.mulf %54, %53 : vector<8x32xf32>
    %59 = arith.addf %57, %58 : vector<8x32xf32>
    %60 = math.tanh %59 : vector<8x32xf32>
    %61 = arith.mulf %56, %60 : vector<8x32xf32>
    %c1 = arith.constant 1 : index
    %c0_26 = arith.constant 0 : index
    %c0_27 = arith.constant 0 : index
    %62 = vector.load %arg1[%c1, %c0_26, %c0_27] : memref<8x8x128xf32, #tpu.memory_space<vmem>>, vector<1x8x128xf32>
    %63 = vector.shape_cast %62 : vector<1x8x128xf32> to vector<8x128xf32>
    %cst_28 = arith.constant dense<0.000000e+00> : vector<8x256xf32>
    %64 = tpu.matmul %63, %0, %cst_28 {dimension_numbers = #tpu.dot_dimension_numbers<[1], [0], [0], [1], [0, 0, 1, 1], [], []>} : vector<8x128xf32>, vector<128x256xf32>, vector<8x256xf32> -> vector<8x256xf32>
    %65 = vector.broadcast %2 : vector<1x256xf32> to vector<8x256xf32>
    %66 = arith.addf %64, %65 : vector<8x256xf32>
    %cst_29 = arith.constant dense<0.000000e+00> : vector<8x256xf32>
    %67 = tpu.matmul %40, %1, %cst_29 {dimension_numbers = #tpu.dot_dimension_numbers<[1], [0], [0], [1], [0, 0, 1, 1], [], []>} : vector<8x64xf32>, vector<64x256xf32>, vector<8x256xf32> -> vector<8x256xf32>
    %68 = arith.addf %66, %67 : vector<8x256xf32>
    %69 = vector.extract_strided_slice %68 {offsets = [0, 0], sizes = [8, 192], strides = [1, 1]} : vector<8x256xf32> to vector<8x192xf32>
    %70 = arith.negf %69 : vector<8x192xf32>
    %71 = math.exp %70 : vector<8x192xf32>
    %cst_30 = arith.constant 1.000000e+00 : f32
    %72 = vector.broadcast %cst_30 : f32 to vector<8x192xf32>
    %73 = arith.addf %72, %71 : vector<8x192xf32>
    %74 = arith.divf %72, %73 : vector<8x192xf32>
    %75 = vector.extract_strided_slice %68 {offsets = [0, 192], sizes = [8, 64], strides = [1, 1]} : vector<8x256xf32> to vector<8x64xf32>
    %76 = math.tanh %75 : vector<8x64xf32>
    %77 = vector.extract_strided_slice %74 {offsets = [0, 0], sizes = [8, 64], strides = [1, 1]} : vector<8x192xf32> to vector<8x64xf32>
    %78 = vector.extract_strided_slice %74 {offsets = [0, 64], sizes = [8, 64], strides = [1, 1]} : vector<8x192xf32> to vector<8x64xf32>
    %79 = vector.extract_strided_slice %74 {offsets = [0, 128], sizes = [8, 64], strides = [1, 1]} : vector<8x192xf32> to vector<8x64xf32>
    %80 = arith.mulf %78, %38 : vector<8x64xf32>
    %81 = arith.mulf %77, %76 : vector<8x64xf32>
    %82 = arith.addf %80, %81 : vector<8x64xf32>
    %83 = math.tanh %82 : vector<8x64xf32>
    %84 = arith.mulf %79, %83 : vector<8x64xf32>
    %cst_31 = arith.constant dense<0.000000e+00> : vector<8x128xf32>
    %85 = tpu.matmul %84, %3, %cst_31 {dimension_numbers = #tpu.dot_dimension_numbers<[1], [0], [0], [1], [0, 0, 1, 1], [], []>} : vector<8x64xf32>, vector<64x128xf32>, vector<8x128xf32> -> vector<8x128xf32>
    %86 = vector.broadcast %5 : vector<1x128xf32> to vector<8x128xf32>
    %87 = arith.addf %85, %86 : vector<8x128xf32>
    %cst_32 = arith.constant dense<0.000000e+00> : vector<8x128xf32>
    %88 = tpu.matmul %61, %4, %cst_32 {dimension_numbers = #tpu.dot_dimension_numbers<[1], [0], [0], [1], [0, 0, 1, 1], [], []>} : vector<8x32xf32>, vector<32x128xf32>, vector<8x128xf32> -> vector<8x128xf32>
    %89 = arith.addf %87, %88 : vector<8x128xf32>
    %90 = vector.extract_strided_slice %89 {offsets = [0, 0], sizes = [8, 96], strides = [1, 1]} : vector<8x128xf32> to vector<8x96xf32>
    %91 = arith.negf %90 : vector<8x96xf32>
    %92 = math.exp %91 : vector<8x96xf32>
    %cst_33 = arith.constant 1.000000e+00 : f32
    %93 = vector.broadcast %cst_33 : f32 to vector<8x96xf32>
    %94 = arith.addf %93, %92 : vector<8x96xf32>
    %95 = arith.divf %93, %94 : vector<8x96xf32>
    %96 = vector.extract_strided_slice %89 {offsets = [0, 96], sizes = [8, 32], strides = [1, 1]} : vector<8x128xf32> to vector<8x32xf32>
    %97 = math.tanh %96 : vector<8x32xf32>
    %98 = vector.extract_strided_slice %95 {offsets = [0, 0], sizes = [8, 32], strides = [1, 1]} : vector<8x96xf32> to vector<8x32xf32>
    %99 = vector.extract_strided_slice %95 {offsets = [0, 32], sizes = [8, 32], strides = [1, 1]} : vector<8x96xf32> to vector<8x32xf32>
    %100 = vector.extract_strided_slice %95 {offsets = [0, 64], sizes = [8, 32], strides = [1, 1]} : vector<8x96xf32> to vector<8x32xf32>
    %101 = arith.mulf %99, %59 : vector<8x32xf32>
    %102 = arith.mulf %98, %97 : vector<8x32xf32>
    %103 = arith.addf %101, %102 : vector<8x32xf32>
    %104 = math.tanh %103 : vector<8x32xf32>
    %105 = arith.mulf %100, %104 : vector<8x32xf32>
    %c2 = arith.constant 2 : index
    %c0_34 = arith.constant 0 : index
    %c0_35 = arith.constant 0 : index
    %106 = vector.load %arg1[%c2, %c0_34, %c0_35] : memref<8x8x128xf32, #tpu.memory_space<vmem>>, vector<1x8x128xf32>
    %107 = vector.shape_cast %106 : vector<1x8x128xf32> to vector<8x128xf32>
    %cst_36 = arith.constant dense<0.000000e+00> : vector<8x256xf32>
    %108 = tpu.matmul %107, %0, %cst_36 {dimension_numbers = #tpu.dot_dimension_numbers<[1], [0], [0], [1], [0, 0, 1, 1], [], []>} : vector<8x128xf32>, vector<128x256xf32>, vector<8x256xf32> -> vector<8x256xf32>
    %109 = vector.broadcast %2 : vector<1x256xf32> to vector<8x256xf32>
    %110 = arith.addf %108, %109 : vector<8x256xf32>
    %cst_37 = arith.constant dense<0.000000e+00> : vector<8x256xf32>
    %111 = tpu.matmul %84, %1, %cst_37 {dimension_numbers = #tpu.dot_dimension_numbers<[1], [0], [0], [1], [0, 0, 1, 1], [], []>} : vector<8x64xf32>, vector<64x256xf32>, vector<8x256xf32> -> vector<8x256xf32>
    %112 = arith.addf %110, %111 : vector<8x256xf32>
    %113 = vector.extract_strided_slice %112 {offsets = [0, 0], sizes = [8, 192], strides = [1, 1]} : vector<8x256xf32> to vector<8x192xf32>
    %114 = arith.negf %113 : vector<8x192xf32>
    %115 = math.exp %114 : vector<8x192xf32>
    %cst_38 = arith.constant 1.000000e+00 : f32
    %116 = vector.broadcast %cst_38 : f32 to vector<8x192xf32>
    %117 = arith.addf %116, %115 : vector<8x192xf32>
    %118 = arith.divf %116, %117 : vector<8x192xf32>
    %119 = vector.extract_strided_slice %112 {offsets = [0, 192], sizes = [8, 64], strides = [1, 1]} : vector<8x256xf32> to vector<8x64xf32>
    %120 = math.tanh %119 : vector<8x64xf32>
    %121 = vector.extract_strided_slice %118 {offsets = [0, 0], sizes = [8, 64], strides = [1, 1]} : vector<8x192xf32> to vector<8x64xf32>
    %122 = vector.extract_strided_slice %118 {offsets = [0, 64], sizes = [8, 64], strides = [1, 1]} : vector<8x192xf32> to vector<8x64xf32>
    %123 = vector.extract_strided_slice %118 {offsets = [0, 128], sizes = [8, 64], strides = [1, 1]} : vector<8x192xf32> to vector<8x64xf32>
    %124 = arith.mulf %122, %82 : vector<8x64xf32>
    %125 = arith.mulf %121, %120 : vector<8x64xf32>
    %126 = arith.addf %124, %125 : vector<8x64xf32>
    %127 = math.tanh %126 : vector<8x64xf32>
    %128 = arith.mulf %123, %127 : vector<8x64xf32>
    %cst_39 = arith.constant dense<0.000000e+00> : vector<8x128xf32>
    %129 = tpu.matmul %128, %3, %cst_39 {dimension_numbers = #tpu.dot_dimension_numbers<[1], [0], [0], [1], [0, 0, 1, 1], [], []>} : vector<8x64xf32>, vector<64x128xf32>, vector<8x128xf32> -> vector<8x128xf32>
    %130 = vector.broadcast %5 : vector<1x128xf32> to vector<8x128xf32>
    %131 = arith.addf %129, %130 : vector<8x128xf32>
    %cst_40 = arith.constant dense<0.000000e+00> : vector<8x128xf32>
    %132 = tpu.matmul %105, %4, %cst_40 {dimension_numbers = #tpu.dot_dimension_numbers<[1], [0], [0], [1], [0, 0, 1, 1], [], []>} : vector<8x32xf32>, vector<32x128xf32>, vector<8x128xf32> -> vector<8x128xf32>
    %133 = arith.addf %131, %132 : vector<8x128xf32>
    %134 = vector.extract_strided_slice %133 {offsets = [0, 0], sizes = [8, 96], strides = [1, 1]} : vector<8x128xf32> to vector<8x96xf32>
    %135 = arith.negf %134 : vector<8x96xf32>
    %136 = math.exp %135 : vector<8x96xf32>
    %cst_41 = arith.constant 1.000000e+00 : f32
    %137 = vector.broadcast %cst_41 : f32 to vector<8x96xf32>
    %138 = arith.addf %137, %136 : vector<8x96xf32>
    %139 = arith.divf %137, %138 : vector<8x96xf32>
    %140 = vector.extract_strided_slice %133 {offsets = [0, 96], sizes = [8, 32], strides = [1, 1]} : vector<8x128xf32> to vector<8x32xf32>
    %141 = math.tanh %140 : vector<8x32xf32>
    %142 = vector.extract_strided_slice %139 {offsets = [0, 0], sizes = [8, 32], strides = [1, 1]} : vector<8x96xf32> to vector<8x32xf32>
    %143 = vector.extract_strided_slice %139 {offsets = [0, 32], sizes = [8, 32], strides = [1, 1]} : vector<8x96xf32> to vector<8x32xf32>
    %144 = vector.extract_strided_slice %139 {offsets = [0, 64], sizes = [8, 32], strides = [1, 1]} : vector<8x96xf32> to vector<8x32xf32>
    %145 = arith.mulf %143, %103 : vector<8x32xf32>
    %146 = arith.mulf %142, %141 : vector<8x32xf32>
    %147 = arith.addf %145, %146 : vector<8x32xf32>
    %148 = math.tanh %147 : vector<8x32xf32>
    %149 = arith.mulf %144, %148 : vector<8x32xf32>
    %c3 = arith.constant 3 : index
    %c0_42 = arith.constant 0 : index
    %c0_43 = arith.constant 0 : index
    %150 = vector.load %arg1[%c3, %c0_42, %c0_43] : memref<8x8x128xf32, #tpu.memory_space<vmem>>, vector<1x8x128xf32>
    %151 = vector.shape_cast %150 : vector<1x8x128xf32> to vector<8x128xf32>
    %cst_44 = arith.constant dense<0.000000e+00> : vector<8x256xf32>
    %152 = tpu.matmul %151, %0, %cst_44 {dimension_numbers = #tpu.dot_dimension_numbers<[1], [0], [0], [1], [0, 0, 1, 1], [], []>} : vector<8x128xf32>, vector<128x256xf32>, vector<8x256xf32> -> vector<8x256xf32>
    %153 = vector.broadcast %2 : vector<1x256xf32> to vector<8x256xf32>
    %154 = arith.addf %152, %153 : vector<8x256xf32>
    %cst_45 = arith.constant dense<0.000000e+00> : vector<8x256xf32>
    %155 = tpu.matmul %128, %1, %cst_45 {dimension_numbers = #tpu.dot_dimension_numbers<[1], [0], [0], [1], [0, 0, 1, 1], [], []>} : vector<8x64xf32>, vector<64x256xf32>, vector<8x256xf32> -> vector<8x256xf32>
    %156 = arith.addf %154, %155 : vector<8x256xf32>
    %157 = vector.extract_strided_slice %156 {offsets = [0, 0], sizes = [8, 192], strides = [1, 1]} : vector<8x256xf32> to vector<8x192xf32>
    %158 = arith.negf %157 : vector<8x192xf32>
    %159 = math.exp %158 : vector<8x192xf32>
    %cst_46 = arith.constant 1.000000e+00 : f32
    %160 = vector.broadcast %cst_46 : f32 to vector<8x192xf32>
    %161 = arith.addf %160, %159 : vector<8x192xf32>
    %162 = arith.divf %160, %161 : vector<8x192xf32>
    %163 = vector.extract_strided_slice %156 {offsets = [0, 192], sizes = [8, 64], strides = [1, 1]} : vector<8x256xf32> to vector<8x64xf32>
    %164 = math.tanh %163 : vector<8x64xf32>
    %165 = vector.extract_strided_slice %162 {offsets = [0, 0], sizes = [8, 64], strides = [1, 1]} : vector<8x192xf32> to vector<8x64xf32>
    %166 = vector.extract_strided_slice %162 {offsets = [0, 64], sizes = [8, 64], strides = [1, 1]} : vector<8x192xf32> to vector<8x64xf32>
    %167 = vector.extract_strided_slice %162 {offsets = [0, 128], sizes = [8, 64], strides = [1, 1]} : vector<8x192xf32> to vector<8x64xf32>
    %168 = arith.mulf %166, %126 : vector<8x64xf32>
    %169 = arith.mulf %165, %164 : vector<8x64xf32>
    %170 = arith.addf %168, %169 : vector<8x64xf32>
    %171 = math.tanh %170 : vector<8x64xf32>
    %172 = arith.mulf %167, %171 : vector<8x64xf32>
    %cst_47 = arith.constant dense<0.000000e+00> : vector<8x128xf32>
    %173 = tpu.matmul %172, %3, %cst_47 {dimension_numbers = #tpu.dot_dimension_numbers<[1], [0], [0], [1], [0, 0, 1, 1], [], []>} : vector<8x64xf32>, vector<64x128xf32>, vector<8x128xf32> -> vector<8x128xf32>
    %174 = vector.broadcast %5 : vector<1x128xf32> to vector<8x128xf32>
    %175 = arith.addf %173, %174 : vector<8x128xf32>
    %cst_48 = arith.constant dense<0.000000e+00> : vector<8x128xf32>
    %176 = tpu.matmul %149, %4, %cst_48 {dimension_numbers = #tpu.dot_dimension_numbers<[1], [0], [0], [1], [0, 0, 1, 1], [], []>} : vector<8x32xf32>, vector<32x128xf32>, vector<8x128xf32> -> vector<8x128xf32>
    %177 = arith.addf %175, %176 : vector<8x128xf32>
    %178 = vector.extract_strided_slice %177 {offsets = [0, 0], sizes = [8, 96], strides = [1, 1]} : vector<8x128xf32> to vector<8x96xf32>
    %179 = arith.negf %178 : vector<8x96xf32>
    %180 = math.exp %179 : vector<8x96xf32>
    %cst_49 = arith.constant 1.000000e+00 : f32
    %181 = vector.broadcast %cst_49 : f32 to vector<8x96xf32>
    %182 = arith.addf %181, %180 : vector<8x96xf32>
    %183 = arith.divf %181, %182 : vector<8x96xf32>
    %184 = vector.extract_strided_slice %177 {offsets = [0, 96], sizes = [8, 32], strides = [1, 1]} : vector<8x128xf32> to vector<8x32xf32>
    %185 = math.tanh %184 : vector<8x32xf32>
    %186 = vector.extract_strided_slice %183 {offsets = [0, 0], sizes = [8, 32], strides = [1, 1]} : vector<8x96xf32> to vector<8x32xf32>
    %187 = vector.extract_strided_slice %183 {offsets = [0, 32], sizes = [8, 32], strides = [1, 1]} : vector<8x96xf32> to vector<8x32xf32>
    %188 = vector.extract_strided_slice %183 {offsets = [0, 64], sizes = [8, 32], strides = [1, 1]} : vector<8x96xf32> to vector<8x32xf32>
    %189 = arith.mulf %187, %147 : vector<8x32xf32>
    %190 = arith.mulf %186, %185 : vector<8x32xf32>
    %191 = arith.addf %189, %190 : vector<8x32xf32>
    %192 = math.tanh %191 : vector<8x32xf32>
    %193 = arith.mulf %188, %192 : vector<8x32xf32>
    %c4 = arith.constant 4 : index
    %c0_50 = arith.constant 0 : index
    %c0_51 = arith.constant 0 : index
    %194 = vector.load %arg1[%c4, %c0_50, %c0_51] : memref<8x8x128xf32, #tpu.memory_space<vmem>>, vector<1x8x128xf32>
    %195 = vector.shape_cast %194 : vector<1x8x128xf32> to vector<8x128xf32>
    %cst_52 = arith.constant dense<0.000000e+00> : vector<8x256xf32>
    %196 = tpu.matmul %195, %0, %cst_52 {dimension_numbers = #tpu.dot_dimension_numbers<[1], [0], [0], [1], [0, 0, 1, 1], [], []>} : vector<8x128xf32>, vector<128x256xf32>, vector<8x256xf32> -> vector<8x256xf32>
    %197 = vector.broadcast %2 : vector<1x256xf32> to vector<8x256xf32>
    %198 = arith.addf %196, %197 : vector<8x256xf32>
    %cst_53 = arith.constant dense<0.000000e+00> : vector<8x256xf32>
    %199 = tpu.matmul %172, %1, %cst_53 {dimension_numbers = #tpu.dot_dimension_numbers<[1], [0], [0], [1], [0, 0, 1, 1], [], []>} : vector<8x64xf32>, vector<64x256xf32>, vector<8x256xf32> -> vector<8x256xf32>
    %200 = arith.addf %198, %199 : vector<8x256xf32>
    %201 = vector.extract_strided_slice %200 {offsets = [0, 0], sizes = [8, 192], strides = [1, 1]} : vector<8x256xf32> to vector<8x192xf32>
    %202 = arith.negf %201 : vector<8x192xf32>
    %203 = math.exp %202 : vector<8x192xf32>
    %cst_54 = arith.constant 1.000000e+00 : f32
    %204 = vector.broadcast %cst_54 : f32 to vector<8x192xf32>
    %205 = arith.addf %204, %203 : vector<8x192xf32>
    %206 = arith.divf %204, %205 : vector<8x192xf32>
    %207 = vector.extract_strided_slice %200 {offsets = [0, 192], sizes = [8, 64], strides = [1, 1]} : vector<8x256xf32> to vector<8x64xf32>
    %208 = math.tanh %207 : vector<8x64xf32>
    %209 = vector.extract_strided_slice %206 {offsets = [0, 0], sizes = [8, 64], strides = [1, 1]} : vector<8x192xf32> to vector<8x64xf32>
    %210 = vector.extract_strided_slice %206 {offsets = [0, 64], sizes = [8, 64], strides = [1, 1]} : vector<8x192xf32> to vector<8x64xf32>
    %211 = vector.extract_strided_slice %206 {offsets = [0, 128], sizes = [8, 64], strides = [1, 1]} : vector<8x192xf32> to vector<8x64xf32>
    %212 = arith.mulf %210, %170 : vector<8x64xf32>
    %213 = arith.mulf %209, %208 : vector<8x64xf32>
    %214 = arith.addf %212, %213 : vector<8x64xf32>
    %215 = math.tanh %214 : vector<8x64xf32>
    %216 = arith.mulf %211, %215 : vector<8x64xf32>
    %cst_55 = arith.constant dense<0.000000e+00> : vector<8x128xf32>
    %217 = tpu.matmul %216, %3, %cst_55 {dimension_numbers = #tpu.dot_dimension_numbers<[1], [0], [0], [1], [0, 0, 1, 1], [], []>} : vector<8x64xf32>, vector<64x128xf32>, vector<8x128xf32> -> vector<8x128xf32>
    %218 = vector.broadcast %5 : vector<1x128xf32> to vector<8x128xf32>
    %219 = arith.addf %217, %218 : vector<8x128xf32>
    %cst_56 = arith.constant dense<0.000000e+00> : vector<8x128xf32>
    %220 = tpu.matmul %193, %4, %cst_56 {dimension_numbers = #tpu.dot_dimension_numbers<[1], [0], [0], [1], [0, 0, 1, 1], [], []>} : vector<8x32xf32>, vector<32x128xf32>, vector<8x128xf32> -> vector<8x128xf32>
    %221 = arith.addf %219, %220 : vector<8x128xf32>
    %222 = vector.extract_strided_slice %221 {offsets = [0, 0], sizes = [8, 96], strides = [1, 1]} : vector<8x128xf32> to vector<8x96xf32>
    %223 = arith.negf %222 : vector<8x96xf32>
    %224 = math.exp %223 : vector<8x96xf32>
    %cst_57 = arith.constant 1.000000e+00 : f32
    %225 = vector.broadcast %cst_57 : f32 to vector<8x96xf32>
    %226 = arith.addf %225, %224 : vector<8x96xf32>
    %227 = arith.divf %225, %226 : vector<8x96xf32>
    %228 = vector.extract_strided_slice %221 {offsets = [0, 96], sizes = [8, 32], strides = [1, 1]} : vector<8x128xf32> to vector<8x32xf32>
    %229 = math.tanh %228 : vector<8x32xf32>
    %230 = vector.extract_strided_slice %227 {offsets = [0, 0], sizes = [8, 32], strides = [1, 1]} : vector<8x96xf32> to vector<8x32xf32>
    %231 = vector.extract_strided_slice %227 {offsets = [0, 32], sizes = [8, 32], strides = [1, 1]} : vector<8x96xf32> to vector<8x32xf32>
    %232 = vector.extract_strided_slice %227 {offsets = [0, 64], sizes = [8, 32], strides = [1, 1]} : vector<8x96xf32> to vector<8x32xf32>
    %233 = arith.mulf %231, %191 : vector<8x32xf32>
    %234 = arith.mulf %230, %229 : vector<8x32xf32>
    %235 = arith.addf %233, %234 : vector<8x32xf32>
    %236 = math.tanh %235 : vector<8x32xf32>
    %237 = arith.mulf %232, %236 : vector<8x32xf32>
    %c5 = arith.constant 5 : index
    %c0_58 = arith.constant 0 : index
    %c0_59 = arith.constant 0 : index
    %238 = vector.load %arg1[%c5, %c0_58, %c0_59] : memref<8x8x128xf32, #tpu.memory_space<vmem>>, vector<1x8x128xf32>
    %239 = vector.shape_cast %238 : vector<1x8x128xf32> to vector<8x128xf32>
    %cst_60 = arith.constant dense<0.000000e+00> : vector<8x256xf32>
    %240 = tpu.matmul %239, %0, %cst_60 {dimension_numbers = #tpu.dot_dimension_numbers<[1], [0], [0], [1], [0, 0, 1, 1], [], []>} : vector<8x128xf32>, vector<128x256xf32>, vector<8x256xf32> -> vector<8x256xf32>
    %241 = vector.broadcast %2 : vector<1x256xf32> to vector<8x256xf32>
    %242 = arith.addf %240, %241 : vector<8x256xf32>
    %cst_61 = arith.constant dense<0.000000e+00> : vector<8x256xf32>
    %243 = tpu.matmul %216, %1, %cst_61 {dimension_numbers = #tpu.dot_dimension_numbers<[1], [0], [0], [1], [0, 0, 1, 1], [], []>} : vector<8x64xf32>, vector<64x256xf32>, vector<8x256xf32> -> vector<8x256xf32>
    %244 = arith.addf %242, %243 : vector<8x256xf32>
    %245 = vector.extract_strided_slice %244 {offsets = [0, 0], sizes = [8, 192], strides = [1, 1]} : vector<8x256xf32> to vector<8x192xf32>
    %246 = arith.negf %245 : vector<8x192xf32>
    %247 = math.exp %246 : vector<8x192xf32>
    %cst_62 = arith.constant 1.000000e+00 : f32
    %248 = vector.broadcast %cst_62 : f32 to vector<8x192xf32>
    %249 = arith.addf %248, %247 : vector<8x192xf32>
    %250 = arith.divf %248, %249 : vector<8x192xf32>
    %251 = vector.extract_strided_slice %244 {offsets = [0, 192], sizes = [8, 64], strides = [1, 1]} : vector<8x256xf32> to vector<8x64xf32>
    %252 = math.tanh %251 : vector<8x64xf32>
    %253 = vector.extract_strided_slice %250 {offsets = [0, 0], sizes = [8, 64], strides = [1, 1]} : vector<8x192xf32> to vector<8x64xf32>
    %254 = vector.extract_strided_slice %250 {offsets = [0, 64], sizes = [8, 64], strides = [1, 1]} : vector<8x192xf32> to vector<8x64xf32>
    %255 = vector.extract_strided_slice %250 {offsets = [0, 128], sizes = [8, 64], strides = [1, 1]} : vector<8x192xf32> to vector<8x64xf32>
    %256 = arith.mulf %254, %214 : vector<8x64xf32>
    %257 = arith.mulf %253, %252 : vector<8x64xf32>
    %258 = arith.addf %256, %257 : vector<8x64xf32>
    %259 = math.tanh %258 : vector<8x64xf32>
    %260 = arith.mulf %255, %259 : vector<8x64xf32>
    %cst_63 = arith.constant dense<0.000000e+00> : vector<8x128xf32>
    %261 = tpu.matmul %260, %3, %cst_63 {dimension_numbers = #tpu.dot_dimension_numbers<[1], [0], [0], [1], [0, 0, 1, 1], [], []>} : vector<8x64xf32>, vector<64x128xf32>, vector<8x128xf32> -> vector<8x128xf32>
    %262 = vector.broadcast %5 : vector<1x128xf32> to vector<8x128xf32>
    %263 = arith.addf %261, %262 : vector<8x128xf32>
    %cst_64 = arith.constant dense<0.000000e+00> : vector<8x128xf32>
    %264 = tpu.matmul %237, %4, %cst_64 {dimension_numbers = #tpu.dot_dimension_numbers<[1], [0], [0], [1], [0, 0, 1, 1], [], []>} : vector<8x32xf32>, vector<32x128xf32>, vector<8x128xf32> -> vector<8x128xf32>
    %265 = arith.addf %263, %264 : vector<8x128xf32>
    %266 = vector.extract_strided_slice %265 {offsets = [0, 0], sizes = [8, 96], strides = [1, 1]} : vector<8x128xf32> to vector<8x96xf32>
    %267 = arith.negf %266 : vector<8x96xf32>
    %268 = math.exp %267 : vector<8x96xf32>
    %cst_65 = arith.constant 1.000000e+00 : f32
    %269 = vector.broadcast %cst_65 : f32 to vector<8x96xf32>
    %270 = arith.addf %269, %268 : vector<8x96xf32>
    %271 = arith.divf %269, %270 : vector<8x96xf32>
    %272 = vector.extract_strided_slice %265 {offsets = [0, 96], sizes = [8, 32], strides = [1, 1]} : vector<8x128xf32> to vector<8x32xf32>
    %273 = math.tanh %272 : vector<8x32xf32>
    %274 = vector.extract_strided_slice %271 {offsets = [0, 0], sizes = [8, 32], strides = [1, 1]} : vector<8x96xf32> to vector<8x32xf32>
    %275 = vector.extract_strided_slice %271 {offsets = [0, 32], sizes = [8, 32], strides = [1, 1]} : vector<8x96xf32> to vector<8x32xf32>
    %276 = vector.extract_strided_slice %271 {offsets = [0, 64], sizes = [8, 32], strides = [1, 1]} : vector<8x96xf32> to vector<8x32xf32>
    %277 = arith.mulf %275, %235 : vector<8x32xf32>
    %278 = arith.mulf %274, %273 : vector<8x32xf32>
    %279 = arith.addf %277, %278 : vector<8x32xf32>
    %280 = math.tanh %279 : vector<8x32xf32>
    %281 = arith.mulf %276, %280 : vector<8x32xf32>
    %c6 = arith.constant 6 : index
    %c0_66 = arith.constant 0 : index
    %c0_67 = arith.constant 0 : index
    %282 = vector.load %arg1[%c6, %c0_66, %c0_67] : memref<8x8x128xf32, #tpu.memory_space<vmem>>, vector<1x8x128xf32>
    %283 = vector.shape_cast %282 : vector<1x8x128xf32> to vector<8x128xf32>
    %cst_68 = arith.constant dense<0.000000e+00> : vector<8x256xf32>
    %284 = tpu.matmul %283, %0, %cst_68 {dimension_numbers = #tpu.dot_dimension_numbers<[1], [0], [0], [1], [0, 0, 1, 1], [], []>} : vector<8x128xf32>, vector<128x256xf32>, vector<8x256xf32> -> vector<8x256xf32>
    %285 = vector.broadcast %2 : vector<1x256xf32> to vector<8x256xf32>
    %286 = arith.addf %284, %285 : vector<8x256xf32>
    %cst_69 = arith.constant dense<0.000000e+00> : vector<8x256xf32>
    %287 = tpu.matmul %260, %1, %cst_69 {dimension_numbers = #tpu.dot_dimension_numbers<[1], [0], [0], [1], [0, 0, 1, 1], [], []>} : vector<8x64xf32>, vector<64x256xf32>, vector<8x256xf32> -> vector<8x256xf32>
    %288 = arith.addf %286, %287 : vector<8x256xf32>
    %289 = vector.extract_strided_slice %288 {offsets = [0, 0], sizes = [8, 192], strides = [1, 1]} : vector<8x256xf32> to vector<8x192xf32>
    %290 = arith.negf %289 : vector<8x192xf32>
    %291 = math.exp %290 : vector<8x192xf32>
    %cst_70 = arith.constant 1.000000e+00 : f32
    %292 = vector.broadcast %cst_70 : f32 to vector<8x192xf32>
    %293 = arith.addf %292, %291 : vector<8x192xf32>
    %294 = arith.divf %292, %293 : vector<8x192xf32>
    %295 = vector.extract_strided_slice %288 {offsets = [0, 192], sizes = [8, 64], strides = [1, 1]} : vector<8x256xf32> to vector<8x64xf32>
    %296 = math.tanh %295 : vector<8x64xf32>
    %297 = vector.extract_strided_slice %294 {offsets = [0, 0], sizes = [8, 64], strides = [1, 1]} : vector<8x192xf32> to vector<8x64xf32>
    %298 = vector.extract_strided_slice %294 {offsets = [0, 64], sizes = [8, 64], strides = [1, 1]} : vector<8x192xf32> to vector<8x64xf32>
    %299 = vector.extract_strided_slice %294 {offsets = [0, 128], sizes = [8, 64], strides = [1, 1]} : vector<8x192xf32> to vector<8x64xf32>
    %300 = arith.mulf %298, %258 : vector<8x64xf32>
    %301 = arith.mulf %297, %296 : vector<8x64xf32>
    %302 = arith.addf %300, %301 : vector<8x64xf32>
    %303 = math.tanh %302 : vector<8x64xf32>
    %304 = arith.mulf %299, %303 : vector<8x64xf32>
    %cst_71 = arith.constant dense<0.000000e+00> : vector<8x128xf32>
    %305 = tpu.matmul %304, %3, %cst_71 {dimension_numbers = #tpu.dot_dimension_numbers<[1], [0], [0], [1], [0, 0, 1, 1], [], []>} : vector<8x64xf32>, vector<64x128xf32>, vector<8x128xf32> -> vector<8x128xf32>
    %306 = vector.broadcast %5 : vector<1x128xf32> to vector<8x128xf32>
    %307 = arith.addf %305, %306 : vector<8x128xf32>
    %cst_72 = arith.constant dense<0.000000e+00> : vector<8x128xf32>
    %308 = tpu.matmul %281, %4, %cst_72 {dimension_numbers = #tpu.dot_dimension_numbers<[1], [0], [0], [1], [0, 0, 1, 1], [], []>} : vector<8x32xf32>, vector<32x128xf32>, vector<8x128xf32> -> vector<8x128xf32>
    %309 = arith.addf %307, %308 : vector<8x128xf32>
    %310 = vector.extract_strided_slice %309 {offsets = [0, 0], sizes = [8, 96], strides = [1, 1]} : vector<8x128xf32> to vector<8x96xf32>
    %311 = arith.negf %310 : vector<8x96xf32>
    %312 = math.exp %311 : vector<8x96xf32>
    %cst_73 = arith.constant 1.000000e+00 : f32
    %313 = vector.broadcast %cst_73 : f32 to vector<8x96xf32>
    %314 = arith.addf %313, %312 : vector<8x96xf32>
    %315 = arith.divf %313, %314 : vector<8x96xf32>
    %316 = vector.extract_strided_slice %309 {offsets = [0, 96], sizes = [8, 32], strides = [1, 1]} : vector<8x128xf32> to vector<8x32xf32>
    %317 = math.tanh %316 : vector<8x32xf32>
    %318 = vector.extract_strided_slice %315 {offsets = [0, 0], sizes = [8, 32], strides = [1, 1]} : vector<8x96xf32> to vector<8x32xf32>
    %319 = vector.extract_strided_slice %315 {offsets = [0, 32], sizes = [8, 32], strides = [1, 1]} : vector<8x96xf32> to vector<8x32xf32>
    %320 = vector.extract_strided_slice %315 {offsets = [0, 64], sizes = [8, 32], strides = [1, 1]} : vector<8x96xf32> to vector<8x32xf32>
    %321 = arith.mulf %319, %279 : vector<8x32xf32>
    %322 = arith.mulf %318, %317 : vector<8x32xf32>
    %323 = arith.addf %321, %322 : vector<8x32xf32>
    %324 = math.tanh %323 : vector<8x32xf32>
    %325 = arith.mulf %320, %324 : vector<8x32xf32>
    %c7 = arith.constant 7 : index
    %c0_74 = arith.constant 0 : index
    %c0_75 = arith.constant 0 : index
    %326 = vector.load %arg1[%c7, %c0_74, %c0_75] : memref<8x8x128xf32, #tpu.memory_space<vmem>>, vector<1x8x128xf32>
    %327 = vector.shape_cast %326 : vector<1x8x128xf32> to vector<8x128xf32>
    %cst_76 = arith.constant dense<0.000000e+00> : vector<8x256xf32>
    %328 = tpu.matmul %327, %0, %cst_76 {dimension_numbers = #tpu.dot_dimension_numbers<[1], [0], [0], [1], [0, 0, 1, 1], [], []>} : vector<8x128xf32>, vector<128x256xf32>, vector<8x256xf32> -> vector<8x256xf32>
    %329 = vector.broadcast %2 : vector<1x256xf32> to vector<8x256xf32>
    %330 = arith.addf %328, %329 : vector<8x256xf32>
    %cst_77 = arith.constant dense<0.000000e+00> : vector<8x256xf32>
    %331 = tpu.matmul %304, %1, %cst_77 {dimension_numbers = #tpu.dot_dimension_numbers<[1], [0], [0], [1], [0, 0, 1, 1], [], []>} : vector<8x64xf32>, vector<64x256xf32>, vector<8x256xf32> -> vector<8x256xf32>
    %332 = arith.addf %330, %331 : vector<8x256xf32>
    %333 = vector.extract_strided_slice %332 {offsets = [0, 0], sizes = [8, 192], strides = [1, 1]} : vector<8x256xf32> to vector<8x192xf32>
    %334 = arith.negf %333 : vector<8x192xf32>
    %335 = math.exp %334 : vector<8x192xf32>
    %cst_78 = arith.constant 1.000000e+00 : f32
    %336 = vector.broadcast %cst_78 : f32 to vector<8x192xf32>
    %337 = arith.addf %336, %335 : vector<8x192xf32>
    %338 = arith.divf %336, %337 : vector<8x192xf32>
    %339 = vector.extract_strided_slice %332 {offsets = [0, 192], sizes = [8, 64], strides = [1, 1]} : vector<8x256xf32> to vector<8x64xf32>
    %340 = math.tanh %339 : vector<8x64xf32>
    %341 = vector.extract_strided_slice %338 {offsets = [0, 0], sizes = [8, 64], strides = [1, 1]} : vector<8x192xf32> to vector<8x64xf32>
    %342 = vector.extract_strided_slice %338 {offsets = [0, 64], sizes = [8, 64], strides = [1, 1]} : vector<8x192xf32> to vector<8x64xf32>
    %343 = vector.extract_strided_slice %338 {offsets = [0, 128], sizes = [8, 64], strides = [1, 1]} : vector<8x192xf32> to vector<8x64xf32>
    %344 = arith.mulf %342, %302 : vector<8x64xf32>
    %345 = arith.mulf %341, %340 : vector<8x64xf32>
    %346 = arith.addf %344, %345 : vector<8x64xf32>
    %347 = math.tanh %346 : vector<8x64xf32>
    %348 = arith.mulf %343, %347 : vector<8x64xf32>
    %cst_79 = arith.constant dense<0.000000e+00> : vector<8x128xf32>
    %349 = tpu.matmul %348, %3, %cst_79 {dimension_numbers = #tpu.dot_dimension_numbers<[1], [0], [0], [1], [0, 0, 1, 1], [], []>} : vector<8x64xf32>, vector<64x128xf32>, vector<8x128xf32> -> vector<8x128xf32>
    %350 = vector.broadcast %5 : vector<1x128xf32> to vector<8x128xf32>
    %351 = arith.addf %349, %350 : vector<8x128xf32>
    %cst_80 = arith.constant dense<0.000000e+00> : vector<8x128xf32>
    %352 = tpu.matmul %325, %4, %cst_80 {dimension_numbers = #tpu.dot_dimension_numbers<[1], [0], [0], [1], [0, 0, 1, 1], [], []>} : vector<8x32xf32>, vector<32x128xf32>, vector<8x128xf32> -> vector<8x128xf32>
    %353 = arith.addf %351, %352 : vector<8x128xf32>
    %354 = vector.extract_strided_slice %353 {offsets = [0, 0], sizes = [8, 96], strides = [1, 1]} : vector<8x128xf32> to vector<8x96xf32>
    %355 = arith.negf %354 : vector<8x96xf32>
    %356 = math.exp %355 : vector<8x96xf32>
    %cst_81 = arith.constant 1.000000e+00 : f32
    %357 = vector.broadcast %cst_81 : f32 to vector<8x96xf32>
    %358 = arith.addf %357, %356 : vector<8x96xf32>
    %359 = arith.divf %357, %358 : vector<8x96xf32>
    %360 = vector.extract_strided_slice %353 {offsets = [0, 96], sizes = [8, 32], strides = [1, 1]} : vector<8x128xf32> to vector<8x32xf32>
    %361 = math.tanh %360 : vector<8x32xf32>
    %362 = vector.extract_strided_slice %359 {offsets = [0, 0], sizes = [8, 32], strides = [1, 1]} : vector<8x96xf32> to vector<8x32xf32>
    %363 = vector.extract_strided_slice %359 {offsets = [0, 32], sizes = [8, 32], strides = [1, 1]} : vector<8x96xf32> to vector<8x32xf32>
    %364 = vector.extract_strided_slice %359 {offsets = [0, 64], sizes = [8, 32], strides = [1, 1]} : vector<8x96xf32> to vector<8x32xf32>
    %365 = arith.mulf %363, %323 : vector<8x32xf32>
    %366 = arith.mulf %362, %361 : vector<8x32xf32>
    %367 = arith.addf %365, %366 : vector<8x32xf32>
    %368 = math.tanh %367 : vector<8x32xf32>
    %369 = arith.mulf %364, %368 : vector<8x32xf32>
    %cst_82 = arith.constant dense<0.000000e+00> : vector<8x128xf32>
    %370 = tpu.matmul %369, %6, %cst_82 {dimension_numbers = #tpu.dot_dimension_numbers<[1], [0], [0], [1], [0, 0, 1, 1], [], []>} : vector<8x32xf32>, vector<32x128xf32>, vector<8x128xf32> -> vector<8x128xf32>
    %371 = vector.broadcast %8 : vector<1x128xf32> to vector<8x128xf32>
    %372 = arith.addf %370, %371 : vector<8x128xf32>
    %cst_83 = arith.constant 0.000000e+00 : f32
    %373 = vector.broadcast %cst_83 : f32 to vector<8x32xf32>
    %cst_84 = arith.constant 0.000000e+00 : f32
    %374 = vector.broadcast %cst_84 : f32 to vector<8x32xf32>
    %cst_85 = arith.constant 0.000000e+00 : f32
    %375 = vector.broadcast %cst_85 : f32 to vector<8x64xf32>
    %cst_86 = arith.constant 0.000000e+00 : f32
    %376 = vector.broadcast %cst_86 : f32 to vector<8x64xf32>
    %cst_87 = arith.constant dense<0.000000e+00> : vector<8x128xf32>
    %377 = tpu.matmul %373, %7, %cst_87 {dimension_numbers = #tpu.dot_dimension_numbers<[1], [0], [0], [1], [0, 0, 1, 1], [], []>} : vector<8x32xf32>, vector<32x128xf32>, vector<8x128xf32> -> vector<8x128xf32>
    %378 = arith.addf %372, %377 : vector<8x128xf32>
    %379 = vector.extract_strided_slice %378 {offsets = [0, 0], sizes = [8, 96], strides = [1, 1]} : vector<8x128xf32> to vector<8x96xf32>
    %380 = arith.negf %379 : vector<8x96xf32>
    %381 = math.exp %380 : vector<8x96xf32>
    %cst_88 = arith.constant 1.000000e+00 : f32
    %382 = vector.broadcast %cst_88 : f32 to vector<8x96xf32>
    %383 = arith.addf %382, %381 : vector<8x96xf32>
    %384 = arith.divf %382, %383 : vector<8x96xf32>
    %385 = vector.extract_strided_slice %378 {offsets = [0, 96], sizes = [8, 32], strides = [1, 1]} : vector<8x128xf32> to vector<8x32xf32>
    %386 = math.tanh %385 : vector<8x32xf32>
    %387 = vector.extract_strided_slice %384 {offsets = [0, 0], sizes = [8, 32], strides = [1, 1]} : vector<8x96xf32> to vector<8x32xf32>
    %388 = vector.extract_strided_slice %384 {offsets = [0, 32], sizes = [8, 32], strides = [1, 1]} : vector<8x96xf32> to vector<8x32xf32>
    %389 = vector.extract_strided_slice %384 {offsets = [0, 64], sizes = [8, 32], strides = [1, 1]} : vector<8x96xf32> to vector<8x32xf32>
    %390 = arith.mulf %388, %374 : vector<8x32xf32>
    %391 = arith.mulf %387, %386 : vector<8x32xf32>
    %392 = arith.addf %390, %391 : vector<8x32xf32>
    %393 = math.tanh %392 : vector<8x32xf32>
    %394 = arith.mulf %389, %393 : vector<8x32xf32>
    %cst_89 = arith.constant dense<0.000000e+00> : vector<8x256xf32>
    %395 = tpu.matmul %394, %9, %cst_89 {dimension_numbers = #tpu.dot_dimension_numbers<[1], [0], [0], [1], [0, 0, 1, 1], [], []>} : vector<8x32xf32>, vector<32x256xf32>, vector<8x256xf32> -> vector<8x256xf32>
    %396 = vector.broadcast %11 : vector<1x256xf32> to vector<8x256xf32>
    %397 = arith.addf %395, %396 : vector<8x256xf32>
    %cst_90 = arith.constant dense<0.000000e+00> : vector<8x256xf32>
    %398 = tpu.matmul %375, %10, %cst_90 {dimension_numbers = #tpu.dot_dimension_numbers<[1], [0], [0], [1], [0, 0, 1, 1], [], []>} : vector<8x64xf32>, vector<64x256xf32>, vector<8x256xf32> -> vector<8x256xf32>
    %399 = arith.addf %397, %398 : vector<8x256xf32>
    %400 = vector.extract_strided_slice %399 {offsets = [0, 0], sizes = [8, 192], strides = [1, 1]} : vector<8x256xf32> to vector<8x192xf32>
    %401 = arith.negf %400 : vector<8x192xf32>
    %402 = math.exp %401 : vector<8x192xf32>
    %cst_91 = arith.constant 1.000000e+00 : f32
    %403 = vector.broadcast %cst_91 : f32 to vector<8x192xf32>
    %404 = arith.addf %403, %402 : vector<8x192xf32>
    %405 = arith.divf %403, %404 : vector<8x192xf32>
    %406 = vector.extract_strided_slice %399 {offsets = [0, 192], sizes = [8, 64], strides = [1, 1]} : vector<8x256xf32> to vector<8x64xf32>
    %407 = math.tanh %406 : vector<8x64xf32>
    %408 = vector.extract_strided_slice %405 {offsets = [0, 0], sizes = [8, 64], strides = [1, 1]} : vector<8x192xf32> to vector<8x64xf32>
    %409 = vector.extract_strided_slice %405 {offsets = [0, 64], sizes = [8, 64], strides = [1, 1]} : vector<8x192xf32> to vector<8x64xf32>
    %410 = vector.extract_strided_slice %405 {offsets = [0, 128], sizes = [8, 64], strides = [1, 1]} : vector<8x192xf32> to vector<8x64xf32>
    %411 = arith.mulf %409, %376 : vector<8x64xf32>
    %412 = arith.mulf %408, %407 : vector<8x64xf32>
    %413 = arith.addf %411, %412 : vector<8x64xf32>
    %414 = math.tanh %413 : vector<8x64xf32>
    %415 = arith.mulf %410, %414 : vector<8x64xf32>
    %cst_92 = arith.constant dense<0.000000e+00> : vector<8x128xf32>
    %416 = tpu.matmul %415, %12, %cst_92 {dimension_numbers = #tpu.dot_dimension_numbers<[1], [0], [0], [1], [0, 0, 1, 1], [], []>} : vector<8x64xf32>, vector<64x128xf32>, vector<8x128xf32> -> vector<8x128xf32>
    %417 = vector.broadcast %13 : vector<1x128xf32> to vector<8x128xf32>
    %418 = arith.addf %416, %417 : vector<8x128xf32>
    %c0_93 = arith.constant 0 : index
    %c0_94 = arith.constant 0 : index
    %c0_95 = arith.constant 0 : index
    %419 = vector.load %arg3[%c0_93, %c0_94, %c0_95] : memref<8x8x128xf32, #tpu.memory_space<vmem>>, vector<1x8x128xf32>
    %420 = vector.shape_cast %419 : vector<1x8x128xf32> to vector<8x128xf32>
    %421 = vector.shape_cast %418 : vector<8x128xf32> to vector<1x8x128xf32>
    tpu.vector_store %arg3[%c0_93, %c0_94, %c0_95], %421 {strides = array<i32>} : memref<8x8x128xf32, #tpu.memory_space<vmem>>, vector<1x8x128xf32>,
    %cst_96 = arith.constant dense<0.000000e+00> : vector<8x128xf32>
    %422 = tpu.matmul %394, %7, %cst_96 {dimension_numbers = #tpu.dot_dimension_numbers<[1], [0], [0], [1], [0, 0, 1, 1], [], []>} : vector<8x32xf32>, vector<32x128xf32>, vector<8x128xf32> -> vector<8x128xf32>
    %423 = arith.addf %372, %422 : vector<8x128xf32>
    %424 = vector.extract_strided_slice %423 {offsets = [0, 0], sizes = [8, 96], strides = [1, 1]} : vector<8x128xf32> to vector<8x96xf32>
    %425 = arith.negf %424 : vector<8x96xf32>
    %426 = math.exp %425 : vector<8x96xf32>
    %cst_97 = arith.constant 1.000000e+00 : f32
    %427 = vector.broadcast %cst_97 : f32 to vector<8x96xf32>
    %428 = arith.addf %427, %426 : vector<8x96xf32>
    %429 = arith.divf %427, %428 : vector<8x96xf32>
    %430 = vector.extract_strided_slice %423 {offsets = [0, 96], sizes = [8, 32], strides = [1, 1]} : vector<8x128xf32> to vector<8x32xf32>
    %431 = math.tanh %430 : vector<8x32xf32>
    %432 = vector.extract_strided_slice %429 {offsets = [0, 0], sizes = [8, 32], strides = [1, 1]} : vector<8x96xf32> to vector<8x32xf32>
    %433 = vector.extract_strided_slice %429 {offsets = [0, 32], sizes = [8, 32], strides = [1, 1]} : vector<8x96xf32> to vector<8x32xf32>
    %434 = vector.extract_strided_slice %429 {offsets = [0, 64], sizes = [8, 32], strides = [1, 1]} : vector<8x96xf32> to vector<8x32xf32>
    %435 = arith.mulf %433, %392 : vector<8x32xf32>
    %436 = arith.mulf %432, %431 : vector<8x32xf32>
    %437 = arith.addf %435, %436 : vector<8x32xf32>
    %438 = math.tanh %437 : vector<8x32xf32>
    %439 = arith.mulf %434, %438 : vector<8x32xf32>
    %cst_98 = arith.constant dense<0.000000e+00> : vector<8x256xf32>
    %440 = tpu.matmul %439, %9, %cst_98 {dimension_numbers = #tpu.dot_dimension_numbers<[1], [0], [0], [1], [0, 0, 1, 1], [], []>} : vector<8x32xf32>, vector<32x256xf32>, vector<8x256xf32> -> vector<8x256xf32>
    %441 = vector.broadcast %11 : vector<1x256xf32> to vector<8x256xf32>
    %442 = arith.addf %440, %441 : vector<8x256xf32>
    %cst_99 = arith.constant dense<0.000000e+00> : vector<8x256xf32>
    %443 = tpu.matmul %415, %10, %cst_99 {dimension_numbers = #tpu.dot_dimension_numbers<[1], [0], [0], [1], [0, 0, 1, 1], [], []>} : vector<8x64xf32>, vector<64x256xf32>, vector<8x256xf32> -> vector<8x256xf32>
    %444 = arith.addf %442, %443 : vector<8x256xf32>
    %445 = vector.extract_strided_slice %444 {offsets = [0, 0], sizes = [8, 192], strides = [1, 1]} : vector<8x256xf32> to vector<8x192xf32>
    %446 = arith.negf %445 : vector<8x192xf32>
    %447 = math.exp %446 : vector<8x192xf32>
    %cst_100 = arith.constant 1.000000e+00 : f32
    %448 = vector.broadcast %cst_100 : f32 to vector<8x192xf32>
    %449 = arith.addf %448, %447 : vector<8x192xf32>
    %450 = arith.divf %448, %449 : vector<8x192xf32>
    %451 = vector.extract_strided_slice %444 {offsets = [0, 192], sizes = [8, 64], strides = [1, 1]} : vector<8x256xf32> to vector<8x64xf32>
    %452 = math.tanh %451 : vector<8x64xf32>
    %453 = vector.extract_strided_slice %450 {offsets = [0, 0], sizes = [8, 64], strides = [1, 1]} : vector<8x192xf32> to vector<8x64xf32>
    %454 = vector.extract_strided_slice %450 {offsets = [0, 64], sizes = [8, 64], strides = [1, 1]} : vector<8x192xf32> to vector<8x64xf32>
    %455 = vector.extract_strided_slice %450 {offsets = [0, 128], sizes = [8, 64], strides = [1, 1]} : vector<8x192xf32> to vector<8x64xf32>
    %456 = arith.mulf %454, %413 : vector<8x64xf32>
    %457 = arith.mulf %453, %452 : vector<8x64xf32>
    %458 = arith.addf %456, %457 : vector<8x64xf32>
    %459 = math.tanh %458 : vector<8x64xf32>
    %460 = arith.mulf %455, %459 : vector<8x64xf32>
    %cst_101 = arith.constant dense<0.000000e+00> : vector<8x128xf32>
    %461 = tpu.matmul %460, %12, %cst_101 {dimension_numbers = #tpu.dot_dimension_numbers<[1], [0], [0], [1], [0, 0, 1, 1], [], []>} : vector<8x64xf32>, vector<64x128xf32>, vector<8x128xf32> -> vector<8x128xf32>
    %462 = vector.broadcast %13 : vector<1x128xf32> to vector<8x128xf32>
    %463 = arith.addf %461, %462 : vector<8x128xf32>
    %c1_102 = arith.constant 1 : index
    %c0_103 = arith.constant 0 : index
    %c0_104 = arith.constant 0 : index
    %464 = vector.load %arg3[%c1_102, %c0_103, %c0_104] : memref<8x8x128xf32, #tpu.memory_space<vmem>>, vector<1x8x128xf32>
    %465 = vector.shape_cast %464 : vector<1x8x128xf32> to vector<8x128xf32>
    %466 = vector.shape_cast %463 : vector<8x128xf32> to vector<1x8x128xf32>
    tpu.vector_store %arg3[%c1_102, %c0_103, %c0_104], %466 {strides = array<i32>} : memref<8x8x128xf32, #tpu.memory_space<vmem>>, vector<1x8x128xf32>,
    %cst_105 = arith.constant dense<0.000000e+00> : vector<8x128xf32>
    %467 = tpu.matmul %439, %7, %cst_105 {dimension_numbers = #tpu.dot_dimension_numbers<[1], [0], [0], [1], [0, 0, 1, 1], [], []>} : vector<8x32xf32>, vector<32x128xf32>, vector<8x128xf32> -> vector<8x128xf32>
    %468 = arith.addf %372, %467 : vector<8x128xf32>
    %469 = vector.extract_strided_slice %468 {offsets = [0, 0], sizes = [8, 96], strides = [1, 1]} : vector<8x128xf32> to vector<8x96xf32>
    %470 = arith.negf %469 : vector<8x96xf32>
    %471 = math.exp %470 : vector<8x96xf32>
    %cst_106 = arith.constant 1.000000e+00 : f32
    %472 = vector.broadcast %cst_106 : f32 to vector<8x96xf32>
    %473 = arith.addf %472, %471 : vector<8x96xf32>
    %474 = arith.divf %472, %473 : vector<8x96xf32>
    %475 = vector.extract_strided_slice %468 {offsets = [0, 96], sizes = [8, 32], strides = [1, 1]} : vector<8x128xf32> to vector<8x32xf32>
    %476 = math.tanh %475 : vector<8x32xf32>
    %477 = vector.extract_strided_slice %474 {offsets = [0, 0], sizes = [8, 32], strides = [1, 1]} : vector<8x96xf32> to vector<8x32xf32>
    %478 = vector.extract_strided_slice %474 {offsets = [0, 32], sizes = [8, 32], strides = [1, 1]} : vector<8x96xf32> to vector<8x32xf32>
    %479 = vector.extract_strided_slice %474 {offsets = [0, 64], sizes = [8, 32], strides = [1, 1]} : vector<8x96xf32> to vector<8x32xf32>
    %480 = arith.mulf %478, %437 : vector<8x32xf32>
    %481 = arith.mulf %477, %476 : vector<8x32xf32>
    %482 = arith.addf %480, %481 : vector<8x32xf32>
    %483 = math.tanh %482 : vector<8x32xf32>
    %484 = arith.mulf %479, %483 : vector<8x32xf32>
    %cst_107 = arith.constant dense<0.000000e+00> : vector<8x256xf32>
    %485 = tpu.matmul %484, %9, %cst_107 {dimension_numbers = #tpu.dot_dimension_numbers<[1], [0], [0], [1], [0, 0, 1, 1], [], []>} : vector<8x32xf32>, vector<32x256xf32>, vector<8x256xf32> -> vector<8x256xf32>
    %486 = vector.broadcast %11 : vector<1x256xf32> to vector<8x256xf32>
    %487 = arith.addf %485, %486 : vector<8x256xf32>
    %cst_108 = arith.constant dense<0.000000e+00> : vector<8x256xf32>
    %488 = tpu.matmul %460, %10, %cst_108 {dimension_numbers = #tpu.dot_dimension_numbers<[1], [0], [0], [1], [0, 0, 1, 1], [], []>} : vector<8x64xf32>, vector<64x256xf32>, vector<8x256xf32> -> vector<8x256xf32>
    %489 = arith.addf %487, %488 : vector<8x256xf32>
    %490 = vector.extract_strided_slice %489 {offsets = [0, 0], sizes = [8, 192], strides = [1, 1]} : vector<8x256xf32> to vector<8x192xf32>
    %491 = arith.negf %490 : vector<8x192xf32>
    %492 = math.exp %491 : vector<8x192xf32>
    %cst_109 = arith.constant 1.000000e+00 : f32
    %493 = vector.broadcast %cst_109 : f32 to vector<8x192xf32>
    %494 = arith.addf %493, %492 : vector<8x192xf32>
    %495 = arith.divf %493, %494 : vector<8x192xf32>
    %496 = vector.extract_strided_slice %489 {offsets = [0, 192], sizes = [8, 64], strides = [1, 1]} : vector<8x256xf32> to vector<8x64xf32>
    %497 = math.tanh %496 : vector<8x64xf32>
    %498 = vector.extract_strided_slice %495 {offsets = [0, 0], sizes = [8, 64], strides = [1, 1]} : vector<8x192xf32> to vector<8x64xf32>
    %499 = vector.extract_strided_slice %495 {offsets = [0, 64], sizes = [8, 64], strides = [1, 1]} : vector<8x192xf32> to vector<8x64xf32>
    %500 = vector.extract_strided_slice %495 {offsets = [0, 128], sizes = [8, 64], strides = [1, 1]} : vector<8x192xf32> to vector<8x64xf32>
    %501 = arith.mulf %499, %458 : vector<8x64xf32>
    %502 = arith.mulf %498, %497 : vector<8x64xf32>
    %503 = arith.addf %501, %502 : vector<8x64xf32>
    %504 = math.tanh %503 : vector<8x64xf32>
    %505 = arith.mulf %500, %504 : vector<8x64xf32>
    %cst_110 = arith.constant dense<0.000000e+00> : vector<8x128xf32>
    %506 = tpu.matmul %505, %12, %cst_110 {dimension_numbers = #tpu.dot_dimension_numbers<[1], [0], [0], [1], [0, 0, 1, 1], [], []>} : vector<8x64xf32>, vector<64x128xf32>, vector<8x128xf32> -> vector<8x128xf32>
    %507 = vector.broadcast %13 : vector<1x128xf32> to vector<8x128xf32>
    %508 = arith.addf %506, %507 : vector<8x128xf32>
    %c2_111 = arith.constant 2 : index
    %c0_112 = arith.constant 0 : index
    %c0_113 = arith.constant 0 : index
    %509 = vector.load %arg3[%c2_111, %c0_112, %c0_113] : memref<8x8x128xf32, #tpu.memory_space<vmem>>, vector<1x8x128xf32>
    %510 = vector.shape_cast %509 : vector<1x8x128xf32> to vector<8x128xf32>
    %511 = vector.shape_cast %508 : vector<8x128xf32> to vector<1x8x128xf32>
    tpu.vector_store %arg3[%c2_111, %c0_112, %c0_113], %511 {strides = array<i32>} : memref<8x8x128xf32, #tpu.memory_space<vmem>>, vector<1x8x128xf32>,
    %cst_114 = arith.constant dense<0.000000e+00> : vector<8x128xf32>
    %512 = tpu.matmul %484, %7, %cst_114 {dimension_numbers = #tpu.dot_dimension_numbers<[1], [0], [0], [1], [0, 0, 1, 1], [], []>} : vector<8x32xf32>, vector<32x128xf32>, vector<8x128xf32> -> vector<8x128xf32>
    %513 = arith.addf %372, %512 : vector<8x128xf32>
    %514 = vector.extract_strided_slice %513 {offsets = [0, 0], sizes = [8, 96], strides = [1, 1]} : vector<8x128xf32> to vector<8x96xf32>
    %515 = arith.negf %514 : vector<8x96xf32>
    %516 = math.exp %515 : vector<8x96xf32>
    %cst_115 = arith.constant 1.000000e+00 : f32
    %517 = vector.broadcast %cst_115 : f32 to vector<8x96xf32>
    %518 = arith.addf %517, %516 : vector<8x96xf32>
    %519 = arith.divf %517, %518 : vector<8x96xf32>
    %520 = vector.extract_strided_slice %513 {offsets = [0, 96], sizes = [8, 32], strides = [1, 1]} : vector<8x128xf32> to vector<8x32xf32>
    %521 = math.tanh %520 : vector<8x32xf32>
    %522 = vector.extract_strided_slice %519 {offsets = [0, 0], sizes = [8, 32], strides = [1, 1]} : vector<8x96xf32> to vector<8x32xf32>
    %523 = vector.extract_strided_slice %519 {offsets = [0, 32], sizes = [8, 32], strides = [1, 1]} : vector<8x96xf32> to vector<8x32xf32>
    %524 = vector.extract_strided_slice %519 {offsets = [0, 64], sizes = [8, 32], strides = [1, 1]} : vector<8x96xf32> to vector<8x32xf32>
    %525 = arith.mulf %523, %482 : vector<8x32xf32>
    %526 = arith.mulf %522, %521 : vector<8x32xf32>
    %527 = arith.addf %525, %526 : vector<8x32xf32>
    %528 = math.tanh %527 : vector<8x32xf32>
    %529 = arith.mulf %524, %528 : vector<8x32xf32>
    %cst_116 = arith.constant dense<0.000000e+00> : vector<8x256xf32>
    %530 = tpu.matmul %529, %9, %cst_116 {dimension_numbers = #tpu.dot_dimension_numbers<[1], [0], [0], [1], [0, 0, 1, 1], [], []>} : vector<8x32xf32>, vector<32x256xf32>, vector<8x256xf32> -> vector<8x256xf32>
    %531 = vector.broadcast %11 : vector<1x256xf32> to vector<8x256xf32>
    %532 = arith.addf %530, %531 : vector<8x256xf32>
    %cst_117 = arith.constant dense<0.000000e+00> : vector<8x256xf32>
    %533 = tpu.matmul %505, %10, %cst_117 {dimension_numbers = #tpu.dot_dimension_numbers<[1], [0], [0], [1], [0, 0, 1, 1], [], []>} : vector<8x64xf32>, vector<64x256xf32>, vector<8x256xf32> -> vector<8x256xf32>
    %534 = arith.addf %532, %533 : vector<8x256xf32>
    %535 = vector.extract_strided_slice %534 {offsets = [0, 0], sizes = [8, 192], strides = [1, 1]} : vector<8x256xf32> to vector<8x192xf32>
    %536 = arith.negf %535 : vector<8x192xf32>
    %537 = math.exp %536 : vector<8x192xf32>
    %cst_118 = arith.constant 1.000000e+00 : f32
    %538 = vector.broadcast %cst_118 : f32 to vector<8x192xf32>
    %539 = arith.addf %538, %537 : vector<8x192xf32>
    %540 = arith.divf %538, %539 : vector<8x192xf32>
    %541 = vector.extract_strided_slice %534 {offsets = [0, 192], sizes = [8, 64], strides = [1, 1]} : vector<8x256xf32> to vector<8x64xf32>
    %542 = math.tanh %541 : vector<8x64xf32>
    %543 = vector.extract_strided_slice %540 {offsets = [0, 0], sizes = [8, 64], strides = [1, 1]} : vector<8x192xf32> to vector<8x64xf32>
    %544 = vector.extract_strided_slice %540 {offsets = [0, 64], sizes = [8, 64], strides = [1, 1]} : vector<8x192xf32> to vector<8x64xf32>
    %545 = vector.extract_strided_slice %540 {offsets = [0, 128], sizes = [8, 64], strides = [1, 1]} : vector<8x192xf32> to vector<8x64xf32>
    %546 = arith.mulf %544, %503 : vector<8x64xf32>
    %547 = arith.mulf %543, %542 : vector<8x64xf32>
    %548 = arith.addf %546, %547 : vector<8x64xf32>
    %549 = math.tanh %548 : vector<8x64xf32>
    %550 = arith.mulf %545, %549 : vector<8x64xf32>
    %cst_119 = arith.constant dense<0.000000e+00> : vector<8x128xf32>
    %551 = tpu.matmul %550, %12, %cst_119 {dimension_numbers = #tpu.dot_dimension_numbers<[1], [0], [0], [1], [0, 0, 1, 1], [], []>} : vector<8x64xf32>, vector<64x128xf32>, vector<8x128xf32> -> vector<8x128xf32>
    %552 = vector.broadcast %13 : vector<1x128xf32> to vector<8x128xf32>
    %553 = arith.addf %551, %552 : vector<8x128xf32>
    %c3_120 = arith.constant 3 : index
    %c0_121 = arith.constant 0 : index
    %c0_122 = arith.constant 0 : index
    %554 = vector.load %arg3[%c3_120, %c0_121, %c0_122] : memref<8x8x128xf32, #tpu.memory_space<vmem>>, vector<1x8x128xf32>
    %555 = vector.shape_cast %554 : vector<1x8x128xf32> to vector<8x128xf32>
    %556 = vector.shape_cast %553 : vector<8x128xf32> to vector<1x8x128xf32>
    tpu.vector_store %arg3[%c3_120, %c0_121, %c0_122], %556 {strides = array<i32>} : memref<8x8x128xf32, #tpu.memory_space<vmem>>, vector<1x8x128xf32>,
    %cst_123 = arith.constant dense<0.000000e+00> : vector<8x128xf32>
    %557 = tpu.matmul %529, %7, %cst_123 {dimension_numbers = #tpu.dot_dimension_numbers<[1], [0], [0], [1], [0, 0, 1, 1], [], []>} : vector<8x32xf32>, vector<32x128xf32>, vector<8x128xf32> -> vector<8x128xf32>
    %558 = arith.addf %372, %557 : vector<8x128xf32>
    %559 = vector.extract_strided_slice %558 {offsets = [0, 0], sizes = [8, 96], strides = [1, 1]} : vector<8x128xf32> to vector<8x96xf32>
    %560 = arith.negf %559 : vector<8x96xf32>
    %561 = math.exp %560 : vector<8x96xf32>
    %cst_124 = arith.constant 1.000000e+00 : f32
    %562 = vector.broadcast %cst_124 : f32 to vector<8x96xf32>
    %563 = arith.addf %562, %561 : vector<8x96xf32>
    %564 = arith.divf %562, %563 : vector<8x96xf32>
    %565 = vector.extract_strided_slice %558 {offsets = [0, 96], sizes = [8, 32], strides = [1, 1]} : vector<8x128xf32> to vector<8x32xf32>
    %566 = math.tanh %565 : vector<8x32xf32>
    %567 = vector.extract_strided_slice %564 {offsets = [0, 0], sizes = [8, 32], strides = [1, 1]} : vector<8x96xf32> to vector<8x32xf32>
    %568 = vector.extract_strided_slice %564 {offsets = [0, 32], sizes = [8, 32], strides = [1, 1]} : vector<8x96xf32> to vector<8x32xf32>
    %569 = vector.extract_strided_slice %564 {offsets = [0, 64], sizes = [8, 32], strides = [1, 1]} : vector<8x96xf32> to vector<8x32xf32>
    %570 = arith.mulf %568, %527 : vector<8x32xf32>
    %571 = arith.mulf %567, %566 : vector<8x32xf32>
    %572 = arith.addf %570, %571 : vector<8x32xf32>
    %573 = math.tanh %572 : vector<8x32xf32>
    %574 = arith.mulf %569, %573 : vector<8x32xf32>
    %cst_125 = arith.constant dense<0.000000e+00> : vector<8x256xf32>
    %575 = tpu.matmul %574, %9, %cst_125 {dimension_numbers = #tpu.dot_dimension_numbers<[1], [0], [0], [1], [0, 0, 1, 1], [], []>} : vector<8x32xf32>, vector<32x256xf32>, vector<8x256xf32> -> vector<8x256xf32>
    %576 = vector.broadcast %11 : vector<1x256xf32> to vector<8x256xf32>
    %577 = arith.addf %575, %576 : vector<8x256xf32>
    %cst_126 = arith.constant dense<0.000000e+00> : vector<8x256xf32>
    %578 = tpu.matmul %550, %10, %cst_126 {dimension_numbers = #tpu.dot_dimension_numbers<[1], [0], [0], [1], [0, 0, 1, 1], [], []>} : vector<8x64xf32>, vector<64x256xf32>, vector<8x256xf32> -> vector<8x256xf32>
    %579 = arith.addf %577, %578 : vector<8x256xf32>
    %580 = vector.extract_strided_slice %579 {offsets = [0, 0], sizes = [8, 192], strides = [1, 1]} : vector<8x256xf32> to vector<8x192xf32>
    %581 = arith.negf %580 : vector<8x192xf32>
    %582 = math.exp %581 : vector<8x192xf32>
    %cst_127 = arith.constant 1.000000e+00 : f32
    %583 = vector.broadcast %cst_127 : f32 to vector<8x192xf32>
    %584 = arith.addf %583, %582 : vector<8x192xf32>
    %585 = arith.divf %583, %584 : vector<8x192xf32>
    %586 = vector.extract_strided_slice %579 {offsets = [0, 192], sizes = [8, 64], strides = [1, 1]} : vector<8x256xf32> to vector<8x64xf32>
    %587 = math.tanh %586 : vector<8x64xf32>
    %588 = vector.extract_strided_slice %585 {offsets = [0, 0], sizes = [8, 64], strides = [1, 1]} : vector<8x192xf32> to vector<8x64xf32>
    %589 = vector.extract_strided_slice %585 {offsets = [0, 64], sizes = [8, 64], strides = [1, 1]} : vector<8x192xf32> to vector<8x64xf32>
    %590 = vector.extract_strided_slice %585 {offsets = [0, 128], sizes = [8, 64], strides = [1, 1]} : vector<8x192xf32> to vector<8x64xf32>
    %591 = arith.mulf %589, %548 : vector<8x64xf32>
    %592 = arith.mulf %588, %587 : vector<8x64xf32>
    %593 = arith.addf %591, %592 : vector<8x64xf32>
    %594 = math.tanh %593 : vector<8x64xf32>
    %595 = arith.mulf %590, %594 : vector<8x64xf32>
    %cst_128 = arith.constant dense<0.000000e+00> : vector<8x128xf32>
    %596 = tpu.matmul %595, %12, %cst_128 {dimension_numbers = #tpu.dot_dimension_numbers<[1], [0], [0], [1], [0, 0, 1, 1], [], []>} : vector<8x64xf32>, vector<64x128xf32>, vector<8x128xf32> -> vector<8x128xf32>
    %597 = vector.broadcast %13 : vector<1x128xf32> to vector<8x128xf32>
    %598 = arith.addf %596, %597 : vector<8x128xf32>
    %c4_129 = arith.constant 4 : index
    %c0_130 = arith.constant 0 : index
    %c0_131 = arith.constant 0 : index
    %599 = vector.load %arg3[%c4_129, %c0_130, %c0_131] : memref<8x8x128xf32, #tpu.memory_space<vmem>>, vector<1x8x128xf32>
    %600 = vector.shape_cast %599 : vector<1x8x128xf32> to vector<8x128xf32>
    %601 = vector.shape_cast %598 : vector<8x128xf32> to vector<1x8x128xf32>
    tpu.vector_store %arg3[%c4_129, %c0_130, %c0_131], %601 {strides = array<i32>} : memref<8x8x128xf32, #tpu.memory_space<vmem>>, vector<1x8x128xf32>,
    %cst_132 = arith.constant dense<0.000000e+00> : vector<8x128xf32>
    %602 = tpu.matmul %574, %7, %cst_132 {dimension_numbers = #tpu.dot_dimension_numbers<[1], [0], [0], [1], [0, 0, 1, 1], [], []>} : vector<8x32xf32>, vector<32x128xf32>, vector<8x128xf32> -> vector<8x128xf32>
    %603 = arith.addf %372, %602 : vector<8x128xf32>
    %604 = vector.extract_strided_slice %603 {offsets = [0, 0], sizes = [8, 96], strides = [1, 1]} : vector<8x128xf32> to vector<8x96xf32>
    %605 = arith.negf %604 : vector<8x96xf32>
    %606 = math.exp %605 : vector<8x96xf32>
    %cst_133 = arith.constant 1.000000e+00 : f32
    %607 = vector.broadcast %cst_133 : f32 to vector<8x96xf32>
    %608 = arith.addf %607, %606 : vector<8x96xf32>
    %609 = arith.divf %607, %608 : vector<8x96xf32>
    %610 = vector.extract_strided_slice %603 {offsets = [0, 96], sizes = [8, 32], strides = [1, 1]} : vector<8x128xf32> to vector<8x32xf32>
    %611 = math.tanh %610 : vector<8x32xf32>
    %612 = vector.extract_strided_slice %609 {offsets = [0, 0], sizes = [8, 32], strides = [1, 1]} : vector<8x96xf32> to vector<8x32xf32>
    %613 = vector.extract_strided_slice %609 {offsets = [0, 32], sizes = [8, 32], strides = [1, 1]} : vector<8x96xf32> to vector<8x32xf32>
    %614 = vector.extract_strided_slice %609 {offsets = [0, 64], sizes = [8, 32], strides = [1, 1]} : vector<8x96xf32> to vector<8x32xf32>
    %615 = arith.mulf %613, %572 : vector<8x32xf32>
    %616 = arith.mulf %612, %611 : vector<8x32xf32>
    %617 = arith.addf %615, %616 : vector<8x32xf32>
    %618 = math.tanh %617 : vector<8x32xf32>
    %619 = arith.mulf %614, %618 : vector<8x32xf32>
    %cst_134 = arith.constant dense<0.000000e+00> : vector<8x256xf32>
    %620 = tpu.matmul %619, %9, %cst_134 {dimension_numbers = #tpu.dot_dimension_numbers<[1], [0], [0], [1], [0, 0, 1, 1], [], []>} : vector<8x32xf32>, vector<32x256xf32>, vector<8x256xf32> -> vector<8x256xf32>
    %621 = vector.broadcast %11 : vector<1x256xf32> to vector<8x256xf32>
    %622 = arith.addf %620, %621 : vector<8x256xf32>
    %cst_135 = arith.constant dense<0.000000e+00> : vector<8x256xf32>
    %623 = tpu.matmul %595, %10, %cst_135 {dimension_numbers = #tpu.dot_dimension_numbers<[1], [0], [0], [1], [0, 0, 1, 1], [], []>} : vector<8x64xf32>, vector<64x256xf32>, vector<8x256xf32> -> vector<8x256xf32>
    %624 = arith.addf %622, %623 : vector<8x256xf32>
    %625 = vector.extract_strided_slice %624 {offsets = [0, 0], sizes = [8, 192], strides = [1, 1]} : vector<8x256xf32> to vector<8x192xf32>
    %626 = arith.negf %625 : vector<8x192xf32>
    %627 = math.exp %626 : vector<8x192xf32>
    %cst_136 = arith.constant 1.000000e+00 : f32
    %628 = vector.broadcast %cst_136 : f32 to vector<8x192xf32>
    %629 = arith.addf %628, %627 : vector<8x192xf32>
    %630 = arith.divf %628, %629 : vector<8x192xf32>
    %631 = vector.extract_strided_slice %624 {offsets = [0, 192], sizes = [8, 64], strides = [1, 1]} : vector<8x256xf32> to vector<8x64xf32>
    %632 = math.tanh %631 : vector<8x64xf32>
    %633 = vector.extract_strided_slice %630 {offsets = [0, 0], sizes = [8, 64], strides = [1, 1]} : vector<8x192xf32> to vector<8x64xf32>
    %634 = vector.extract_strided_slice %630 {offsets = [0, 64], sizes = [8, 64], strides = [1, 1]} : vector<8x192xf32> to vector<8x64xf32>
    %635 = vector.extract_strided_slice %630 {offsets = [0, 128], sizes = [8, 64], strides = [1, 1]} : vector<8x192xf32> to vector<8x64xf32>
    %636 = arith.mulf %634, %593 : vector<8x64xf32>
    %637 = arith.mulf %633, %632 : vector<8x64xf32>
    %638 = arith.addf %636, %637 : vector<8x64xf32>
    %639 = math.tanh %638 : vector<8x64xf32>
    %640 = arith.mulf %635, %639 : vector<8x64xf32>
    %cst_137 = arith.constant dense<0.000000e+00> : vector<8x128xf32>
    %641 = tpu.matmul %640, %12, %cst_137 {dimension_numbers = #tpu.dot_dimension_numbers<[1], [0], [0], [1], [0, 0, 1, 1], [], []>} : vector<8x64xf32>, vector<64x128xf32>, vector<8x128xf32> -> vector<8x128xf32>
    %642 = vector.broadcast %13 : vector<1x128xf32> to vector<8x128xf32>
    %643 = arith.addf %641, %642 : vector<8x128xf32>
    %c5_138 = arith.constant 5 : index
    %c0_139 = arith.constant 0 : index
    %c0_140 = arith.constant 0 : index
    %644 = vector.load %arg3[%c5_138, %c0_139, %c0_140] : memref<8x8x128xf32, #tpu.memory_space<vmem>>, vector<1x8x128xf32>
    %645 = vector.shape_cast %644 : vector<1x8x128xf32> to vector<8x128xf32>
    %646 = vector.shape_cast %643 : vector<8x128xf32> to vector<1x8x128xf32>
    tpu.vector_store %arg3[%c5_138, %c0_139, %c0_140], %646 {strides = array<i32>} : memref<8x8x128xf32, #tpu.memory_space<vmem>>, vector<1x8x128xf32>,
    %cst_141 = arith.constant dense<0.000000e+00> : vector<8x128xf32>
    %647 = tpu.matmul %619, %7, %cst_141 {dimension_numbers = #tpu.dot_dimension_numbers<[1], [0], [0], [1], [0, 0, 1, 1], [], []>} : vector<8x32xf32>, vector<32x128xf32>, vector<8x128xf32> -> vector<8x128xf32>
    %648 = arith.addf %372, %647 : vector<8x128xf32>
    %649 = vector.extract_strided_slice %648 {offsets = [0, 0], sizes = [8, 96], strides = [1, 1]} : vector<8x128xf32> to vector<8x96xf32>
    %650 = arith.negf %649 : vector<8x96xf32>
    %651 = math.exp %650 : vector<8x96xf32>
    %cst_142 = arith.constant 1.000000e+00 : f32
    %652 = vector.broadcast %cst_142 : f32 to vector<8x96xf32>
    %653 = arith.addf %652, %651 : vector<8x96xf32>
    %654 = arith.divf %652, %653 : vector<8x96xf32>
    %655 = vector.extract_strided_slice %648 {offsets = [0, 96], sizes = [8, 32], strides = [1, 1]} : vector<8x128xf32> to vector<8x32xf32>
    %656 = math.tanh %655 : vector<8x32xf32>
    %657 = vector.extract_strided_slice %654 {offsets = [0, 0], sizes = [8, 32], strides = [1, 1]} : vector<8x96xf32> to vector<8x32xf32>
    %658 = vector.extract_strided_slice %654 {offsets = [0, 32], sizes = [8, 32], strides = [1, 1]} : vector<8x96xf32> to vector<8x32xf32>
    %659 = vector.extract_strided_slice %654 {offsets = [0, 64], sizes = [8, 32], strides = [1, 1]} : vector<8x96xf32> to vector<8x32xf32>
    %660 = arith.mulf %658, %617 : vector<8x32xf32>
    %661 = arith.mulf %657, %656 : vector<8x32xf32>
    %662 = arith.addf %660, %661 : vector<8x32xf32>
    %663 = math.tanh %662 : vector<8x32xf32>
    %664 = arith.mulf %659, %663 : vector<8x32xf32>
    %cst_143 = arith.constant dense<0.000000e+00> : vector<8x256xf32>
    %665 = tpu.matmul %664, %9, %cst_143 {dimension_numbers = #tpu.dot_dimension_numbers<[1], [0], [0], [1], [0, 0, 1, 1], [], []>} : vector<8x32xf32>, vector<32x256xf32>, vector<8x256xf32> -> vector<8x256xf32>
    %666 = vector.broadcast %11 : vector<1x256xf32> to vector<8x256xf32>
    %667 = arith.addf %665, %666 : vector<8x256xf32>
    %cst_144 = arith.constant dense<0.000000e+00> : vector<8x256xf32>
    %668 = tpu.matmul %640, %10, %cst_144 {dimension_numbers = #tpu.dot_dimension_numbers<[1], [0], [0], [1], [0, 0, 1, 1], [], []>} : vector<8x64xf32>, vector<64x256xf32>, vector<8x256xf32> -> vector<8x256xf32>
    %669 = arith.addf %667, %668 : vector<8x256xf32>
    %670 = vector.extract_strided_slice %669 {offsets = [0, 0], sizes = [8, 192], strides = [1, 1]} : vector<8x256xf32> to vector<8x192xf32>
    %671 = arith.negf %670 : vector<8x192xf32>
    %672 = math.exp %671 : vector<8x192xf32>
    %cst_145 = arith.constant 1.000000e+00 : f32
    %673 = vector.broadcast %cst_145 : f32 to vector<8x192xf32>
    %674 = arith.addf %673, %672 : vector<8x192xf32>
    %675 = arith.divf %673, %674 : vector<8x192xf32>
    %676 = vector.extract_strided_slice %669 {offsets = [0, 192], sizes = [8, 64], strides = [1, 1]} : vector<8x256xf32> to vector<8x64xf32>
    %677 = math.tanh %676 : vector<8x64xf32>
    %678 = vector.extract_strided_slice %675 {offsets = [0, 0], sizes = [8, 64], strides = [1, 1]} : vector<8x192xf32> to vector<8x64xf32>
    %679 = vector.extract_strided_slice %675 {offsets = [0, 64], sizes = [8, 64], strides = [1, 1]} : vector<8x192xf32> to vector<8x64xf32>
    %680 = vector.extract_strided_slice %675 {offsets = [0, 128], sizes = [8, 64], strides = [1, 1]} : vector<8x192xf32> to vector<8x64xf32>
    %681 = arith.mulf %679, %638 : vector<8x64xf32>
    %682 = arith.mulf %678, %677 : vector<8x64xf32>
    %683 = arith.addf %681, %682 : vector<8x64xf32>
    %684 = math.tanh %683 : vector<8x64xf32>
    %685 = arith.mulf %680, %684 : vector<8x64xf32>
    %cst_146 = arith.constant dense<0.000000e+00> : vector<8x128xf32>
    %686 = tpu.matmul %685, %12, %cst_146 {dimension_numbers = #tpu.dot_dimension_numbers<[1], [0], [0], [1], [0, 0, 1, 1], [], []>} : vector<8x64xf32>, vector<64x128xf32>, vector<8x128xf32> -> vector<8x128xf32>
    %687 = vector.broadcast %13 : vector<1x128xf32> to vector<8x128xf32>
    %688 = arith.addf %686, %687 : vector<8x128xf32>
    %c6_147 = arith.constant 6 : index
    %c0_148 = arith.constant 0 : index
    %c0_149 = arith.constant 0 : index
    %689 = vector.load %arg3[%c6_147, %c0_148, %c0_149] : memref<8x8x128xf32, #tpu.memory_space<vmem>>, vector<1x8x128xf32>
    %690 = vector.shape_cast %689 : vector<1x8x128xf32> to vector<8x128xf32>
    %691 = vector.shape_cast %688 : vector<8x128xf32> to vector<1x8x128xf32>
    tpu.vector_store %arg3[%c6_147, %c0_148, %c0_149], %691 {strides = array<i32>} : memref<8x8x128xf32, #tpu.memory_space<vmem>>, vector<1x8x128xf32>,
    %cst_150 = arith.constant dense<0.000000e+00> : vector<8x128xf32>
    %692 = tpu.matmul %664, %7, %cst_150 {dimension_numbers = #tpu.dot_dimension_numbers<[1], [0], [0], [1], [0, 0, 1, 1], [], []>} : vector<8x32xf32>, vector<32x128xf32>, vector<8x128xf32> -> vector<8x128xf32>
    %693 = arith.addf %372, %692 : vector<8x128xf32>
    %694 = vector.extract_strided_slice %693 {offsets = [0, 0], sizes = [8, 96], strides = [1, 1]} : vector<8x128xf32> to vector<8x96xf32>
    %695 = arith.negf %694 : vector<8x96xf32>
    %696 = math.exp %695 : vector<8x96xf32>
    %cst_151 = arith.constant 1.000000e+00 : f32
    %697 = vector.broadcast %cst_151 : f32 to vector<8x96xf32>
    %698 = arith.addf %697, %696 : vector<8x96xf32>
    %699 = arith.divf %697, %698 : vector<8x96xf32>
    %700 = vector.extract_strided_slice %693 {offsets = [0, 96], sizes = [8, 32], strides = [1, 1]} : vector<8x128xf32> to vector<8x32xf32>
    %701 = math.tanh %700 : vector<8x32xf32>
    %702 = vector.extract_strided_slice %699 {offsets = [0, 0], sizes = [8, 32], strides = [1, 1]} : vector<8x96xf32> to vector<8x32xf32>
    %703 = vector.extract_strided_slice %699 {offsets = [0, 32], sizes = [8, 32], strides = [1, 1]} : vector<8x96xf32> to vector<8x32xf32>
    %704 = vector.extract_strided_slice %699 {offsets = [0, 64], sizes = [8, 32], strides = [1, 1]} : vector<8x96xf32> to vector<8x32xf32>
    %705 = arith.mulf %703, %662 : vector<8x32xf32>
    %706 = arith.mulf %702, %701 : vector<8x32xf32>
    %707 = arith.addf %705, %706 : vector<8x32xf32>
    %708 = math.tanh %707 : vector<8x32xf32>
    %709 = arith.mulf %704, %708 : vector<8x32xf32>
    %cst_152 = arith.constant dense<0.000000e+00> : vector<8x256xf32>
    %710 = tpu.matmul %709, %9, %cst_152 {dimension_numbers = #tpu.dot_dimension_numbers<[1], [0], [0], [1], [0, 0, 1, 1], [], []>} : vector<8x32xf32>, vector<32x256xf32>, vector<8x256xf32> -> vector<8x256xf32>
    %711 = vector.broadcast %11 : vector<1x256xf32> to vector<8x256xf32>
    %712 = arith.addf %710, %711 : vector<8x256xf32>
    %cst_153 = arith.constant dense<0.000000e+00> : vector<8x256xf32>
    %713 = tpu.matmul %685, %10, %cst_153 {dimension_numbers = #tpu.dot_dimension_numbers<[1], [0], [0], [1], [0, 0, 1, 1], [], []>} : vector<8x64xf32>, vector<64x256xf32>, vector<8x256xf32> -> vector<8x256xf32>
    %714 = arith.addf %712, %713 : vector<8x256xf32>
    %715 = vector.extract_strided_slice %714 {offsets = [0, 0], sizes = [8, 192], strides = [1, 1]} : vector<8x256xf32> to vector<8x192xf32>
    %716 = arith.negf %715 : vector<8x192xf32>
    %717 = math.exp %716 : vector<8x192xf32>
    %cst_154 = arith.constant 1.000000e+00 : f32
    %718 = vector.broadcast %cst_154 : f32 to vector<8x192xf32>
    %719 = arith.addf %718, %717 : vector<8x192xf32>
    %720 = arith.divf %718, %719 : vector<8x192xf32>
    %721 = vector.extract_strided_slice %714 {offsets = [0, 192], sizes = [8, 64], strides = [1, 1]} : vector<8x256xf32> to vector<8x64xf32>
    %722 = math.tanh %721 : vector<8x64xf32>
    %723 = vector.extract_strided_slice %720 {offsets = [0, 0], sizes = [8, 64], strides = [1, 1]} : vector<8x192xf32> to vector<8x64xf32>
    %724 = vector.extract_strided_slice %720 {offsets = [0, 64], sizes = [8, 64], strides = [1, 1]} : vector<8x192xf32> to vector<8x64xf32>
    %725 = vector.extract_strided_slice %720 {offsets = [0, 128], sizes = [8, 64], strides = [1, 1]} : vector<8x192xf32> to vector<8x64xf32>
    %726 = arith.mulf %724, %683 : vector<8x64xf32>
    %727 = arith.mulf %723, %722 : vector<8x64xf32>
    %728 = arith.addf %726, %727 : vector<8x64xf32>
    %729 = math.tanh %728 : vector<8x64xf32>
    %730 = arith.mulf %725, %729 : vector<8x64xf32>
    %cst_155 = arith.constant dense<0.000000e+00> : vector<8x128xf32>
    %731 = tpu.matmul %730, %12, %cst_155 {dimension_numbers = #tpu.dot_dimension_numbers<[1], [0], [0], [1], [0, 0, 1, 1], [], []>} : vector<8x64xf32>, vector<64x128xf32>, vector<8x128xf32> -> vector<8x128xf32>
    %732 = vector.broadcast %13 : vector<1x128xf32> to vector<8x128xf32>
    %733 = arith.addf %731, %732 : vector<8x128xf32>
    %c7_156 = arith.constant 7 : index
    %c0_157 = arith.constant 0 : index
    %c0_158 = arith.constant 0 : index
    %734 = vector.load %arg3[%c7_156, %c0_157, %c0_158] : memref<8x8x128xf32, #tpu.memory_space<vmem>>, vector<1x8x128xf32>
    %735 = vector.shape_cast %734 : vector<1x8x128xf32> to vector<8x128xf32>
    %736 = vector.shape_cast %733 : vector<8x128xf32> to vector<1x8x128xf32>
    tpu.vector_store %arg3[%c7_156, %c0_157, %c0_158], %736 {strides = array<i32>} : memref<8x8x128xf32, #tpu.memory_space<vmem>>, vector<1x8x128xf32>,
    return
  }
  func.func @transform_0(%arg0: i32) -> (i32, i32, i32) {
    %c0_i32 = arith.constant 0 : i32
    %c0_i32_0 = arith.constant 0 : i32
    %c0_i32_1 = arith.constant 0 : i32
    return %c0_i32, %arg0, %c0_i32_0 : i32, i32, i32
  }
  func.func @transform_1(%arg0: i32) -> (i32, i32) {
    %c0_i32 = arith.constant 0 : i32
    %c0_i32_0 = arith.constant 0 : i32
    %c0_i32_1 = arith.constant 0 : i32
    return %c0_i32, %c0_i32_0 : i32, i32
  }
  func.func @transform_2(%arg0: i32) -> (i32, i32, i32) {
    %c0_i32 = arith.constant 0 : i32
    %c0_i32_0 = arith.constant 0 : i32
    %c0_i32_1 = arith.constant 0 : i32
    return %c0_i32, %arg0, %c0_i32_0 : i32, i32, i32
  }
}

</mosaic_0001>

<bundles_post_ra>
// kernel: forward.1
= control target key start
LH: loop header
LB: loop body
LE: loop exit
PB: predicated region body
PF: predicated region fallthrough
CT: control target
= control target key end

     0   :  { %7 = vsyncpa [#allocation4], 0  ;;  %s8391_s9 = smov 0   ;;  %s8393_s10 = smov 0   ;;  %s9567_s0 = inlined_call_operand.vmem [shape: f32[8,16,128], index: 0, kind: input, shape index: {}]   ;;  %s9568_s1 = inlined_call_operand.hbm [shape: f32[552,256], index: 1, kind: input, shape index: {}]   ;;  %s9569_s2 = inlined_call_operand.vmem [shape: f32[8,16,128], index: 2, kind: output, shape index: {}]  }
   0x1   :  { %s8395_s11 = smov 0  }
   0x2 LB: > { %s8407_s12 = sadd.s32 4294967295, %s8366_s11   ;;  %s8410_s13 = sadd.s32 1, %s8366_s11   ;;  %s8366_s11 = sphi %s8395_s11, %s9583_s11   ;;  %s8362_s10 = sphi %s8393_s10, %s9582_s10   ;;  %s8358_s9 = sphi %s8391_s9, %s9581_s9  }
   0x3   : > { %s17_s14 = ssub.s32 %s8366_s11, %s8410_s13  ;;  %s20_s15 = sadd.s32 1, %s8362_s10 }
   0x4   : > { %p18_p0 = scmp.eq.s32.totalorder %s17_s14, 0  ;;  %p27_p1 = scmp.ne.s32.totalorder %s8362_s10, %s8358_s9 }
   0x5   : > { %p28_p2 = scmp.eq.s32.totalorder %s8366_s11, 0  ;;  %p78_p3 = scmp.eq.s32.totalorder %s8407_s12, 1 }
   0x6   : > { %s8420_s16 = scalar_select %p18_p0, %s8362_s10, %s20_s15  }
   0x7   : > { %p8422_p4 = por %p28_p2, %p27_p1  ;;  %p8426_p5 = por %p78_p3, %p27_p1 }
   0x8   : > { %p6142_p6 = scmp.ge.s32.totalorder %s8366_s11, 1  ;;  %p91_p7 = scmp.lt.s32.totalorder %s8366_s11, 3 }
   0x9   : > { %s9572_s17 = scalar_select %p8422_p4, 1, 0 }
   0xa   : > { %s9573_s18 = scalar_select %p8426_p5, 1, 0 }
   0xb   : > { %p9570_p8 = scmp.eq.s32.totalorder %s8407_s12, 0  ;;  %p8433_p9 = pnand %p6142_p6, %p91_p7 }
   0xc   : > { %s8368_s20 = smov [#allocation3]   ;;  %s8312_s25 = scalar_lea.hbm %s9568_s1, 17664 }
   0xd   : > { %s9574_s19 = scalar_select %p8433_p9, 1, 0 }
   0xe   : > { %s103_s21 = sshll.u32 %s8368_s20, 4  ;;  %p7952_p10 = pneg %p8433_p9  ;;  %s104_s21 = int_to_ptr.vmem [resolvable:$true] %s103_s21 }
   0xf   : > { %p8313_p12 = scmp.ne.s32.totalorder %s9568_s1, %s8312_s25  ;;  %p8319_p2 = scmp.lt.u32.totalorder %s8312_s25, %s9568_s1 }
  0x10   : > { %p8441_p11 = pnand %p9570_p8, %p7952_p10 }
  0x12   : > { %p8314_p13 = pneg %p8441_p11 }
  0x14   : > { %p8315_p0 = pnand %p8314_p13, %p8313_p12 }
  0x16   : > { %p8316_p1 = pneg %p8315_p0 }
  0x18   : > { %p8321_p3 = pnand %p8319_p2, %p8316_p1 }
  0x1a   : > { %8324 = shalt.err (!%p8321_p3)
}
  0x1b   : > { %s8325_s30 = scalar_lea.vmem %s104_s21, 17664  ;;  %p8333_p8 = scmp.lt.s32.totalorder %s104_s21, %s104_s21 }
  0x1c   : > { %p8326_p6 = scmp.ne.s32.totalorder %s104_s21, %s8325_s30  ;;  %p8334_p5 = scmp.lt.s32.totalorder %s8325_s30, %s8325_s30 }
  0x1e   : > { %p8328_p7 = pnand %p8326_p6, %p8314_p13  ;;  %p8335_p9 = por %p8334_p5, %p8333_p8 }
  0x20   : > { %p8329_p10 = pneg %p8328_p7 }
  0x22   : > { %p8336_p4 = pnand %p8335_p9, %p8329_p10 }
  0x24   : > { %8339 = shalt.err (!%p8336_p4)
}
  0x25   : > { %s8369_s3 = smov 256   ;;  %s8370_s4 = smov 16  }
  0x26   : > { %7955 = dma.hbm_to_vmem [thread:$0]  (!%p8441_p11), %s9568_s1, 17664, %s104_s21, [#allocation4], %s8369_s3, %s8369_s3, %s8370_s4  }
  0x27   : > { %p6144_p12 = scmp.ge.s32.totalorder %s8366_s11, 2 }
  0x28   : > { %p9576_p0 = scmp.ne.s32.totalorder (!%p6144_p12), %s9572_s17, 0 }
  0x29   : > { %113 = sbr.rel (%p6144_p12) target bundleno = 56 (0x38), region = 20 }
  0x30   : > { %116 = sbr.rel (!%p9576_p0) target bundleno = 56 (0x38), region = 24  ;;  %s118_s7 = sand.u32 (%p9576_p0), 1, %s8362_s10  }
  0x31   : > { %s6146_s8 = sshll.u32 (%p9576_p0), %s8366_s11, 3  ;;  %s6145_s14 = sshll.u32 (%p9576_p0), %s118_s7, 6 }
  0x32   : > { %s122_s23 = scalar_lea.vmem (%p9576_p0), %s9567_s0, %s6146_s8  ;;  %s120_s22 = scalar_lea.vmem (%p9576_p0), [#allocation2], %s6145_s14 }
  0x33   : > { %v164_v0 = vld [vmem:[%s122_s23] sm:$0xff] (%p9576_p0)  ;;  %v166_v1 = vld [vmem:[%s122_s23 + $0x10] sm:$0xff] (%p9576_p0) }
  0x34   : > { %v168_v2 = vld [vmem:[%s122_s23 + $0x20] sm:$0xff] (%p9576_p0)  ;;  %165 = vst [vmem:[%s120_s22] sm:$0xff] (%p9576_p0), %v164_v0  ;;  %167 = vst [vmem:[%s120_s22 + $0x8] sm:$0xff] (%p9576_p0), %v166_v1  ;;  %v170_v3 = vld [vmem:[%s122_s23 + $0x30] sm:$0xff] (%p9576_p0) }
  0x35   : > { %169 = vst [vmem:[%s120_s22 + $0x10] sm:$0xff] (%p9576_p0), %v168_v2  ;;  %v172_v4 = vld [vmem:[%s122_s23 + $0x40] sm:$0xff] (%p9576_p0)  ;;  %v174_v5 = vld [vmem:[%s122_s23 + $0x50] sm:$0xff] (%p9576_p0)  ;;  %171 = vst [vmem:[%s120_s22 + $0x18] sm:$0xff] (%p9576_p0), %v170_v3 }
  0x36   : > { %173 = vst [vmem:[%s120_s22 + $0x20] sm:$0xff] (%p9576_p0), %v172_v4  ;;  %175 = vst [vmem:[%s120_s22 + $0x28] sm:$0xff] (%p9576_p0), %v174_v5  ;;  %v176_v6 = vld [vmem:[%s122_s23 + $0x60] sm:$0xff] (%p9576_p0)  ;;  %v178_v7 = vld [vmem:[%s122_s23 + $0x70] sm:$0xff] (%p9576_p0) }
  0x37   : > { %177 = vst [vmem:[%s120_s22 + $0x30] sm:$0xff] %v176_v6  ;;  %179 = vst [vmem:[%s120_s22 + $0x38] sm:$0xff] %v178_v7 }
  0x38 PF: > { %p9577_p4 = scmp.ne.s32.totalorder %s9574_s19, 0 }
  0x39   : > { %s191_s11 = sand.u32 (!%p9577_p4), 1, %s8358_s9   ;;  %p9578_p5 = scmp.eq.s32.totalorder (!%p9577_p4), %s8407_s12, 0 }
  0x3a   : > { %188 = sbr.rel (%p9577_p4) target bundleno = 17058 (0x42a2), region = 62  ;;  %s8472_s17 = sshll.u32 (!%p9577_p4), %s191_s11, 6 }
  0x3b   : > { %s8475_s21 = scalar_lea.vmem (!%p9577_p4), [#allocation2], %s8472_s17 }
  0x41   : > { %8353 = dma.done.wait (%p9578_p5), [#allocation4], 17664   ;;  %p9579_p8 = pmov %p9578_p5 }
  0x42   : > { %v8371_v8 = vmov 0.0   ;;  %v216_v9 = vld [vmem:[#allocation3 + $0x8] sm:$0xff]  ;;  %v218_v10 = vld [vmem:[#allocation3 + $0x18] sm:$0xff]  ;;  %v215_v11 = vld [vmem:[#allocation3] sm:$0xff]  ;;  %s8372_s9 = smov 64   ;;  %vm8374_vm0 = vmmov 0  }
  0x43   : > { %8355 = vsyncadd (%p9579_p8), [#allocation4], 4294949632  ;;  %398 = vmatprep.mubr.f32.mxu0 %v8371_v8  ;;  %v8482_v12 = vpack.c.bf16 %v218_v10, %v216_v9  ;;  %v217_v13 = vld [vmem:[#allocation3 + $0x10] sm:$0xff]  ;;  %v220_v14 = vld [vmem:[#allocation3 + $0x28] sm:$0xff]  ;;  %6515 = vmatprep.mubr.msk.f32.mxu1 %vm8374_vm0, %v8371_v8  ;;  %vm405_vm1 = vcmask 523264   ;;  %s8375_s19 = smov 32  }
  0x44   : > { %v222_v15 = vld [vmem:[#allocation3 + $0x38] sm:$0xff]  ;;  %v8484_v16 = vpack.c.bf16 %v217_v13, %v215_v11  ;;  %v219_v18 = vld [vmem:[#allocation3 + $0x20] sm:$0xff]  ;;  %v221_v19 = vld [vmem:[#allocation3 + $0x30] sm:$0xff]  ;;  %vm585_vm2 = vcmask 261120   ;;  %s9190_s24 = scalar_lea.vmem [#allocation5], %s8472_s17  ;;  %p9580_p9 = scmp.ne.s32.totalorder %s9573_s18, 0 }
  0x45   : > { %v8486_v17 = vpack.c.bf16 %v222_v15, %v220_v14  ;;  %v224_v20 = vld [vmem:[#allocation3 + $0x48] sm:$0xff]  ;;  %6991 = vmatprep.subr.bf16.mxu0 %v8482_v12  ;;  %v226_v21 = vld [vmem:[#allocation3 + $0x58] sm:$0xff]  ;;  %v8490_v22 = vpack.c.bf16 %v221_v19, %v219_v18  ;;  %v223_v24 = vld [vmem:[#allocation3 + $0x40] sm:$0xff]  ;;  %s6267_s25 = sshll.u32 (%p9580_p9), %s8407_s12, 3 }
  0x46   : > { %6993 = vmatpush1.bf16.msra.mxu0 %v8484_v16  ;;  %v8493_v23 = vpack.c.bf16 %v226_v21, %v224_v20  ;;  %v225_v25 = vld [vmem:[#allocation3 + $0x50] sm:$0xff]  ;;  %v228_v26 = vld [vmem:[#allocation3 + $0x68] sm:$0xff]  ;;  %v230_v27 = vld [vmem:[#allocation3 + $0x78] sm:$0xff]  ;;  %s6011_s28 = scalar_lea.vmem (%p9580_p9), %s9569_s2, %s6267_s25 }
  0x47   : > { %6995 = vmatprep.subr.bf16.mxu0 %v8486_v17  ;;  %v8496_v28 = vpack.c.bf16 %v225_v25, %v223_v24  ;;  %v8499_v29 = vpack.c.bf16 %v230_v27, %v228_v26  ;;  %v227_v30 = vld [vmem:[#allocation3 + $0x60] sm:$0xff]  ;;  %v229_v31 = vld [vmem:[#allocation3 + $0x70] sm:$0xff]  ;;  %v232_v32 = vld [vmem:[#allocation3 + $0x88] sm:$0xff]  ;;  %v324_v24 = vlaneseq }
  0x48   : > { %v234_v33 = vld [vmem:[#allocation3 + $0x98] sm:$0xff]  ;;  %v8502_v34 = vpack.c.bf16 %v229_v31, %v227_v30  ;;  %v231_v36 = vld [vmem:[#allocation3 + $0x80] sm:$0xff]  ;;  %v233_v37 = vld [vmem:[#allocation3 + $0x90] sm:$0xff] }
  0x49   : > { %v8505_v35 = vpack.c.bf16 %v234_v33, %v232_v32  ;;  %v236_v38 = vld [vmem:[#allocation3 + $0xa8] sm:$0xff]  ;;  %v238_v39 = vld [vmem:[#allocation3 + $0xb8] sm:$0xff]  ;;  %v8508_v40 = vpack.c.bf16 %v233_v37, %v231_v36  ;;  %v235_v42 = vld [vmem:[#allocation3 + $0xa0] sm:$0xff]  ;;  %v8557_v25 = vshrl.u32 %v324_v24, 7 }
  0x4a   : > { %6997 = vmatpush1.bf16.msra.mxu0 %v8490_v22  ;;  %v8511_v41 = vpack.c.bf16 %v238_v39, %v236_v38  ;;  %v237_v43 = vld [vmem:[#allocation3 + $0xb0] sm:$0xff]  ;;  %v240_v44 = vld [vmem:[#allocation3 + $0xc8] sm:$0xff]  ;;  %v242_v45 = vld [vmem:[#allocation3 + $0xd8] sm:$0xff] }
  0x4b   : > { %6999 = vmatprep.subr.bf16.mxu0 %v8493_v23  ;;  %v8514_v46 = vpack.c.bf16 %v237_v43, %v235_v42  ;;  %v8517_v47 = vpack.c.bf16 %v242_v45, %v240_v44  ;;  %v239_v48 = vld [vmem:[#allocation3 + $0xc0] sm:$0xff]  ;;  %v241_v49 = vld [vmem:[#allocation3 + $0xd0] sm:$0xff]  ;;  %v244_v50 = vld [vmem:[#allocation3 + $0xe8] sm:$0xff]  ;;  %v330_v26 = vsub.s32 1, %v8557_v25  ;;  %v326_v37 = vsub.s32 0, %v8557_v25 }
  0x4c   : > { %v246_v51 = vld [vmem:[#allocation3 + $0xf8] sm:$0xff]  ;;  %v8520_v52 = vpack.c.bf16 %v241_v49, %v239_v48  ;;  %v243_v54 = vld [vmem:[#allocation3 + $0xe0] sm:$0xff]  ;;  %v245_v55 = vld [vmem:[#allocation3 + $0xf0] sm:$0xff] }
  0x4d   : > { %v8523_v53 = vpack.c.bf16 %v246_v51, %v244_v50  ;;  %v248_v56 = vld [vmem:[#allocation3 + $0x108] sm:$0xff]  ;;  %v250_v57 = vld [vmem:[#allocation3 + $0x118] sm:$0xff]  ;;  %v8526_v58 = vpack.c.bf16 %v245_v55, %v243_v54  ;;  %v247_v60 = vld [vmem:[#allocation3 + $0x100] sm:$0xff]  ;;  %v8373_v55 = vmov 0.0|0.0  }
  0x4e   : > { %7001 = vmatpush1.bf16.msra.mxu0 %v8496_v28  ;;  %v8529_v59 = vpack.c.bf16 %v250_v57, %v248_v56  ;;  %v249_v61 = vld [vmem:[#allocation3 + $0x110] sm:$0xff]  ;;  %v252_v62 = vld [vmem:[#allocation3 + $0x128] sm:$0xff]  ;;  %v254_v63 = vld [vmem:[#allocation3 + $0x138] sm:$0xff]  ;;  %7038 = vmatprep.subr.bf16.mxu1 %v8373_v55 }
  0x4f   : > { %7003 = vmatprep.subr.bf16.mxu0 %v8499_v29  ;;  %v322_v0 = vld [vmem:[%s8475_s21] sm:$0xff]  ;;  %v8533_v1 = vpack.c.bf16 %v249_v61, %v247_v60  ;;  %v8536_v2 = vpack.c.bf16 %v254_v63, %v252_v62  ;;  %v253_v4 = vld [vmem:[#allocation3 + $0x130] sm:$0xff]  ;;  %v256_v5 = vld [vmem:[#allocation3 + $0x148] sm:$0xff] }
  0x50   : > { %v251_v3 = vld [vmem:[#allocation3 + $0x120] sm:$0xff]  ;;  %v258_v6 = vld [vmem:[#allocation3 + $0x158] sm:$0xff]  ;;  %v257_v11 = vld [vmem:[#allocation3 + $0x150] sm:$0xff] }
  0x51   : > { %v8539_v7 = vpack.c.bf16 %v253_v4, %v251_v3  ;;  %v8543_v9 = vpack.c.bf16 %v258_v6, %v256_v5  ;;  %v255_v10 = vld [vmem:[#allocation3 + $0x140] sm:$0xff]  ;;  %v260_v13 = vld [vmem:[#allocation3 + $0x168] sm:$0xff]  ;;  %v262_v14 = vld [vmem:[#allocation3 + $0x178] sm:$0xff] }
  0x52   : > { %7005 = vmatpush1.bf16.msra.mxu0 %v8502_v34  ;;  %v8546_v15 = vpack.c.bf16 %v257_v11, %v255_v10  ;;  %v8549_v18 = vpack.c.bf16 %v262_v14, %v260_v13  ;;  %v259_v19 = vld [vmem:[#allocation3 + $0x160] sm:$0xff]  ;;  %v261_v20 = vld [vmem:[#allocation3 + $0x170] sm:$0xff] }
  0x53   : > { %7007 = vmatprep.subr.bf16.mxu0 %v8505_v35  ;;  %v8552_v21 = vpack.c.bf16 %v261_v20, %v259_v19  ;;  %v264_v27 = vld [vmem:[#allocation3 + $0x180] ss:$8 sm:$0x3]  ;;  %v265_v50 = vld [vmem:[#allocation3 + $0x190] sm:$0xff] }
  0x54   : > { %v8562_v30 = vrot.slane %v264_v27, %v330_v26  ;;  %v8569_v38 = vrot.slane %v264_v27, %v326_v37  ;;  %v266_v51 = vld [vmem:[#allocation3 + $0x1a0] sm:$0xff]  ;;  %v267_v54 = vld [vmem:[#allocation3 + $0x1b0] sm:$0xff] }
  0x55   : > { %v8574_v56 = vpack.c.bf16 %v266_v51, %v265_v50  ;;  %v268_v57 = vld [vmem:[#allocation3 + $0x1c0] sm:$0xff]  ;;  %v269_v61 = vld [vmem:[#allocation3 + $0x1d0] sm:$0xff] }
  0x56   : > { %7009 = vmatpush1.bf16.msra.mxu0 %v8508_v40  ;;  %v8578_v60 = vpack.c.bf16 %v268_v57, %v267_v54  ;;  %v270_v62 = vld [vmem:[#allocation3 + $0x1e0] sm:$0xff]  ;;  %v273_v20 = vld [vmem:[#allocation3 + $0x210] sm:$0xff] }
  0x57   : > { %7011 = vmatprep.subr.bf16.mxu0 %v8511_v41  ;;  %7040 = vmatpush3.bf16.msra.mxu1 %v8574_v56  ;;  %v8584_v63 = vpack.c.bf16 %v270_v62, %v269_v61  ;;  %v272_v3 = vld [vmem:[#allocation3 + $0x200] sm:$0xff]  ;;  %v316_v25 = vld [vmem:[#allocation3 + $0x3f0] sm:$0xff] }
  0x58   : > { %7041 = vmatprep.subr.bf16.mxu1 %v8373_v55  ;;  %v274_v24 = vld [vmem:[#allocation3 + $0x220] sm:$0xff] }
  0x5a   : > { %7013 = vmatpush1.bf16.msra.mxu0 %v8514_v46 }
  0x5b   : > { %7015 = vmatprep.subr.bf16.mxu0 %v8517_v47  ;;  %7043 = vmatpush3.bf16.msra.mxu1 %v8578_v60 }
  0x5c   : > { %7044 = vmatprep.subr.bf16.mxu1 %v8373_v55 }
  0x5e   : > { %7017 = vmatpush1.bf16.msra.mxu0 %v8520_v52 }
  0x5f   : > { %7019 = vmatprep.subr.bf16.mxu0 %v8523_v53  ;;  %7046 = vmatpush3.bf16.msra.mxu1 %v8584_v63 }
  0x60   : > { %7047 = vmatprep.subr.bf16.mxu1 %v8373_v55 }
  0x62   : > { %7021 = vmatpush1.bf16.msra.mxu0 %v8526_v58 }
  0x63   : > { %7023 = vmatprep.subr.bf16.mxu0 %v8529_v59 }
  0x65   : > { %399 = vmatmul.mubr.f32.vlgmr.msra.gmra.mrb[0].mxu0 %v322_v0  ;;  %v271_v0 = vld [vmem:[#allocation3 + $0x1f0] sm:$0xff] }
  0x66   : > { %7025 = vmatpush1.bf16.msra.mxu0 %v8533_v1  ;;  %473 = vmatprep.mubr.f32.mxu0 %v8371_v8  ;;  %v8590_v4 = vpack.c.bf16 %v272_v3, %v271_v0 }
  0x67   : > { %7027 = vmatprep.subr.bf16.mxu0 %v8536_v2 }
  0x68   : > { %7049 = vmatpush3.bf16.msra.mxu1 %v8590_v4 }
  0x69   : > { %7050 = vmatprep.subr.bf16.mxu1 %v8373_v55 }
  0x6a   : > { %7029 = vmatpush1.bf16.msra.mxu0 %v8539_v7 }
  0x6b   : > { %7031 = vmatprep.subr.bf16.mxu0 %v8543_v9 }
  0x6e   : > { %7033 = vmatpush1.bf16.msra.mxu0 %v8546_v15 }
  0x6f   : > { %7035 = vmatprep.subr.bf16.mxu0 %v8549_v18 }
  0x72   : > { %7037 = vmatpush1.bf16.msra.mxu0 %v8552_v21 }
  0x73   : > { %7104 = vmatprep.subr.bf16.mxu0 %v8373_v55 }
  0x75   : > { %474 = vmatmul.mubr.f32.vlgmr.msra.gmra.mrb[0].mxu0 %v8371_v8 }
  0x76   : > { %7106 = vmatpush3.bf16.msra.mxu0 %v8574_v56  ;;  %6545 = vmatprep.mubr.msk.f32.mxu0 %vm8374_vm0, %v8371_v8 }
  0x77   : > { %7107 = vmatprep.subr.bf16.mxu0 %v8373_v55 }
  0x7a   : > { %7109 = vmatpush3.bf16.msra.mxu0 %v8578_v60 }
  0x7b   : > { %7110 = vmatprep.subr.bf16.mxu0 %v8373_v55 }
  0x7e   : > { %7112 = vmatpush3.bf16.msra.mxu0 %v8584_v63 }
  0x7f   : > { %7113 = vmatprep.subr.bf16.mxu0 %v8373_v55 }
  0x82   : > { %7115 = vmatpush3.bf16.msra.mxu0 %v8590_v4 }
  0x83   : > { %7116 = vmatprep.subr.bf16.mxu0 %v8373_v55 }
 0x148   : > { %v475_v31 = vpop.f32.mrb[0].mxu0 }
 0x149   : > { %v477_v32 = vpop.f32.mrb[1].mxu0  ;;  %v7860_v39 = vadd.f32 %v475_v31, %v8569_v38 }
 0x14a   : > { %v7861_v33 = vadd.f32 %v477_v32, %v8562_v30  ;;  %v8607_v32 = vpack.c.bf16 %v274_v24, %v273_v20 }
 0x14b   : > { %v6151_v42 = vmul.f32 -1.442695, %v7860_v39  ;;  %v275_v39 = vld [vmem:[#allocation3 + $0x230] sm:$0xff] }
 0x14c   : > { %7990 = vtanh.f32 %v7861_v33  ;;  %v6152_v13 = vmul.f32 -1.442695, %v7861_v33  ;;  %v6155_v33 = vld [vmem:[%s8475_s21 + $0x8] sm:$0xff] }
 0x14d   : > { %7992 = vpow2.f32 %v6151_v42  ;;  %v276_v42 = vld [vmem:[#allocation3 + $0x240] sm:$0xff] }
 0x156   : > { %v7991_v36 = vpop.eup %7990 }
 0x157   : > { %497 = vrot.lane.b32.xlu0 %v7991_v36, %s8372_s9  ;;  %v7993_v43 = vpop.eup %7992 }
 0x158   : > { %v488_v44 = vadd.f32 1.0, %v7993_v43  ;;  %v8611_v43 = vpack.c.bf16 %v276_v42, %v275_v39 }
 0x15a   : > { %7994 = vrcp.f32 %v488_v44  ;;  %v8657_v44 = vld [vmem:[#allocation3 + $0x250] ss:$0 sm:$0xff] }
 0x164   : > { %v7995_v45 = vpop.eup %7994 }
 0x165   : > { %v495_v5 = vmul.f32 0.0, %v7995_v45 }
 0x1c9   : > { %v498_v48 = vpop.permute.xlu0 %497 }
 0x1ca   : > { %v500_v49 = vmul.f32 %v7995_v45, %v498_v48 }
 0x1cc   : > { %502 = vrot.lane.b32.xlu0 %v500_v49, %s8372_s9 }
 0x23e   : > { %v503_v6 = vpop.permute.xlu0 %502 }
 0x23f   : > { %v8599_v10 = vadd.f32 %v503_v6, %v495_v5 }
 0x241   : > { %7996 = vtanh.f32 %v8599_v10 }
 0x242   : > { %7998 = vpow2.f32 %v6152_v13 }
 0x24b   : > { %v7997_v11 = vpop.eup %7996 }
 0x24c   : > { %508 = vrot.lane.b32.xlu1 %v7997_v11, %s8372_s9  ;;  %v7999_v14 = vpop.eup %7998 }
 0x24d   : > { %v489_v19 = vadd.f32 1.0, %v7999_v14 }
 0x24f   : > { %8000 = vrcp.f32 %v489_v19 }
 0x259   : > { %v8001_v27 = vpop.eup %8000 }
 0x2be   : > { %v509_v31 = vpop.permute.xlu1 %508 }
 0x2bf   : > { %v511_v36 = vmul.f32 %v8001_v27, %v509_v31 }
 0x2c1   : > { %6516 = vmatmul.mubr.msk.f32.vlgmr.msra.gmra.mrb[0].mxu1 %vm405_vm1, %v511_v36 }
 0x2c2   : > { %7052 = vmatpush3.bf16.msra.mxu1 %v8607_v32  ;;  %6526 = vmatprep.mubr.msk.f32.mxu1 %vm8374_vm0, %v8371_v8 }
 0x2c3   : > { %7053 = vmatprep.subr.bf16.mxu1 %v8373_v55 }
 0x2c6   : > { %7055 = vmatpush3.bf16.msra.mxu1 %v8611_v43 }
 0x2c7   : > { %7057 = vmatprep.subr.bf16.mxu1 %v8482_v12 }
 0x2c9   : > { %6527 = vmatmul.mubr.f32.vlgmr.msra.gmra.mrb[0].mxu1 %v8371_v8 }
 0x2ca   : > { %7059 = vmatpush1.bf16.msra.mxu1 %v8484_v16  ;;  %749 = vmatprep.mubr.f32.mxu1 %v8371_v8 }
 0x2cb   : > { %7061 = vmatprep.subr.bf16.mxu1 %v8486_v17 }
 0x2ce   : > { %7063 = vmatpush1.bf16.msra.mxu1 %v8490_v22 }
 0x2cf   : > { %7065 = vmatprep.subr.bf16.mxu1 %v8493_v23 }
 0x2d2   : > { %7067 = vmatpush1.bf16.msra.mxu1 %v8496_v28 }
 0x2d3   : > { %7069 = vmatprep.subr.bf16.mxu1 %v8499_v29 }
 0x2d6   : > { %7071 = vmatpush1.bf16.msra.mxu1 %v8502_v34 }
 0x2d7   : > { %7073 = vmatprep.subr.bf16.mxu1 %v8505_v35 }
 0x2da   : > { %7075 = vmatpush1.bf16.msra.mxu1 %v8508_v40 }
 0x2db   : > { %7077 = vmatprep.subr.bf16.mxu1 %v8511_v41 }
 0x2de   : > { %7079 = vmatpush1.bf16.msra.mxu1 %v8514_v46 }
 0x2df   : > { %7081 = vmatprep.subr.bf16.mxu1 %v8517_v47 }
 0x2e2   : > { %7083 = vmatpush1.bf16.msra.mxu1 %v8520_v52 }
 0x2e3   : > { %7085 = vmatprep.subr.bf16.mxu1 %v8523_v53 }
 0x2e6   : > { %7087 = vmatpush1.bf16.msra.mxu1 %v8526_v58 }
 0x2e7   : > { %7089 = vmatprep.subr.bf16.mxu1 %v8529_v59 }
 0x2e9   : > { %750 = vmatmul.mubr.f32.vlgmr.msra.gmra.mrb[2].mxu1 %v6155_v33 }
 0x2ea   : > { %7091 = vmatpush1.bf16.msra.mxu1 %v8533_v1  ;;  %820 = vmatprep.mubr.f32.mxu1 %v8371_v8 }
 0x2eb   : > { %7093 = vmatprep.subr.bf16.mxu1 %v8536_v2 }
 0x2ee   : > { %7095 = vmatpush1.bf16.msra.mxu1 %v8539_v7 }
 0x2ef   : > { %7097 = vmatprep.subr.bf16.mxu1 %v8543_v9 }
 0x2f2   : > { %7099 = vmatpush1.bf16.msra.mxu1 %v8546_v15 }
 0x2f3   : > { %7101 = vmatprep.subr.bf16.mxu1 %v8549_v18 }
 0x2f6   : > { %7103 = vmatpush1.bf16.msra.mxu1 %v8552_v21 }
 0x2f7   : > { %7170 = vmatprep.subr.bf16.mxu1 %v8373_v55 }
 0x2f9   : > { %6156 = vmatmul.mubr.msk.f32.vlgmr.msra.gmra.mrb[2].mxu1 %vm405_vm1, %v511_v36 }
 0x2fa   : > { %7172 = vmatpush3.bf16.msra.mxu1 %v8574_v56  ;;  %6575 = vmatprep.mubr.msk.f32.mxu1 %vm8374_vm0, %v8371_v8 }
 0x2fb   : > { %7173 = vmatprep.subr.bf16.mxu1 %v8373_v55 }
 0x2fe   : > { %7175 = vmatpush3.bf16.msra.mxu1 %v8578_v60 }
 0x2ff   : > { %7176 = vmatprep.subr.bf16.mxu1 %v8373_v55 }
 0x302   : > { %7178 = vmatpush3.bf16.msra.mxu1 %v8584_v63 }
 0x303   : > { %7179 = vmatprep.subr.bf16.mxu1 %v8373_v55 }
 0x306   : > { %7181 = vmatpush3.bf16.msra.mxu1 %v8590_v4 }
 0x307   : > { %7182 = vmatprep.subr.bf16.mxu1 %v8373_v55 }
 0x39c   : > { %v654_v45 = vpop.f32.mrb[0].mxu1 }
 0x39d   : > { %v7862_v48 = vadd.f32 %v654_v45, %v8657_v44  ;;  %v6528_v49 = vpop.f32.mrb[1].mxu1 }
 0x39f   : > { %8002 = vtanh.f32 %v7862_v48  ;;  %v6154_v62 = vmul.f32 -1.442695, %v7862_v48 }
 0x3a9   : > { %v8003_v50 = vpop.eup %8002 }
 0x3aa   : > { %668 = vrot.lane.b32.xlu1 %v8003_v50, %s8375_s19 }
 0x3cc   : > { %v822_v51 = vpop.f32.mrb[2].mxu1 }
 0x3cd   : > { %v824_v54 = vpop.f32.mrb[3].mxu1  ;;  %v7863_v13 = vadd.f32 %v822_v51, %v8569_v38 }
 0x3ce   : > { %v7864_v57 = vadd.f32 %v824_v54, %v8562_v30 }
 0x3cf   : > { %v6157_v14 = vmul.f32 -1.442695, %v7863_v13 }
 0x3d0   : > { %8004 = vtanh.f32 %v7864_v57 }
 0x3d1   : > { %8006 = vpow2.f32 %v6154_v62 }
 0x3da   : > { %v8005_v61 = vpop.eup %8004 }
 0x3db   : > { %844 = vrot.lane.b32.xlu0 %v8005_v61, %s8372_s9  ;;  %v8007_v0 = vpop.eup %8006  ;;  %v6158_v61 = vmul.f32 -1.442695, %v7864_v57 }
 0x3dc   : > { %v662_v3 = vadd.f32 1.0, %v8007_v0 }
 0x3de   : > { %8008 = vrcp.f32 %v662_v3 }
 0x3df   : > { %8010 = vpow2.f32 %v6157_v14 }
 0x3e8   : > { %v8009_v5 = vpop.eup %8008 }
 0x3e9   : > { %v8011_v19 = vpop.eup %8010  ;;  %v666_v36 = vmul.f32 0.0, %v8009_v5 }
 0x3ea   : > { %v835_v20 = vadd.f32 1.0, %v8011_v19 }
 0x3ec   : > { %8012 = vrcp.f32 %v835_v20 }
 0x3f6   : > { %v8013_v24 = vpop.eup %8012 }
 0x3f7   : > { %v842_v45 = vmul.f32 %v8013_v24, %v8599_v10 }
 0x41c   : > { %v669_v6 = vpop.permute.xlu1 %668 }
 0x41d   : > { %v671_v11 = vmul.f32 %v8009_v5, %v669_v6 }
 0x41f   : > { %673 = vrot.lane.b32.xlu1 %v671_v11, %s8375_s19 }
 0x44d   : > { %v845_v27 = vpop.permute.xlu0 %844 }
 0x44e   : > { %v847_v31 = vmul.f32 %v8013_v24, %v845_v27 }
 0x450   : > { %849 = vrot.lane.b32.xlu0 %v847_v31, %s8372_s9 }
 0x491   : > { %v674_v39 = vpop.permute.xlu1 %673 }
 0x492   : > { %v8666_v42 = vadd.f32 %v674_v39, %v666_v36 }
 0x494   : > { %8014 = vtanh.f32 %v8666_v42 }
 0x49e   : > { %v8015_v33 = vpop.eup %8014 }
 0x49f   : > { %679 = vrot.lane.b32.xlu1 %v8015_v33, %s8375_s19 }
 0x4c2   : > { %v850_v48 = vpop.permute.xlu0 %849 }
 0x4c3   : > { %v8671_v49 = vadd.f32 %v850_v48, %v842_v45 }
 0x4c5   : > { %8016 = vtanh.f32 %v8671_v49 }
 0x4c6   : > { %8018 = vpow2.f32 %v6158_v61 }
 0x4cf   : > { %v8017_v50 = vpop.eup %8016 }
 0x4d0   : > { %855 = vrot.lane.b32.xlu0 %v8017_v50, %s8372_s9  ;;  %v8019_v62 = vpop.eup %8018 }
 0x4d1   : > { %v836_v0 = vadd.f32 1.0, %v8019_v62 }
 0x4d3   : > { %8020 = vrcp.f32 %v836_v0 }
 0x4dd   : > { %v8021_v3 = vpop.eup %8020 }
 0x511   : > { %v680_v51 = vpop.permute.xlu1 %679 }
 0x512   : > { %v682_v54 = vmul.f32 %v8009_v5, %v680_v51  ;;  %v6162_v5 = vld [vmem:[%s8475_s21 + $0x10] sm:$0xff] }
 0x514   : > { %933 = vrot.lane.b32.xlu1 %v682_v54, %s8372_s9 }
 0x542   : > { %v856_v6 = vpop.permute.xlu0 %855 }
 0x543   : > { %v858_v10 = vmul.f32 %v8021_v3, %v856_v6 }
 0x545   : > { %6546 = vmatmul.mubr.msk.f32.vlgmr.msra.gmra.mrb[2].mxu0 %vm405_vm1, %v858_v10 }
 0x546   : > { %7118 = vmatpush3.bf16.msra.mxu0 %v8607_v32  ;;  %6556 = vmatprep.mubr.msk.f32.mxu0 %vm8374_vm0, %v8371_v8 }
 0x547   : > { %7119 = vmatprep.subr.bf16.mxu0 %v8373_v55 }
 0x54a   : > { %7121 = vmatpush3.bf16.msra.mxu0 %v8611_v43 }
 0x54b   : > { %7123 = vmatprep.subr.bf16.mxu0 %v8482_v12 }
 0x586   : > { %v934_v57 = vpop.permute.xlu1 %933 }
 0x587   : > { %6557 = vmatmul.mubr.msk.f32.vlgmr.msra.gmra.mrb[2].mxu0 %vm585_vm2, %v934_v57 }
 0x588   : > { %7125 = vmatpush1.bf16.msra.mxu0 %v8484_v16  ;;  %1098 = vmatprep.mubr.f32.mxu0 %v8371_v8 }
 0x589   : > { %7127 = vmatprep.subr.bf16.mxu0 %v8486_v17 }
 0x58c   : > { %7129 = vmatpush1.bf16.msra.mxu0 %v8490_v22 }
 0x58d   : > { %7131 = vmatprep.subr.bf16.mxu0 %v8493_v23 }
 0x590   : > { %7133 = vmatpush1.bf16.msra.mxu0 %v8496_v28 }
 0x591   : > { %7135 = vmatprep.subr.bf16.mxu0 %v8499_v29 }
 0x594   : > { %7137 = vmatpush1.bf16.msra.mxu0 %v8502_v34 }
 0x595   : > { %7139 = vmatprep.subr.bf16.mxu0 %v8505_v35 }
 0x598   : > { %7141 = vmatpush1.bf16.msra.mxu0 %v8508_v40 }
 0x599   : > { %7143 = vmatprep.subr.bf16.mxu0 %v8511_v41 }
 0x59c   : > { %7145 = vmatpush1.bf16.msra.mxu0 %v8514_v46 }
 0x59d   : > { %7147 = vmatprep.subr.bf16.mxu0 %v8517_v47 }
 0x5a0   : > { %7149 = vmatpush1.bf16.msra.mxu0 %v8520_v52 }
 0x5a1   : > { %7151 = vmatprep.subr.bf16.mxu0 %v8523_v53 }
 0x5a4   : > { %7153 = vmatpush1.bf16.msra.mxu0 %v8526_v58 }
 0x5a5   : > { %7155 = vmatprep.subr.bf16.mxu0 %v8529_v59 }
 0x5a7   : > { %1099 = vmatmul.mubr.f32.vlgmr.msra.gmra.mrb[4].mxu0 %v6162_v5 }
 0x5a8   : > { %7157 = vmatpush1.bf16.msra.mxu0 %v8533_v1  ;;  %1169 = vmatprep.mubr.f32.mxu0 %v8371_v8 }
 0x5a9   : > { %7159 = vmatprep.subr.bf16.mxu0 %v8536_v2 }
 0x5ac   : > { %7161 = vmatpush1.bf16.msra.mxu0 %v8539_v7 }
 0x5ad   : > { %7163 = vmatprep.subr.bf16.mxu0 %v8543_v9 }
 0x5b0   : > { %7165 = vmatpush1.bf16.msra.mxu0 %v8546_v15 }
 0x5b1   : > { %7167 = vmatprep.subr.bf16.mxu0 %v8549_v18 }
 0x5b4   : > { %7169 = vmatpush1.bf16.msra.mxu0 %v8552_v21 }
 0x5b5   : > { %7236 = vmatprep.subr.bf16.mxu0 %v8373_v55 }
 0x5b7   : > { %6163 = vmatmul.mubr.msk.f32.vlgmr.msra.gmra.mrb[4].mxu0 %vm405_vm1, %v858_v10 }
 0x5b8   : > { %7238 = vmatpush3.bf16.msra.mxu0 %v8574_v56  ;;  %6605 = vmatprep.mubr.msk.f32.mxu0 %vm8374_vm0, %v8371_v8 }
 0x5b9   : > { %7239 = vmatprep.subr.bf16.mxu0 %v8373_v55 }
 0x5bc   : > { %7241 = vmatpush3.bf16.msra.mxu0 %v8578_v60 }
 0x5bd   : > { %7242 = vmatprep.subr.bf16.mxu0 %v8373_v55 }
 0x5c0   : > { %7244 = vmatpush3.bf16.msra.mxu0 %v8584_v63 }
 0x5c1   : > { %7245 = vmatprep.subr.bf16.mxu0 %v8373_v55 }
 0x5c4   : > { %7247 = vmatpush3.bf16.msra.mxu0 %v8590_v4 }
 0x5c5   : > { %7248 = vmatprep.subr.bf16.mxu0 %v8373_v55 }
 0x65a   : > { %v1003_v11 = vpop.f32.mrb[2].mxu0 }
 0x65b   : > { %v7865_v13 = vadd.f32 %v1003_v11, %v8657_v44  ;;  %v6558_v14 = vpop.f32.mrb[3].mxu0 }
 0x65d   : > { %8022 = vtanh.f32 %v7865_v13  ;;  %v6161_v36 = vmul.f32 -1.442695, %v7865_v13 }
 0x667   : > { %v8023_v19 = vpop.eup %8022 }
 0x668   : > { %1017 = vrot.lane.b32.xlu0 %v8023_v19, %s8375_s19 }
 0x68a   : > { %v1171_v20 = vpop.f32.mrb[4].mxu0 }
 0x68b   : > { %v1173_v24 = vpop.f32.mrb[5].mxu0  ;;  %v7866_v51 = vadd.f32 %v1171_v20, %v8569_v38 }
 0x68c   : > { %v7867_v27 = vadd.f32 %v1173_v24, %v8562_v30 }
 0x68d   : > { %v6164_v54 = vmul.f32 -1.442695, %v7866_v51 }
 0x68e   : > { %8024 = vtanh.f32 %v7867_v27 }
 0x68f   : > { %8026 = vpow2.f32 %v6161_v36 }
 0x698   : > { %v8025_v31 = vpop.eup %8024 }
 0x699   : > { %1193 = vrot.lane.b32.xlu1 %v8025_v31, %s8372_s9  ;;  %v8027_v39 = vpop.eup %8026  ;;  %v6165_v31 = vmul.f32 -1.442695, %v7867_v27 }
 0x69a   : > { %v1011_v33 = vadd.f32 1.0, %v8027_v39 }
 0x69c   : > { %8028 = vrcp.f32 %v1011_v33 }
 0x69d   : > { %8030 = vpow2.f32 %v6164_v54 }
 0x6a6   : > { %v8029_v45 = vpop.eup %8028 }
 0x6a7   : > { %v8031_v61 = vpop.eup %8030  ;;  %v1015_v10 = vmul.f32 %v8029_v45, %v8666_v42 }
 0x6a8   : > { %v1184_v62 = vadd.f32 1.0, %v8031_v61 }
 0x6aa   : > { %8032 = vrcp.f32 %v1184_v62 }
 0x6b4   : > { %v8033_v0 = vpop.eup %8032 }
 0x6b5   : > { %v1191_v13 = vmul.f32 %v8033_v0, %v8671_v49 }
 0x6da   : > { %v1018_v48 = vpop.permute.xlu0 %1017 }
 0x6db   : > { %v1020_v50 = vmul.f32 %v8029_v45, %v1018_v48 }
 0x6dd   : > { %1022 = vrot.lane.b32.xlu0 %v1020_v50, %s8375_s19 }
 0x70b   : > { %v1194_v3 = vpop.permute.xlu1 %1193 }
 0x70c   : > { %v1196_v6 = vmul.f32 %v8033_v0, %v1194_v3 }
 0x70e   : > { %1198 = vrot.lane.b32.xlu1 %v1196_v6, %s8372_s9 }
 0x74f   : > { %v1023_v57 = vpop.permute.xlu0 %1022 }
 0x750   : > { %v8730_v5 = vadd.f32 %v1023_v57, %v1015_v10 }
 0x752   : > { %8034 = vtanh.f32 %v8730_v5 }
 0x75c   : > { %v8035_v11 = vpop.eup %8034 }
 0x75d   : > { %1028 = vrot.lane.b32.xlu0 %v8035_v11, %s8375_s19 }
 0x780   : > { %v1199_v14 = vpop.permute.xlu1 %1198 }
 0x781   : > { %v8735_v19 = vadd.f32 %v1199_v14, %v1191_v13 }
 0x783   : > { %8036 = vtanh.f32 %v8735_v19 }
 0x784   : > { %8038 = vpow2.f32 %v6165_v31 }
 0x78d   : > { %v8037_v20 = vpop.eup %8036 }
 0x78e   : > { %1204 = vrot.lane.b32.xlu1 %v8037_v20, %s8372_s9  ;;  %v8039_v36 = vpop.eup %8038 }
 0x78f   : > { %v1185_v39 = vadd.f32 1.0, %v8039_v36 }
 0x791   : > { %8040 = vrcp.f32 %v1185_v39 }
 0x79b   : > { %v8041_v33 = vpop.eup %8040 }
 0x7cf   : > { %v1029_v24 = vpop.permute.xlu0 %1028 }
 0x7d0   : > { %v1031_v42 = vmul.f32 %v8029_v45, %v1029_v24  ;;  %v6169_v45 = vld [vmem:[%s8475_s21 + $0x18] sm:$0xff] }
 0x7d2   : > { %1282 = vrot.lane.b32.xlu0 %v1031_v42, %s8372_s9 }
 0x800   : > { %v1205_v48 = vpop.permute.xlu1 %1204 }
 0x801   : > { %v1207_v49 = vmul.f32 %v8041_v33, %v1205_v48 }
 0x803   : > { %6576 = vmatmul.mubr.msk.f32.vlgmr.msra.gmra.mrb[4].mxu1 %vm405_vm1, %v1207_v49 }
 0x804   : > { %7184 = vmatpush3.bf16.msra.mxu1 %v8607_v32  ;;  %6586 = vmatprep.mubr.msk.f32.mxu1 %vm8374_vm0, %v8371_v8 }
 0x805   : > { %7185 = vmatprep.subr.bf16.mxu1 %v8373_v55 }
 0x808   : > { %7187 = vmatpush3.bf16.msra.mxu1 %v8611_v43 }
 0x809   : > { %7189 = vmatprep.subr.bf16.mxu1 %v8482_v12 }
 0x844   : > { %v1283_v27 = vpop.permute.xlu0 %1282 }
 0x845   : > { %6587 = vmatmul.mubr.msk.f32.vlgmr.msra.gmra.mrb[4].mxu1 %vm585_vm2, %v1283_v27 }
 0x846   : > { %7191 = vmatpush1.bf16.msra.mxu1 %v8484_v16  ;;  %1447 = vmatprep.mubr.f32.mxu1 %v8371_v8 }
 0x847   : > { %7193 = vmatprep.subr.bf16.mxu1 %v8486_v17 }
 0x84a   : > { %7195 = vmatpush1.bf16.msra.mxu1 %v8490_v22 }
 0x84b   : > { %7197 = vmatprep.subr.bf16.mxu1 %v8493_v23 }
 0x84e   : > { %7199 = vmatpush1.bf16.msra.mxu1 %v8496_v28 }
 0x84f   : > { %7201 = vmatprep.subr.bf16.mxu1 %v8499_v29 }
 0x852   : > { %7203 = vmatpush1.bf16.msra.mxu1 %v8502_v34 }
 0x853   : > { %7205 = vmatprep.subr.bf16.mxu1 %v8505_v35 }
 0x856   : > { %7207 = vmatpush1.bf16.msra.mxu1 %v8508_v40 }
 0x857   : > { %7209 = vmatprep.subr.bf16.mxu1 %v8511_v41 }
 0x85a   : > { %7211 = vmatpush1.bf16.msra.mxu1 %v8514_v46 }
 0x85b   : > { %7213 = vmatprep.subr.bf16.mxu1 %v8517_v47 }
 0x85e   : > { %7215 = vmatpush1.bf16.msra.mxu1 %v8520_v52 }
 0x85f   : > { %7217 = vmatprep.subr.bf16.mxu1 %v8523_v53 }
 0x862   : > { %7219 = vmatpush1.bf16.msra.mxu1 %v8526_v58 }
 0x863   : > { %7221 = vmatprep.subr.bf16.mxu1 %v8529_v59 }
 0x865   : > { %1448 = vmatmul.mubr.f32.vlgmr.msra.gmra.mrb[6].mxu1 %v6169_v45 }
 0x866   : > { %7223 = vmatpush1.bf16.msra.mxu1 %v8533_v1  ;;  %1518 = vmatprep.mubr.f32.mxu1 %v8371_v8 }
 0x867   : > { %7225 = vmatprep.subr.bf16.mxu1 %v8536_v2 }
 0x86a   : > { %7227 = vmatpush1.bf16.msra.mxu1 %v8539_v7 }
 0x86b   : > { %7229 = vmatprep.subr.bf16.mxu1 %v8543_v9 }
 0x86e   : > { %7231 = vmatpush1.bf16.msra.mxu1 %v8546_v15 }
 0x86f   : > { %7233 = vmatprep.subr.bf16.mxu1 %v8549_v18 }
 0x872   : > { %7235 = vmatpush1.bf16.msra.mxu1 %v8552_v21 }
 0x873   : > { %7302 = vmatprep.subr.bf16.mxu1 %v8373_v55 }
 0x875   : > { %6170 = vmatmul.mubr.msk.f32.vlgmr.msra.gmra.mrb[6].mxu1 %vm405_vm1, %v1207_v49 }
 0x876   : > { %7304 = vmatpush3.bf16.msra.mxu1 %v8574_v56  ;;  %6635 = vmatprep.mubr.msk.f32.mxu1 %vm8374_vm0, %v8371_v8 }
 0x877   : > { %7305 = vmatprep.subr.bf16.mxu1 %v8373_v55 }
 0x87a   : > { %7307 = vmatpush3.bf16.msra.mxu1 %v8578_v60 }
 0x87b   : > { %7308 = vmatprep.subr.bf16.mxu1 %v8373_v55 }
 0x87e   : > { %7310 = vmatpush3.bf16.msra.mxu1 %v8584_v63 }
 0x87f   : > { %7311 = vmatprep.subr.bf16.mxu1 %v8373_v55 }
 0x882   : > { %7313 = vmatpush3.bf16.msra.mxu1 %v8590_v4 }
 0x883   : > { %7314 = vmatprep.subr.bf16.mxu1 %v8373_v55 }
 0x918   : > { %v1352_v50 = vpop.f32.mrb[4].mxu1 }
 0x919   : > { %v7868_v51 = vadd.f32 %v1352_v50, %v8657_v44  ;;  %v6588_v54 = vpop.f32.mrb[5].mxu1 }
 0x91b   : > { %8042 = vtanh.f32 %v7868_v51  ;;  %v6168_v10 = vmul.f32 -1.442695, %v7868_v51 }
 0x925   : > { %v8043_v61 = vpop.eup %8042 }
 0x926   : > { %1366 = vrot.lane.b32.xlu1 %v8043_v61, %s8375_s19 }
 0x948   : > { %v1520_v62 = vpop.f32.mrb[6].mxu1 }
 0x949   : > { %v1522_v0 = vpop.f32.mrb[7].mxu1  ;;  %v7869_v24 = vadd.f32 %v1520_v62, %v8569_v38 }
 0x94a   : > { %v7870_v3 = vadd.f32 %v1522_v0, %v8562_v30 }
 0x94b   : > { %v6171_v42 = vmul.f32 -1.442695, %v7869_v24 }
 0x94c   : > { %8044 = vtanh.f32 %v7870_v3 }
 0x94d   : > { %8046 = vpow2.f32 %v6168_v10 }
 0x956   : > { %v8045_v6 = vpop.eup %8044 }
 0x957   : > { %1542 = vrot.lane.b32.xlu0 %v8045_v6, %s8372_s9  ;;  %v8047_v57 = vpop.eup %8046  ;;  %v6172_v6 = vmul.f32 -1.442695, %v7870_v3 }
 0x958   : > { %v1360_v11 = vadd.f32 1.0, %v8047_v57 }
 0x95a   : > { %8048 = vrcp.f32 %v1360_v11 }
 0x95b   : > { %8050 = vpow2.f32 %v6171_v42 }
 0x964   : > { %v8049_v13 = vpop.eup %8048 }
 0x965   : > { %v8051_v31 = vpop.eup %8050  ;;  %v1364_v49 = vmul.f32 %v8049_v13, %v8730_v5 }
 0x966   : > { %v1533_v36 = vadd.f32 1.0, %v8051_v31 }
 0x968   : > { %8052 = vrcp.f32 %v1533_v36 }
 0x972   : > { %v8053_v39 = vpop.eup %8052 }
 0x973   : > { %v1540_v51 = vmul.f32 %v8053_v39, %v8735_v19 }
 0x998   : > { %v1367_v14 = vpop.permute.xlu1 %1366 }
 0x999   : > { %v1369_v20 = vmul.f32 %v8049_v13, %v1367_v14 }
 0x99b   : > { %1371 = vrot.lane.b32.xlu1 %v1369_v20, %s8375_s19 }
 0x9c9   : > { %v1543_v33 = vpop.permute.xlu0 %1542 }
 0x9ca   : > { %v1545_v48 = vmul.f32 %v8053_v39, %v1543_v33 }
 0x9cc   : > { %1547 = vrot.lane.b32.xlu0 %v1545_v48, %s8372_s9 }
 0xa0d   : > { %v1372_v27 = vpop.permute.xlu1 %1371 }
 0xa0e   : > { %v8794_v45 = vadd.f32 %v1372_v27, %v1364_v49 }
 0xa10   : > { %8054 = vtanh.f32 %v8794_v45 }
 0xa1a   : > { %v8055_v50 = vpop.eup %8054 }
 0xa1b   : > { %1377 = vrot.lane.b32.xlu1 %v8055_v50, %s8375_s19 }
 0xa3e   : > { %v1548_v54 = vpop.permute.xlu0 %1547 }
 0xa3f   : > { %v8799_v61 = vadd.f32 %v1548_v54, %v1540_v51 }
 0xa41   : > { %8056 = vtanh.f32 %v8799_v61 }
 0xa42   : > { %8058 = vpow2.f32 %v6172_v6 }
 0xa4b   : > { %v8057_v62 = vpop.eup %8056 }
 0xa4c   : > { %1553 = vrot.lane.b32.xlu0 %v8057_v62, %s8372_s9  ;;  %v8059_v10 = vpop.eup %8058 }
 0xa4d   : > { %v1534_v57 = vadd.f32 1.0, %v8059_v10 }
 0xa4f   : > { %8060 = vrcp.f32 %v1534_v57 }
 0xa59   : > { %v8061_v11 = vpop.eup %8060 }
 0xa8d   : > { %v1378_v0 = vpop.permute.xlu1 %1377 }
 0xa8e   : > { %v1380_v5 = vmul.f32 %v8049_v13, %v1378_v0  ;;  %v6176_v13 = vld [vmem:[%s8475_s21 + $0x20] sm:$0xff] }
 0xa90   : > { %1631 = vrot.lane.b32.xlu1 %v1380_v5, %s8372_s9 }
 0xabe   : > { %v1554_v14 = vpop.permute.xlu0 %1553 }
 0xabf   : > { %v1556_v19 = vmul.f32 %v8061_v11, %v1554_v14 }
 0xac1   : > { %6606 = vmatmul.mubr.msk.f32.vlgmr.msra.gmra.mrb[6].mxu0 %vm405_vm1, %v1556_v19 }
 0xac2   : > { %7250 = vmatpush3.bf16.msra.mxu0 %v8607_v32  ;;  %6616 = vmatprep.mubr.msk.f32.mxu0 %vm8374_vm0, %v8371_v8 }
 0xac3   : > { %7251 = vmatprep.subr.bf16.mxu0 %v8373_v55 }
 0xac6   : > { %7253 = vmatpush3.bf16.msra.mxu0 %v8611_v43 }
 0xac7   : > { %7255 = vmatprep.subr.bf16.mxu0 %v8482_v12 }
 0xb02   : > { %v1632_v3 = vpop.permute.xlu1 %1631 }
 0xb03   : > { %6617 = vmatmul.mubr.msk.f32.vlgmr.msra.gmra.mrb[6].mxu0 %vm585_vm2, %v1632_v3 }
 0xb04   : > { %7257 = vmatpush1.bf16.msra.mxu0 %v8484_v16  ;;  %1796 = vmatprep.mubr.f32.mxu0 %v8371_v8 }
 0xb05   : > { %7259 = vmatprep.subr.bf16.mxu0 %v8486_v17 }
 0xb08   : > { %7261 = vmatpush1.bf16.msra.mxu0 %v8490_v22 }
 0xb09   : > { %7263 = vmatprep.subr.bf16.mxu0 %v8493_v23 }
 0xb0c   : > { %7265 = vmatpush1.bf16.msra.mxu0 %v8496_v28 }
 0xb0d   : > { %7267 = vmatprep.subr.bf16.mxu0 %v8499_v29 }
 0xb10   : > { %7269 = vmatpush1.bf16.msra.mxu0 %v8502_v34 }
 0xb11   : > { %7271 = vmatprep.subr.bf16.mxu0 %v8505_v35 }
 0xb14   : > { %7273 = vmatpush1.bf16.msra.mxu0 %v8508_v40 }
 0xb15   : > { %7275 = vmatprep.subr.bf16.mxu0 %v8511_v41 }
 0xb18   : > { %7277 = vmatpush1.bf16.msra.mxu0 %v8514_v46 }
 0xb19   : > { %7279 = vmatprep.subr.bf16.mxu0 %v8517_v47 }
 0xb1c   : > { %7281 = vmatpush1.bf16.msra.mxu0 %v8520_v52 }
 0xb1d   : > { %7283 = vmatprep.subr.bf16.mxu0 %v8523_v53 }
 0xb20   : > { %7285 = vmatpush1.bf16.msra.mxu0 %v8526_v58 }
 0xb21   : > { %7287 = vmatprep.subr.bf16.mxu0 %v8529_v59 }
 0xb23   : > { %1797 = vmatmul.mubr.f32.vlgmr.msra.gmra.mrb[8].mxu0 %v6176_v13 }
 0xb24   : > { %7289 = vmatpush1.bf16.msra.mxu0 %v8533_v1  ;;  %1867 = vmatprep.mubr.f32.mxu0 %v8371_v8 }
 0xb25   : > { %7291 = vmatprep.subr.bf16.mxu0 %v8536_v2 }
 0xb28   : > { %7293 = vmatpush1.bf16.msra.mxu0 %v8539_v7 }
 0xb29   : > { %7295 = vmatprep.subr.bf16.mxu0 %v8543_v9 }
 0xb2c   : > { %7297 = vmatpush1.bf16.msra.mxu0 %v8546_v15 }
 0xb2d   : > { %7299 = vmatprep.subr.bf16.mxu0 %v8549_v18 }
 0xb30   : > { %7301 = vmatpush1.bf16.msra.mxu0 %v8552_v21 }
 0xb31   : > { %7368 = vmatprep.subr.bf16.mxu0 %v8373_v55 }
 0xb33   : > { %6177 = vmatmul.mubr.msk.f32.vlgmr.msra.gmra.mrb[8].mxu0 %vm405_vm1, %v1556_v19 }
 0xb34   : > { %7370 = vmatpush3.bf16.msra.mxu0 %v8574_v56  ;;  %6665 = vmatprep.mubr.msk.f32.mxu0 %vm8374_vm0, %v8371_v8 }
 0xb35   : > { %7371 = vmatprep.subr.bf16.mxu0 %v8373_v55 }
 0xb38   : > { %7373 = vmatpush3.bf16.msra.mxu0 %v8578_v60 }
 0xb39   : > { %7374 = vmatprep.subr.bf16.mxu0 %v8373_v55 }
 0xb3c   : > { %7376 = vmatpush3.bf16.msra.mxu0 %v8584_v63 }
 0xb3d   : > { %7377 = vmatprep.subr.bf16.mxu0 %v8373_v55 }
 0xb40   : > { %7379 = vmatpush3.bf16.msra.mxu0 %v8590_v4 }
 0xb41   : > { %7380 = vmatprep.subr.bf16.mxu0 %v8373_v55 }
 0xbd6   : > { %v1701_v20 = vpop.f32.mrb[6].mxu0 }
 0xbd7   : > { %v7871_v24 = vadd.f32 %v1701_v20, %v8657_v44  ;;  %v6618_v42 = vpop.f32.mrb[7].mxu0 }
 0xbd9   : > { %8062 = vtanh.f32 %v7871_v24  ;;  %v6175_v49 = vmul.f32 -1.442695, %v7871_v24 }
 0xbe3   : > { %v8063_v31 = vpop.eup %8062 }
 0xbe4   : > { %1715 = vrot.lane.b32.xlu0 %v8063_v31, %s8375_s19 }
 0xc06   : > { %v1869_v36 = vpop.f32.mrb[8].mxu0 }
 0xc07   : > { %v1871_v39 = vpop.f32.mrb[9].mxu0  ;;  %v7872_v0 = vadd.f32 %v1869_v36, %v8569_v38 }
 0xc08   : > { %v7873_v33 = vadd.f32 %v1871_v39, %v8562_v30 }
 0xc09   : > { %v6178_v5 = vmul.f32 -1.442695, %v7872_v0 }
 0xc0a   : > { %8064 = vtanh.f32 %v7873_v33 }
 0xc0b   : > { %8066 = vpow2.f32 %v6175_v49 }
 0xc14   : > { %v8065_v48 = vpop.eup %8064 }
 0xc15   : > { %1891 = vrot.lane.b32.xlu1 %v8065_v48, %s8372_s9  ;;  %v8067_v27 = vpop.eup %8066  ;;  %v6179_v48 = vmul.f32 -1.442695, %v7873_v33 }
 0xc16   : > { %v1709_v50 = vadd.f32 1.0, %v8067_v27 }
 0xc18   : > { %8068 = vrcp.f32 %v1709_v50 }
 0xc19   : > { %8070 = vpow2.f32 %v6178_v5 }
 0xc22   : > { %v8069_v51 = vpop.eup %8068 }
 0xc23   : > { %v8071_v6 = vpop.eup %8070  ;;  %v1713_v19 = vmul.f32 %v8069_v51, %v8794_v45 }
 0xc24   : > { %v1882_v10 = vadd.f32 1.0, %v8071_v6 }
 0xc26   : > { %8072 = vrcp.f32 %v1882_v10 }
 0xc30   : > { %v8073_v57 = vpop.eup %8072 }
 0xc31   : > { %v1889_v24 = vmul.f32 %v8073_v57, %v8799_v61 }
 0xc56   : > { %v1716_v54 = vpop.permute.xlu0 %1715 }
 0xc57   : > { %v1718_v62 = vmul.f32 %v8069_v51, %v1716_v54 }
 0xc59   : > { %1720 = vrot.lane.b32.xlu0 %v1718_v62, %s8375_s19 }
 0xc87   : > { %v1892_v11 = vpop.permute.xlu1 %1891 }
 0xc88   : > { %v1894_v14 = vmul.f32 %v8073_v57, %v1892_v11 }
 0xc8a   : > { %1896 = vrot.lane.b32.xlu1 %v1894_v14, %s8372_s9 }
 0xccb   : > { %v1721_v3 = vpop.permute.xlu0 %1720 }
 0xccc   : > { %v8858_v13 = vadd.f32 %v1721_v3, %v1713_v19 }
 0xcce   : > { %8074 = vtanh.f32 %v8858_v13 }
 0xcd8   : > { %v8075_v20 = vpop.eup %8074 }
 0xcd9   : > { %1726 = vrot.lane.b32.xlu0 %v8075_v20, %s8375_s19 }
 0xcfc   : > { %v1897_v42 = vpop.permute.xlu1 %1896 }
 0xcfd   : > { %v8863_v31 = vadd.f32 %v1897_v42, %v1889_v24 }
 0xcff   : > { %8076 = vtanh.f32 %v8863_v31 }
 0xd00   : > { %8078 = vpow2.f32 %v6179_v48 }
 0xd09   : > { %v8077_v36 = vpop.eup %8076 }
 0xd0a   : > { %1902 = vrot.lane.b32.xlu1 %v8077_v36, %s8372_s9  ;;  %v8079_v49 = vpop.eup %8078 }
 0xd0b   : > { %v1883_v27 = vadd.f32 1.0, %v8079_v49 }
 0xd0d   : > { %8080 = vrcp.f32 %v1883_v27 }
 0xd17   : > { %v8081_v50 = vpop.eup %8080 }
 0xd4b   : > { %v1727_v39 = vpop.permute.xlu0 %1726 }
 0xd4c   : > { %v1729_v45 = vmul.f32 %v8069_v51, %v1727_v39  ;;  %v6183_v51 = vld [vmem:[%s8475_s21 + $0x28] sm:$0xff] }
 0xd4e   : > { %1980 = vrot.lane.b32.xlu0 %v1729_v45, %s8372_s9 }
 0xd7c   : > { %v1903_v54 = vpop.permute.xlu1 %1902 }
 0xd7d   : > { %v1905_v61 = vmul.f32 %v8081_v50, %v1903_v54 }
 0xd7f   : > { %6636 = vmatmul.mubr.msk.f32.vlgmr.msra.gmra.mrb[8].mxu1 %vm405_vm1, %v1905_v61 }
 0xd80   : > { %7316 = vmatpush3.bf16.msra.mxu1 %v8607_v32  ;;  %6646 = vmatprep.mubr.msk.f32.mxu1 %vm8374_vm0, %v8371_v8 }
 0xd81   : > { %7317 = vmatprep.subr.bf16.mxu1 %v8373_v55 }
 0xd84   : > { %7319 = vmatpush3.bf16.msra.mxu1 %v8611_v43 }
 0xd85   : > { %7321 = vmatprep.subr.bf16.mxu1 %v8482_v12 }
 0xdc0   : > { %v1981_v33 = vpop.permute.xlu0 %1980 }
 0xdc1   : > { %6647 = vmatmul.mubr.msk.f32.vlgmr.msra.gmra.mrb[8].mxu1 %vm585_vm2, %v1981_v33 }
 0xdc2   : > { %7323 = vmatpush1.bf16.msra.mxu1 %v8484_v16  ;;  %2145 = vmatprep.mubr.f32.mxu1 %v8371_v8 }
 0xdc3   : > { %7325 = vmatprep.subr.bf16.mxu1 %v8486_v17 }
 0xdc6   : > { %7327 = vmatpush1.bf16.msra.mxu1 %v8490_v22 }
 0xdc7   : > { %7329 = vmatprep.subr.bf16.mxu1 %v8493_v23 }
 0xdca   : > { %7331 = vmatpush1.bf16.msra.mxu1 %v8496_v28 }
 0xdcb   : > { %7333 = vmatprep.subr.bf16.mxu1 %v8499_v29 }
 0xdce   : > { %7335 = vmatpush1.bf16.msra.mxu1 %v8502_v34 }
 0xdcf   : > { %7337 = vmatprep.subr.bf16.mxu1 %v8505_v35 }
 0xdd2   : > { %7339 = vmatpush1.bf16.msra.mxu1 %v8508_v40 }
 0xdd3   : > { %7341 = vmatprep.subr.bf16.mxu1 %v8511_v41 }
 0xdd6   : > { %7343 = vmatpush1.bf16.msra.mxu1 %v8514_v46 }
 0xdd7   : > { %7345 = vmatprep.subr.bf16.mxu1 %v8517_v47 }
 0xdda   : > { %7347 = vmatpush1.bf16.msra.mxu1 %v8520_v52 }
 0xddb   : > { %7349 = vmatprep.subr.bf16.mxu1 %v8523_v53 }
 0xdde   : > { %7351 = vmatpush1.bf16.msra.mxu1 %v8526_v58 }
 0xddf   : > { %7353 = vmatprep.subr.bf16.mxu1 %v8529_v59 }
 0xde1   : > { %2146 = vmatmul.mubr.f32.vlgmr.msra.gmra.mrb[10].mxu1 %v6183_v51 }
 0xde2   : > { %7355 = vmatpush1.bf16.msra.mxu1 %v8533_v1  ;;  %2216 = vmatprep.mubr.f32.mxu1 %v8371_v8 }
 0xde3   : > { %7357 = vmatprep.subr.bf16.mxu1 %v8536_v2 }
 0xde6   : > { %7359 = vmatpush1.bf16.msra.mxu1 %v8539_v7 }
 0xde7   : > { %7361 = vmatprep.subr.bf16.mxu1 %v8543_v9 }
 0xdea   : > { %7363 = vmatpush1.bf16.msra.mxu1 %v8546_v15 }
 0xdeb   : > { %7365 = vmatprep.subr.bf16.mxu1 %v8549_v18 }
 0xdee   : > { %7367 = vmatpush1.bf16.msra.mxu1 %v8552_v21 }
 0xdef   : > { %7434 = vmatprep.subr.bf16.mxu1 %v8373_v55 }
 0xdf1   : > { %6184 = vmatmul.mubr.msk.f32.vlgmr.msra.gmra.mrb[10].mxu1 %vm405_vm1, %v1905_v61 }
 0xdf2   : > { %7436 = vmatpush3.bf16.msra.mxu1 %v8574_v56  ;;  %6695 = vmatprep.mubr.msk.f32.mxu1 %vm8374_vm0, %v8371_v8 }
 0xdf3   : > { %7437 = vmatprep.subr.bf16.mxu1 %v8373_v55 }
 0xdf6   : > { %7439 = vmatpush3.bf16.msra.mxu1 %v8578_v60 }
 0xdf7   : > { %7440 = vmatprep.subr.bf16.mxu1 %v8373_v55 }
 0xdfa   : > { %7442 = vmatpush3.bf16.msra.mxu1 %v8584_v63 }
 0xdfb   : > { %7443 = vmatprep.subr.bf16.mxu1 %v8373_v55 }
 0xdfe   : > { %7445 = vmatpush3.bf16.msra.mxu1 %v8590_v4 }
 0xdff   : > { %7446 = vmatprep.subr.bf16.mxu1 %v8373_v55 }
 0xe94   : > { %v2050_v62 = vpop.f32.mrb[8].mxu1 }
 0xe95   : > { %v7874_v0 = vadd.f32 %v2050_v62, %v8657_v44  ;;  %v6648_v5 = vpop.f32.mrb[9].mxu1 }
 0xe97   : > { %8082 = vtanh.f32 %v7874_v0  ;;  %v6182_v19 = vmul.f32 -1.442695, %v7874_v0 }
 0xea1   : > { %v8083_v6 = vpop.eup %8082 }
 0xea2   : > { %2064 = vrot.lane.b32.xlu1 %v8083_v6, %s8375_s19 }
 0xec4   : > { %v2218_v10 = vpop.f32.mrb[10].mxu1 }
 0xec5   : > { %v2220_v57 = vpop.f32.mrb[11].mxu1  ;;  %v7875_v39 = vadd.f32 %v2218_v10, %v8569_v38 }
 0xec6   : > { %v7876_v11 = vadd.f32 %v2220_v57, %v8562_v30 }
 0xec7   : > { %v6185_v45 = vmul.f32 -1.442695, %v7875_v39 }
 0xec8   : > { %8084 = vtanh.f32 %v7876_v11 }
 0xec9   : > { %8086 = vpow2.f32 %v6182_v19 }
 0xed2   : > { %v8085_v14 = vpop.eup %8084 }
 0xed3   : > { %2240 = vrot.lane.b32.xlu0 %v8085_v14, %s8372_s9  ;;  %v8087_v3 = vpop.eup %8086  ;;  %v6186_v14 = vmul.f32 -1.442695, %v7876_v11 }
 0xed4   : > { %v2058_v20 = vadd.f32 1.0, %v8087_v3 }
 0xed6   : > { %8088 = vrcp.f32 %v2058_v20 }
 0xed7   : > { %8090 = vpow2.f32 %v6185_v45 }
 0xee0   : > { %v8089_v24 = vpop.eup %8088 }
 0xee1   : > { %v8091_v48 = vpop.eup %8090  ;;  %v2062_v61 = vmul.f32 %v8089_v24, %v8858_v13 }
 0xee2   : > { %v2231_v49 = vadd.f32 1.0, %v8091_v48 }
 0xee4   : > { %8092 = vrcp.f32 %v2231_v49 }
 0xeee   : > { %v8093_v27 = vpop.eup %8092 }
 0xeef   : > { %v2238_v0 = vmul.f32 %v8093_v27, %v8863_v31 }
 0xf14   : > { %v2065_v42 = vpop.permute.xlu1 %2064 }
 0xf15   : > { %v2067_v36 = vmul.f32 %v8089_v24, %v2065_v42 }
 0xf17   : > { %2069 = vrot.lane.b32.xlu1 %v2067_v36, %s8375_s19 }
 0xf45   : > { %v2241_v50 = vpop.permute.xlu0 %2240 }
 0xf46   : > { %v2243_v54 = vmul.f32 %v8093_v27, %v2241_v50 }
 0xf48   : > { %2245 = vrot.lane.b32.xlu0 %v2243_v54, %s8372_s9 }
 0xf89   : > { %v2070_v33 = vpop.permute.xlu1 %2069 }
 0xf8a   : > { %v8922_v51 = vadd.f32 %v2070_v33, %v2062_v61 }
 0xf8c   : > { %8094 = vtanh.f32 %v8922_v51 }
 0xf96   : > { %v8095_v62 = vpop.eup %8094 }
 0xf97   : > { %2075 = vrot.lane.b32.xlu1 %v8095_v62, %s8375_s19 }
 0xfba   : > { %v2246_v5 = vpop.permute.xlu0 %2245 }
 0xfbb   : > { %v8927_v6 = vadd.f32 %v2246_v5, %v2238_v0 }
 0xfbd   : > { %8096 = vtanh.f32 %v8927_v6 }
 0xfbe   : > { %8098 = vpow2.f32 %v6186_v14 }
 0xfc7   : > { %v8097_v10 = vpop.eup %8096 }
 0xfc8   : > { %2251 = vrot.lane.b32.xlu0 %v8097_v10, %s8372_s9  ;;  %v8099_v19 = vpop.eup %8098 }
 0xfc9   : > { %v2232_v3 = vadd.f32 1.0, %v8099_v19 }
 0xfcb   : > { %8100 = vrcp.f32 %v2232_v3 }
 0xfd5   : > { %v8101_v20 = vpop.eup %8100 }
0x1009   : > { %v2076_v57 = vpop.permute.xlu1 %2075 }
0x100a   : > { %v2078_v13 = vmul.f32 %v8089_v24, %v2076_v57  ;;  %v6190_v24 = vld [vmem:[%s8475_s21 + $0x30] sm:$0xff] }
0x100c   : > { %2329 = vrot.lane.b32.xlu1 %v2078_v13, %s8372_s9 }
0x103a   : > { %v2252_v42 = vpop.permute.xlu0 %2251 }
0x103b   : > { %v2254_v31 = vmul.f32 %v8101_v20, %v2252_v42 }
0x103d   : > { %6666 = vmatmul.mubr.msk.f32.vlgmr.msra.gmra.mrb[10].mxu0 %vm405_vm1, %v2254_v31 }
0x103e   : > { %7382 = vmatpush3.bf16.msra.mxu0 %v8607_v32  ;;  %6676 = vmatprep.mubr.msk.f32.mxu0 %vm8374_vm0, %v8371_v8 }
0x103f   : > { %7383 = vmatprep.subr.bf16.mxu0 %v8373_v55 }
0x1042   : > { %7385 = vmatpush3.bf16.msra.mxu0 %v8611_v43 }
0x1043   : > { %7387 = vmatprep.subr.bf16.mxu0 %v8482_v12 }
0x107e   : > { %v2330_v11 = vpop.permute.xlu1 %2329 }
0x107f   : > { %6677 = vmatmul.mubr.msk.f32.vlgmr.msra.gmra.mrb[10].mxu0 %vm585_vm2, %v2330_v11 }
0x1080   : > { %7389 = vmatpush1.bf16.msra.mxu0 %v8484_v16  ;;  %2494 = vmatprep.mubr.f32.mxu0 %v8371_v8 }
0x1081   : > { %7391 = vmatprep.subr.bf16.mxu0 %v8486_v17 }
0x1084   : > { %7393 = vmatpush1.bf16.msra.mxu0 %v8490_v22 }
0x1085   : > { %7395 = vmatprep.subr.bf16.mxu0 %v8493_v23 }
0x1088   : > { %7397 = vmatpush1.bf16.msra.mxu0 %v8496_v28 }
0x1089   : > { %7399 = vmatprep.subr.bf16.mxu0 %v8499_v29 }
0x108c   : > { %7401 = vmatpush1.bf16.msra.mxu0 %v8502_v34 }
0x108d   : > { %7403 = vmatprep.subr.bf16.mxu0 %v8505_v35 }
0x1090   : > { %7405 = vmatpush1.bf16.msra.mxu0 %v8508_v40 }
0x1091   : > { %7407 = vmatprep.subr.bf16.mxu0 %v8511_v41 }
0x1094   : > { %7409 = vmatpush1.bf16.msra.mxu0 %v8514_v46 }
0x1095   : > { %7411 = vmatprep.subr.bf16.mxu0 %v8517_v47 }
0x1098   : > { %7413 = vmatpush1.bf16.msra.mxu0 %v8520_v52 }
0x1099   : > { %7415 = vmatprep.subr.bf16.mxu0 %v8523_v53 }
0x109c   : > { %7417 = vmatpush1.bf16.msra.mxu0 %v8526_v58 }
0x109d   : > { %7419 = vmatprep.subr.bf16.mxu0 %v8529_v59 }
0x109f   : > { %2495 = vmatmul.mubr.f32.vlgmr.msra.gmra.mrb[12].mxu0 %v6190_v24 }
0x10a0   : > { %7421 = vmatpush1.bf16.msra.mxu0 %v8533_v1  ;;  %2565 = vmatprep.mubr.f32.mxu0 %v8371_v8 }
0x10a1   : > { %7423 = vmatprep.subr.bf16.mxu0 %v8536_v2 }
0x10a4   : > { %7425 = vmatpush1.bf16.msra.mxu0 %v8539_v7 }
0x10a5   : > { %7427 = vmatprep.subr.bf16.mxu0 %v8543_v9 }
0x10a8   : > { %7429 = vmatpush1.bf16.msra.mxu0 %v8546_v15 }
0x10a9   : > { %7431 = vmatprep.subr.bf16.mxu0 %v8549_v18 }
0x10ac   : > { %7433 = vmatpush1.bf16.msra.mxu0 %v8552_v21 }
0x10ad   : > { %7500 = vmatprep.subr.bf16.mxu0 %v8373_v55 }
0x10af   : > { %6191 = vmatmul.mubr.msk.f32.vlgmr.msra.gmra.mrb[12].mxu0 %vm405_vm1, %v2254_v31 }
0x10b0   : > { %7502 = vmatpush3.bf16.msra.mxu0 %v8574_v56  ;;  %6725 = vmatprep.mubr.msk.f32.mxu0 %vm8374_vm0, %v8371_v8 }
0x10b1   : > { %7503 = vmatprep.subr.bf16.mxu0 %v8373_v55 }
0x10b4   : > { %7505 = vmatpush3.bf16.msra.mxu0 %v8578_v60 }
0x10b5   : > { %7506 = vmatprep.subr.bf16.mxu0 %v8373_v55 }
0x10b8   : > { %7508 = vmatpush3.bf16.msra.mxu0 %v8584_v63 }
0x10b9   : > { %7509 = vmatprep.subr.bf16.mxu0 %v8373_v55 }
0x10bc   : > { %7511 = vmatpush3.bf16.msra.mxu0 %v8590_v4 }
0x10bd   : > { %7512 = vmatprep.subr.bf16.mxu0 %v8373_v55 }
0x1152   : > { %v2399_v36 = vpop.f32.mrb[10].mxu0 }
0x1153   : > { %v7877_v56 = vadd.f32 %v2399_v36, %v8657_v44  ;;  %v6678_v39 = vpop.f32.mrb[11].mxu0 }
0x1155   : > { %8102 = vtanh.f32 %v7877_v56  ;;  %v6189_v27 = vmul.f32 -1.442695, %v7877_v56 }
0x115f   : > { %v8103_v45 = vpop.eup %8102 }
0x1160   : > { %2413 = vrot.lane.b32.xlu0 %v8103_v45, %s8375_s19 }
0x1182   : > { %v2567_v48 = vpop.f32.mrb[12].mxu0 }
0x1183   : > { %v2569_v60 = vpop.f32.mrb[13].mxu0  ;;  %v7878_v33 = vadd.f32 %v2567_v48, %v8569_v38 }
0x1184   : > { %v7879_v49 = vadd.f32 %v2569_v60, %v8562_v30 }
0x1185   : > { %v6192_v62 = vmul.f32 -1.442695, %v7878_v33 }
0x1186   : > { %8104 = vtanh.f32 %v7879_v49  ;;  %v6193_v56 = vmul.f32 -1.442695, %v7879_v49 }
0x1187   : > { %8106 = vpow2.f32 %v6189_v27 }
0x1190   : > { %v8105_v63 = vpop.eup %8104 }
0x1191   : > { %2589 = vrot.lane.b32.xlu1 %v8105_v63, %s8372_s9  ;;  %v8107_v4 = vpop.eup %8106 }
0x1192   : > { %v2407_v50 = vadd.f32 1.0, %v8107_v4 }
0x1194   : > { %8108 = vrcp.f32 %v2407_v50 }
0x1195   : > { %8110 = vpow2.f32 %v6192_v62 }
0x119e   : > { %v8109_v54 = vpop.eup %8108 }
0x119f   : > { %v8111_v0 = vpop.eup %8110  ;;  %v2411_v14 = vmul.f32 %v8109_v54, %v8922_v51 }
0x11a0   : > { %v2580_v5 = vadd.f32 1.0, %v8111_v0 }
0x11a2   : > { %8112 = vrcp.f32 %v2580_v5 }
0x11ac   : > { %v8113_v10 = vpop.eup %8112 }
0x11ad   : > { %v2587_v42 = vmul.f32 %v8113_v10, %v8927_v6 }
0x11d2   : > { %v2414_v44 = vpop.permute.xlu0 %2413 }
0x11d3   : > { %v2416_v61 = vmul.f32 %v8109_v54, %v2414_v44 }
0x11d5   : > { %2418 = vrot.lane.b32.xlu0 %v2416_v61, %s8375_s19 }
0x1203   : > { %v2590_v57 = vpop.permute.xlu1 %2589 }
0x1204   : > { %v2592_v13 = vmul.f32 %v8113_v10, %v2590_v57 }
0x1206   : > { %2594 = vrot.lane.b32.xlu1 %v2592_v13, %s8372_s9 }
0x1247   : > { %v2419_v19 = vpop.permute.xlu0 %2418 }
0x1248   : > { %v8986_v3 = vadd.f32 %v2419_v19, %v2411_v14 }
0x124a   : > { %8114 = vtanh.f32 %v8986_v3 }
0x1254   : > { %v8115_v20 = vpop.eup %8114 }
0x1255   : > { %2424 = vrot.lane.b32.xlu0 %v8115_v20, %s8375_s19 }
0x1278   : > { %v2595_v31 = vpop.permute.xlu1 %2594 }
0x1279   : > { %v8991_v11 = vadd.f32 %v2595_v31, %v2587_v42 }
0x127b   : > { %8116 = vtanh.f32 %v8991_v11 }
0x127c   : > { %8118 = vpow2.f32 %v6193_v56 }
0x1285   : > { %v8117_v24 = vpop.eup %8116 }
0x1286   : > { %2600 = vrot.lane.b32.xlu1 %v8117_v24, %s8372_s9  ;;  %v8119_v39 = vpop.eup %8118 }
0x1287   : > { %v2581_v45 = vadd.f32 1.0, %v8119_v39  ;;  %v278_v39 = vld [vmem:[#allocation3 + $0x260] sm:$0xff] }
0x1289   : > { %8120 = vrcp.f32 %v2581_v45  ;;  %v279_v45 = vld [vmem:[#allocation3 + $0x270] sm:$0xff] }
0x1293   : > { %v8121_v48 = vpop.eup %8120 }
0x12c7   : > { %v2425_v36 = vpop.permute.xlu0 %2424 }
0x12c8   : > { %v2427_v51 = vmul.f32 %v8109_v54, %v2425_v36 }
0x12ca   : > { %2678 = vrot.lane.b32.xlu0 %v2427_v51, %s8372_s9 }
0x12f8   : > { %v2601_v60 = vpop.permute.xlu1 %2600 }
0x12f9   : > { %v2603_v6 = vmul.f32 %v8121_v48, %v2601_v60  ;;  %v282_v48 = vld [vmem:[#allocation3 + $0x2a0] sm:$0xff]  ;;  %v7519_v60 = vpack.c.bf16 %v279_v45, %v278_v39  ;;  %v304_v45 = vld [vmem:[#allocation3 + $0x378] sm:$0xff] }
0x12fb   : > { %6696 = vmatmul.mubr.msk.f32.vlgmr.msra.gmra.mrb[12].mxu1 %vm405_vm1, %v2603_v6 }
0x12fc   : > { %7448 = vmatpush3.bf16.msra.mxu1 %v8607_v32  ;;  %6706 = vmatprep.mubr.msk.f32.mxu1 %vm8374_vm0, %v8371_v8 }
0x12fd   : > { %7449 = vmatprep.subr.bf16.mxu1 %v8373_v55 }
0x1300   : > { %7451 = vmatpush3.bf16.msra.mxu1 %v8611_v43 }
0x1301   : > { %7453 = vmatprep.subr.bf16.mxu1 %v8482_v12  ;;  %v6197_v12 = vld [vmem:[%s8475_s21 + $0x38] sm:$0xff] }
0x133c   : > { %v2679_v49 = vpop.permute.xlu0 %2678 }
0x133d   : > { %6707 = vmatmul.mubr.msk.f32.vlgmr.msra.gmra.mrb[12].mxu1 %vm585_vm2, %v2679_v49  ;;  %v280_v49 = vld [vmem:[#allocation3 + $0x280] sm:$0xff] }
0x133e   : > { %7455 = vmatpush1.bf16.msra.mxu1 %v8484_v16  ;;  %2843 = vmatprep.mubr.f32.mxu1 %v8371_v8 }
0x133f   : > { %7457 = vmatprep.subr.bf16.mxu1 %v8486_v17  ;;  %v9034_v17 = vld [vmem:[#allocation3 + $0x250] ss:$0 sm:$0xff] }
0x1342   : > { %7459 = vmatpush1.bf16.msra.mxu1 %v8490_v22 }
0x1343   : > { %7461 = vmatprep.subr.bf16.mxu1 %v8493_v23 }
0x1346   : > { %7463 = vmatpush1.bf16.msra.mxu1 %v8496_v28 }
0x1347   : > { %7465 = vmatprep.subr.bf16.mxu1 %v8499_v29 }
0x134a   : > { %7467 = vmatpush1.bf16.msra.mxu1 %v8502_v34 }
0x134b   : > { %7469 = vmatprep.subr.bf16.mxu1 %v8505_v35 }
0x134e   : > { %7471 = vmatpush1.bf16.msra.mxu1 %v8508_v40 }
0x134f   : > { %7473 = vmatprep.subr.bf16.mxu1 %v8511_v41 }
0x1352   : > { %7475 = vmatpush1.bf16.msra.mxu1 %v8514_v46 }
0x1353   : > { %7477 = vmatprep.subr.bf16.mxu1 %v8517_v47 }
0x1356   : > { %7479 = vmatpush1.bf16.msra.mxu1 %v8520_v52 }
0x1357   : > { %7481 = vmatprep.subr.bf16.mxu1 %v8523_v53 }
0x135a   : > { %7483 = vmatpush1.bf16.msra.mxu1 %v8526_v58 }
0x135b   : > { %7485 = vmatprep.subr.bf16.mxu1 %v8529_v59 }
0x135d   : > { %2844 = vmatmul.mubr.f32.vlgmr.msra.gmra.mrb[14].mxu1 %v6197_v12  ;;  %v281_v12 = vld [vmem:[#allocation3 + $0x290] sm:$0xff] }
0x135e   : > { %7487 = vmatpush1.bf16.msra.mxu1 %v8533_v1  ;;  %2914 = vmatprep.mubr.f32.mxu1 %v8371_v8 }
0x135f   : > { %7489 = vmatprep.subr.bf16.mxu1 %v8536_v2 }
0x1362   : > { %7491 = vmatpush1.bf16.msra.mxu1 %v8539_v7 }
0x1363   : > { %7493 = vmatprep.subr.bf16.mxu1 %v8543_v9 }
0x1366   : > { %7495 = vmatpush1.bf16.msra.mxu1 %v8546_v15 }
0x1367   : > { %7497 = vmatprep.subr.bf16.mxu1 %v8549_v18 }
0x136a   : > { %7499 = vmatpush1.bf16.msra.mxu1 %v8552_v21 }
0x136b   : > { %7524 = vmatprep.subr.bf16.mxu1 %v8373_v55 }
0x136d   : > { %6198 = vmatmul.mubr.msk.f32.vlgmr.msra.gmra.mrb[14].mxu1 %vm405_vm1, %v2603_v6  ;;  %v283_v6 = vld [vmem:[#allocation3 + $0x2b0] sm:$0xff] }
0x136e   : > { %6758 = vmatprep.mubr.msk.f32.mxu1 %vm8374_vm0, %v8371_v8 }
0x1410   : > { %v2748_v16 = vpop.f32.mrb[12].mxu1 }
0x1411   : > { %v7880_v22 = vadd.f32 %v9034_v17, %v2748_v16  ;;  %v6708_v23 = vpop.f32.mrb[13].mxu1  ;;  %v9061_v16 = vpack.c.bf16 %v283_v6, %v282_v48  ;;  %v306_v48 = vld [vmem:[#allocation3 + $0x388] sm:$0xff] }
0x1412   : > { %v7522_v23 = vpack.c.bf16 %v281_v12, %v280_v49  ;;  %v9115_v6 = vpack.c.bf16 %v306_v48, %v304_v45  ;;  %v303_v49 = vld [vmem:[#allocation3 + $0x370] sm:$0xff]  ;;  %v305_v12 = vld [vmem:[#allocation3 + $0x380] sm:$0xff] }
0x1413   : > { %8122 = vtanh.f32 %v7880_v22  ;;  %v6196_v41 = vmul.f32 -1.442695, %v7880_v22  ;;  %v285_v22 = vld [vmem:[#allocation3 + $0x2d0] sm:$0xff]  ;;  %7526 = vmatpush3.bf16.msra.mxu1 %v9061_v16 }
0x1414   : > { %7527 = vmatprep.subr.bf16.mxu1 %v8373_v55 }
0x141d   : > { %v8123_v28 = vpop.eup %8122 }
0x141e   : > { %2762 = vrot.lane.b32.xlu1 %v8123_v28, %s8375_s19 }
0x1440   : > { %v2916_v29 = vpop.f32.mrb[14].mxu1 }
0x1441   : > { %v2918_v34 = vpop.f32.mrb[15].mxu1  ;;  %v7881_v59 = vadd.f32 %v2916_v29, %v8569_v38 }
0x1442   : > { %v7882_v35 = vadd.f32 %v2918_v34, %v8562_v30 }
0x1443   : > { %v6199_v1 = vmul.f32 -1.442695, %v7881_v59 }
0x1444   : > { %8124 = vtanh.f32 %v7882_v35  ;;  %v6200_v33 = vmul.f32 -1.442695, %v7882_v35 }
0x1445   : > { %8126 = vpow2.f32 %v6196_v41 }
0x144e   : > { %v8125_v40 = vpop.eup %8124 }
0x144f   : > { %2938 = vrot.lane.b32.xlu0 %v8125_v40, %s8372_s9  ;;  %v8127_v46 = vpop.eup %8126 }
0x1450   : > { %v2756_v47 = vadd.f32 1.0, %v8127_v46 }
0x1452   : > { %8128 = vrcp.f32 %v2756_v47  ;;  %v286_v47 = vld [vmem:[#allocation3 + $0x2e0] ss:$0 sm:$0xff] }
0x1453   : > { %8130 = vpow2.f32 %v6199_v1 }
0x145c   : > { %v8129_v52 = vpop.eup %8128 }
0x145d   : > { %v8131_v2 = vpop.eup %8130  ;;  %v2760_v21 = vmul.f32 %v8129_v52, %v8986_v3 }
0x145e   : > { %v2929_v7 = vadd.f32 1.0, %v8131_v2 }
0x1460   : > { %8132 = vrcp.f32 %v2929_v7 }
0x146a   : > { %v8133_v9 = vpop.eup %8132 }
0x146b   : > { %v2936_v38 = vmul.f32 %v8133_v9, %v8991_v11 }
0x1490   : > { %v2763_v53 = vpop.permute.xlu1 %2762 }
0x1491   : > { %v2765_v58 = vmul.f32 %v8129_v52, %v2763_v53 }
0x1493   : > { %2767 = vrot.lane.b32.xlu1 %v2765_v58, %s8375_s19 }
0x14c1   : > { %v2939_v15 = vpop.permute.xlu0 %2938 }
0x14c2   : > { %v2941_v18 = vmul.f32 %v8133_v9, %v2939_v15 }
0x14c4   : > { %2943 = vrot.lane.b32.xlu0 %v2941_v18, %s8372_s9 }
0x1505   : > { %v2768_v30 = vpop.permute.xlu1 %2767 }
0x1506   : > { %v2770_v63 = vadd.f32 %v2768_v30, %v2760_v21 }
0x1508   : > { %8134 = vtanh.f32 %v2770_v63 }
0x1512   : > { %v8135_v27 = vpop.eup %8134 }
0x1513   : > { %2773 = vrot.lane.b32.xlu1 %v8135_v27, %s8375_s19 }
0x1536   : > { %v2944_v4 = vpop.permute.xlu0 %2943 }
0x1537   : > { %v2946_v50 = vadd.f32 %v2944_v4, %v2936_v38  ;;  %v288_v38 = vld [vmem:[#allocation3 + $0x2f8] sm:$0xff]  ;;  %v290_v4 = vld [vmem:[#allocation3 + $0x308] sm:$0xff] }
0x1539   : > { %8136 = vtanh.f32 %v2946_v50  ;;  %v287_v50 = vld [vmem:[#allocation3 + $0x2f0] sm:$0xff] }
0x153a   : > { %8138 = vpow2.f32 %v6200_v33  ;;  %v294_v33 = vld [vmem:[#allocation3 + $0x328] sm:$0xff] }
0x1543   : > { %v8137_v54 = vpop.eup %8136 }
0x1544   : > { %2949 = vrot.lane.b32.xlu0 %v8137_v54, %s8372_s9  ;;  %v8139_v62 = vpop.eup %8138  ;;  %v9085_v54 = vpack.c.bf16 %v290_v4, %v288_v38  ;;  %v315_v38 = vld [vmem:[#allocation3 + $0x3e0] sm:$0xff] }
0x1545   : > { %v2930_v0 = vadd.f32 1.0, %v8139_v62 }
0x1547   : > { %8140 = vrcp.f32 %v2930_v0 }
0x1551   : > { %v8141_v5 = vpop.eup %8140 }
0x1585   : > { %v2774_v44 = vpop.permute.xlu1 %2773 }
0x1586   : > { %v2776_v61 = vmul.f32 %v8129_v52, %v2774_v44  ;;  %v289_v44 = vld [vmem:[#allocation3 + $0x300] sm:$0xff] }
0x1587   : > { %v9087_v62 = vpack.c.bf16 %v289_v44, %v287_v50  ;;  %v317_v50 = vld [vmem:[#allocation3 + $0x400] sm:$0xff]  ;;  %v318_v44 = vld [vmem:[#allocation3 + $0x410] sm:$0xff] }
0x1588   : > { %3027 = vrot.lane.b32.xlu1 %v2776_v61, %s8372_s9  ;;  %v292_v61 = vld [vmem:[#allocation3 + $0x318] sm:$0xff] }
0x1589   : > { %v9089_v0 = vpack.c.bf16 %v294_v33, %v292_v61  ;;  %v9154_v61 = vpack.c.bf16 %v318_v44, %v317_v50  ;;  %v319_v33 = vld [vmem:[#allocation3 + $0x420] sm:$0xff] }
0x15b6   : > { %v2950_v10 = vpop.permute.xlu0 %2949 }
0x15b7   : > { %v2952_v57 = vmul.f32 %v8141_v5, %v2950_v10  ;;  %v291_v5 = vld [vmem:[#allocation3 + $0x310] sm:$0xff]  ;;  %v293_v10 = vld [vmem:[#allocation3 + $0x320] sm:$0xff] }
0x15b9   : > { %6726 = vmatmul.mubr.msk.f32.vlgmr.msra.gmra.mrb[14].mxu0 %vm405_vm1, %v2952_v57  ;;  %v296_v57 = vld [vmem:[#allocation3 + $0x338] sm:$0xff] }
0x15ba   : > { %7514 = vmatpush3.bf16.msra.mxu0 %v8607_v32  ;;  %6736 = vmatprep.mubr.msk.f32.mxu0 %vm8374_vm0, %v8371_v8 }
0x15bb   : > { %7515 = vmatprep.subr.bf16.mxu0 %v8373_v55 }
0x15be   : > { %7517 = vmatpush3.bf16.msra.mxu0 %v8611_v43 }
0x15bf   : > { %7518 = vmatprep.subr.bf16.mxu0 %v8373_v55 }
0x15fa   : > { %v3028_v13 = vpop.permute.xlu1 %3027 }
0x15fb   : > { %6737 = vmatmul.mubr.msk.f32.vlgmr.msra.gmra.mrb[14].mxu0 %vm585_vm2, %v3028_v13  ;;  %v298_v13 = vld [vmem:[#allocation3 + $0x348] sm:$0xff] }
0x15fc   : > { %6747 = vmatprep.mubr.msk.f32.mxu0 %vm8374_vm0, %v8371_v8  ;;  %7520 = vmatpush3.bf16.msra.mxu0 %v7519_v60 }
0x15fd   : > { %7521 = vmatprep.subr.bf16.mxu0 %v8373_v55 }
0x1600   : > { %7523 = vmatpush3.bf16.msra.mxu0 %v7522_v23  ;;  %v9118_v23 = vpack.c.bf16 %v305_v12, %v303_v49 }
0x1601   : > { %7531 = vmatprep.subr.bf16.mxu0 %v9085_v54 }
0x16ce   : > { %v3097_v14 = vpop.f32.mrb[14].mxu0 }
0x16cf   : > { %v7883_v19 = vadd.f32 %v9034_v17, %v3097_v14  ;;  %v6738_v3 = vpop.f32.mrb[15].mxu0  ;;  %v284_v17 = vld [vmem:[#allocation3 + $0x2c0] sm:$0xff]  ;;  %v9093_v14 = vpack.c.bf16 %v293_v10, %v291_v5  ;;  %v320_v5 = vld [vmem:[#allocation3 + $0x430] sm:$0xff] }
0x16d0   : > { %v9065_v28 = vpack.c.bf16 %v285_v22, %v284_v17  ;;  %v308_v17 = vld [vmem:[#allocation3 + $0x398] sm:$0xff]  ;;  %v310_v22 = vld [vmem:[#allocation3 + $0x3a8] sm:$0xff]  ;;  %v9158_v10 = vpack.c.bf16 %v320_v5, %v319_v33 }
0x16d1   : > { %8142 = vtanh.f32 %v7883_v19  ;;  %v6203_v20 = vmul.f32 -1.442695, %v7883_v19  ;;  %v9096_v19 = vpack.c.bf16 %v298_v13, %v296_v57 }
0x16d2   : > { %7529 = vmatpush3.bf16.msra.mxu1 %v9065_v28 }
0x16d3   : > { %8144 = vpow2.f32 %v6203_v20  ;;  %7554 = vmatprep.subr.bf16.mxu1 %v8373_v55 }
0x16d5   : > { %6759 = vmatmul.mubr.f32.vlgmr.msra.gmra.mrb[16].mxu1 %v8371_v8 }
0x16d6   : > { %6777 = vmatprep.mubr.msk.f32.mxu1 %vm8374_vm0, %v8371_v8 }
0x16db   : > { %v8143_v32 = vpop.eup %8142 }
0x16dc   : > { %3111 = vrot.lane.b32.xlu0 %v8143_v32, %s8375_s19 }
0x16dd   : > { %v8145_v42 = vpop.eup %8144 }
0x16de   : > { %v3105_v43 = vadd.f32 1.0, %v8145_v42  ;;  %v295_v42 = vld [vmem:[#allocation3 + $0x330] sm:$0xff] }
0x16e0   : > { %8146 = vrcp.f32 %v3105_v43  ;;  %v297_v43 = vld [vmem:[#allocation3 + $0x340] sm:$0xff] }
0x16ea   : > { %v8147_v31 = vpop.eup %8146 }
0x16eb   : > { %v3109_v36 = vmul.f32 %v8147_v31, %v2770_v63 }
0x174e   : > { %v3112_v11 = vpop.permute.xlu0 %3111 }
0x174f   : > { %v3114_v24 = vmul.f32 %v8147_v31, %v3112_v11  ;;  %v302_v11 = vld [vmem:[#allocation3 + $0x368] sm:$0xff] }
0x1751   : > { %3116 = vrot.lane.b32.xlu1 %v3114_v24, %s8375_s19  ;;  %v9102_v24 = vpack.c.bf16 %v297_v43, %v295_v42 }
0x17a8   : > { %v3267_v41 = vpop.f32.mrb[16].mxu1 }
0x17a9   : > { %v6760_v46 = vpop.f32.mrb[17].mxu1 }
0x17c3   : > { %v3117_v51 = vpop.permute.xlu1 %3116 }
0x17c4   : > { %v3119_v56 = vadd.f32 %v3117_v51, %v3109_v36  ;;  %v299_v51 = vld [vmem:[#allocation3 + $0x350] sm:$0xff] }
0x17c6   : > { %8148 = vtanh.f32 %v3119_v56  ;;  %v301_v56 = vld [vmem:[#allocation3 + $0x360] sm:$0xff] }
0x17c7   : > { %v9111_v60 = vpack.c.bf16 %v301_v56, %v299_v51  ;;  %v9186_v56 = vld [vmem:[#allocation3 + $0x440] ss:$0 sm:$0xff] }
0x17d0   : > { %v8149_v29 = vpop.eup %8148 }
0x17d1   : > { %3122 = vrot.lane.b32.xlu0 %v8149_v29, %s8375_s19  ;;  %v9121_v29 = vpack.c.bf16 %v310_v22, %v308_v17 }
0x1843   : > { %v3123_v34 = vpop.permute.xlu0 %3122 }
0x1844   : > { %v3125_v35 = vmul.f32 %v8147_v31, %v3123_v34  ;;  %v300_v31 = vld [vmem:[#allocation3 + $0x358] sm:$0xff]  ;;  %v307_v34 = vld [vmem:[#allocation3 + $0x390] sm:$0xff] }
0x1845   : > { %v9104_v36 = vpack.c.bf16 %v302_v11, %v300_v31 }
0x1846   : > { %3127 = vrot.lane.b32.xlu1 %v3125_v35, %s8372_s9  ;;  %v309_v35 = vld [vmem:[#allocation3 + $0x3a0] sm:$0xff] }
0x18b8   : > { %v3128_v40 = vpop.permute.xlu1 %3127 }
0x18b9   : > { %6748 = vmatmul.mubr.msk.f32.vlgmr.msra.gmra.mrb[16].mxu0 %vm585_vm2, %v3128_v40  ;;  %v9124_v40 = vpack.c.bf16 %v309_v35, %v307_v34 }
0x18ba   : > { %3376 = vmatprep.mubr.f32.mxu0 %v8371_v8  ;;  %7533 = vmatpush1.bf16.msra.mxu0 %v9087_v62 }
0x18bb   : > { %7535 = vmatprep.subr.bf16.mxu0 %v9089_v0 }
0x18be   : > { %7537 = vmatpush1.bf16.msra.mxu0 %v9093_v14 }
0x18bf   : > { %7539 = vmatprep.subr.bf16.mxu0 %v9096_v19 }
0x198c   : > { %v3197_v52 = vpop.f32.mrb[16].mxu0 }
0x198d   : > { %v9077_v53 = vadd.f32 %v3197_v52, %v286_v47  ;;  %v6749_v58 = vpop.f32.mrb[17].mxu0 }
0x198f   : > { %v3271_v59 = vadd.f32 %v3267_v41, %v9077_v53  ;;  %v312_v41 = vld [vmem:[#allocation3 + $0x3b0] ss:$8 sm:$0x3] }
0x1990   : > { %v9137_v46 = vrot.slane %v312_v41, %v330_v26 }
0x1991   : > { %8150 = vtanh.f32 %v3271_v59  ;;  %v6205_v2 = vmul.f32 -1.442695, %v3271_v59 }
0x1993   : > { %8152 = vpow2.f32 %v6205_v2 }
0x199b   : > { %v8151_v1 = vpop.eup %8150 }
0x199c   : > { %3281 = vrot.lane.b32.xlu0 %v8151_v1, %s8375_s19  ;;  %v9143_v1 = vrot.slane %v312_v41, %v326_v37  ;;  %v9150_v37 = vpack.c.bf16 %v316_v25, %v315_v38 }
0x199d   : > { %v8153_v7 = vpop.eup %8152 }
0x199e   : > { %v3275_v9 = vadd.f32 1.0, %v8153_v7 }
0x19a0   : > { %8154 = vrcp.f32 %v3275_v9 }
0x19aa   : > { %v8155_v15 = vpop.eup %8154 }
0x19ab   : > { %v3279_v30 = vmul.f32 0.0, %v8155_v15 }
0x1a0e   : > { %v3282_v18 = vpop.permute.xlu0 %3281 }
0x1a0f   : > { %v3284_v21 = vmul.f32 %v8155_v15, %v3282_v18 }
0x1a11   : > { %3286 = vrot.lane.b32.xlu1 %v3284_v21, %s8375_s19 }
0x1a83   : > { %v3287_v63 = vpop.permute.xlu1 %3286 }
0x1a84   : > { %v9082_v27 = vadd.f32 %v3287_v63, %v3279_v30  ;;  %v313_v30 = vld [vmem:[#allocation3 + $0x3c0] sm:$0xff]  ;;  %v314_v63 = vld [vmem:[#allocation3 + $0x3d0] sm:$0xff] }
0x1a85   : > { %v9147_v4 = vpack.c.bf16 %v314_v63, %v313_v30 }
0x1a86   : > { %8156 = vtanh.f32 %v9082_v27 }
0x1a87   : > { %7556 = vmatpush3.bf16.msra.mxu1 %v9147_v4 }
0x1a88   : > { %7557 = vmatprep.subr.bf16.mxu1 %v8373_v55 }
0x1a8b   : > { %7559 = vmatpush3.bf16.msra.mxu1 %v9150_v37 }
0x1a8c   : > { %7560 = vmatprep.subr.bf16.mxu1 %v8373_v55 }
0x1a8f   : > { %7562 = vmatpush3.bf16.msra.mxu1 %v9154_v61 }
0x1a90   : > { %v8157_v3 = vpop.eup %8156  ;;  %7563 = vmatprep.subr.bf16.mxu1 %v8373_v55 }
0x1a91   : > { %3292 = vrot.lane.b32.xlu0 %v8157_v3, %s8375_s19 }
0x1a93   : > { %7565 = vmatpush3.bf16.msra.mxu1 %v9158_v10 }
0x1a94   : > { %7566 = vmatprep.subr.bf16.mxu1 %v8373_v55 }
0x1b03   : > { %v3293_v32 = vpop.permute.xlu0 %3292 }
0x1b04   : > { %v3295_v20 = vmul.f32 %v8155_v15, %v3293_v32 }
0x1b06   : > { %3308 = vrot.lane.b32.xlu1 %v3295_v20, %s8372_s9 }
0x1b78   : > { %v9106_v39 = vpop.permute.xlu1 %3308 }
0x1b79   : > { %6206 = vmatmul.mubr.msk.f32.vlgmr.msra.gmra.mrb[18].mxu0 %vm585_vm2, %v9106_v39 }
0x1b7a   : > { %7541 = vmatpush1.bf16.msra.mxu0 %v9102_v24  ;;  %3447 = vmatprep.mubr.f32.mxu0 %v8371_v8 }
0x1b7b   : > { %7543 = vmatprep.subr.bf16.mxu0 %v9104_v36 }
0x1b7e   : > { %7545 = vmatpush1.bf16.msra.mxu0 %v9111_v60 }
0x1b7f   : > { %7547 = vmatprep.subr.bf16.mxu0 %v9115_v6 }
0x1b82   : > { %7549 = vmatpush1.bf16.msra.mxu0 %v9118_v23 }
0x1b83   : > { %7551 = vmatprep.subr.bf16.mxu0 %v9121_v29 }
0x1b86   : > { %7553 = vmatpush1.bf16.msra.mxu0 %v9124_v40 }
0x1b87   : > { %7573 = vmatprep.subr.bf16.mxu0 %v9085_v54 }
0x1b89   : > { %3448 = vmatmul.mubr.f32.vlgmr.msra.gmra.mrb[18].mxu0 %v8371_v8 }
0x1b8a   : > { %7575 = vmatpush1.bf16.msra.mxu0 %v9087_v62  ;;  %3724 = vmatprep.mubr.f32.mxu0 %v8371_v8 }
0x1b8b   : > { %7577 = vmatprep.subr.bf16.mxu0 %v9089_v0 }
0x1b8e   : > { %7579 = vmatpush1.bf16.msra.mxu0 %v9093_v14 }
0x1b8f   : > { %7581 = vmatprep.subr.bf16.mxu0 %v9096_v19 }
0x1c5c   : > { %v3449_v47 = vpop.f32.mrb[18].mxu0 }
0x1c5d   : > { %v3451_v52 = vpop.f32.mrb[19].mxu0  ;;  %v7884_v2 = vadd.f32 %v3449_v47, %v9143_v1 }
0x1c5e   : > { %v7885_v58 = vadd.f32 %v3451_v52, %v9137_v46 }
0x1c5f   : > { %v6207_v7 = vmul.f32 -1.442695, %v7884_v2 }
0x1c60   : > { %8158 = vtanh.f32 %v7885_v58  ;;  %v6208_v20 = vmul.f32 -1.442695, %v7885_v58 }
0x1c61   : > { %8160 = vpow2.f32 %v6207_v7 }
0x1c6a   : > { %v8159_v59 = vpop.eup %8158 }
0x1c6b   : > { %3471 = vrot.lane.b32.xlu0 %v8159_v59, %s8372_s9  ;;  %v8161_v9 = vpop.eup %8160 }
0x1c6c   : > { %v3462_v15 = vadd.f32 1.0, %v8161_v9 }
0x1c6e   : > { %8162 = vrcp.f32 %v3462_v15 }
0x1c78   : > { %v8163_v26 = vpop.eup %8162 }
0x1c79   : > { %v3469_v57 = vmul.f32 0.0, %v8163_v26 }
0x1cdd   : > { %v3472_v18 = vpop.permute.xlu0 %3471 }
0x1cde   : > { %v3474_v21 = vmul.f32 %v8163_v26, %v3472_v18 }
0x1ce0   : > { %3476 = vrot.lane.b32.xlu1 %v3474_v21, %s8372_s9 }
0x1d52   : > { %v3477_v13 = vpop.permute.xlu1 %3476 }
0x1d53   : > { %v9163_v3 = vadd.f32 %v3477_v13, %v3469_v57 }
0x1d55   : > { %8164 = vtanh.f32 %v9163_v3 }
0x1d56   : > { %8166 = vpow2.f32 %v6208_v20 }
0x1d5f   : > { %v8165_v32 = vpop.eup %8164 }
0x1d60   : > { %3482 = vrot.lane.b32.xlu0 %v8165_v32, %s8372_s9  ;;  %v8167_v42 = vpop.eup %8166 }
0x1d61   : > { %v3463_v43 = vadd.f32 1.0, %v8167_v42 }
0x1d63   : > { %8168 = vrcp.f32 %v3463_v43 }
0x1d6d   : > { %v8169_v31 = vpop.eup %8168 }
0x1dd2   : > { %v3483_v11 = vpop.permute.xlu0 %3482 }
0x1dd3   : > { %v3485_v51 = vmul.f32 %v8169_v31, %v3483_v11 }
0x1dd5   : > { %6778 = vmatmul.mubr.msk.f32.vlgmr.msra.gmra.mrb[18].mxu1 %vm405_vm1, %v3485_v51 }
0x1dd6   : > { %7568 = vmatpush3.bf16.msra.mxu1 %v9061_v16  ;;  %6788 = vmatprep.mubr.msk.f32.mxu1 %vm8374_vm0, %v8371_v8 }
0x1dd7   : > { %7569 = vmatprep.subr.bf16.mxu1 %v8373_v55 }
0x1dda   : > { %7571 = vmatpush3.bf16.msra.mxu1 %v9065_v28 }
0x1ddb   : > { %7596 = vmatprep.subr.bf16.mxu1 %v8373_v55 }
0x1ddd   : > { %6789 = vmatmul.mubr.msk.f32.vlgmr.msra.gmra.mrb[20].mxu1 %vm585_vm2, %v9106_v39 }
0x1dde   : > { %7598 = vmatpush3.bf16.msra.mxu1 %v9147_v4  ;;  %6807 = vmatprep.mubr.msk.f32.mxu1 %vm8374_vm0, %v8371_v8 }
0x1ddf   : > { %7599 = vmatprep.subr.bf16.mxu1 %v8373_v55 }
0x1de2   : > { %7601 = vmatpush3.bf16.msra.mxu1 %v9150_v37 }
0x1de3   : > { %7602 = vmatprep.subr.bf16.mxu1 %v8373_v55 }
0x1de6   : > { %7604 = vmatpush3.bf16.msra.mxu1 %v9154_v61 }
0x1de7   : > { %7605 = vmatprep.subr.bf16.mxu1 %v8373_v55 }
0x1dea   : > { %7607 = vmatpush3.bf16.msra.mxu1 %v9158_v10 }
0x1deb   : > { %7608 = vmatprep.subr.bf16.mxu1 %v8373_v55 }
0x1ea8   : > { %v3555_v39 = vpop.f32.mrb[18].mxu1 }
0x1ea9   : > { %v3556_v45 = vadd.f32 %v3555_v39, %v9186_v56  ;;  %v6779_v48 = vpop.f32.mrb[19].mxu1 }
0x1eab   : > { %3559 = vst [vmem:[%s9190_s24] sm:$0xff] %v3556_v45 }
0x1eb0   : > { %v3626_v49 = vpop.f32.mrb[20].mxu1 }
0x1eb1   : > { %v3630_v12 = vadd.f32 %v3626_v49, %v9077_v53  ;;  %v6790_v17 = vpop.f32.mrb[21].mxu1 }
0x1eb3   : > { %8170 = vtanh.f32 %v3630_v12  ;;  %v6211_v34 = vmul.f32 -1.442695, %v3630_v12 }
0x1eb5   : > { %8172 = vpow2.f32 %v6211_v34 }
0x1ebd   : > { %v8171_v22 = vpop.eup %8170 }
0x1ebe   : > { %3640 = vrot.lane.b32.xlu1 %v8171_v22, %s8375_s19 }
0x1ebf   : > { %v8173_v35 = vpop.eup %8172 }
0x1ec0   : > { %v3634_v41 = vadd.f32 1.0, %v8173_v35 }
0x1ec2   : > { %8174 = vrcp.f32 %v3634_v41 }
0x1ecc   : > { %v8175_v47 = vpop.eup %8174 }
0x1ecd   : > { %v3638_v59 = vmul.f32 %v8175_v47, %v9082_v27 }
0x1f30   : > { %v3641_v52 = vpop.permute.xlu1 %3640 }
0x1f31   : > { %v3643_v58 = vmul.f32 %v8175_v47, %v3641_v52 }
0x1f33   : > { %3645 = vrot.lane.b32.xlu0 %v3643_v58, %s8375_s19 }
0x1fa5   : > { %v3646_v2 = vpop.permute.xlu0 %3645 }
0x1fa6   : > { %v9197_v7 = vadd.f32 %v3646_v2, %v3638_v59 }
0x1fa8   : > { %8176 = vtanh.f32 %v9197_v7 }
0x1fb2   : > { %v8177_v9 = vpop.eup %8176 }
0x1fb3   : > { %3651 = vrot.lane.b32.xlu1 %v8177_v9, %s8375_s19 }
0x2025   : > { %v3652_v15 = vpop.permute.xlu1 %3651 }
0x2026   : > { %v3654_v26 = vmul.f32 %v8175_v47, %v3652_v15 }
0x2028   : > { %3656 = vrot.lane.b32.xlu0 %v3654_v26, %s8372_s9 }
0x209a   : > { %v3657_v18 = vpop.permute.xlu0 %3656 }
0x209b   : > { %6212 = vmatmul.mubr.msk.f32.vlgmr.msra.gmra.mrb[20].mxu0 %vm585_vm2, %v3657_v18 }
0x209c   : > { %7583 = vmatpush1.bf16.msra.mxu0 %v9102_v24  ;;  %3795 = vmatprep.mubr.f32.mxu0 %v8371_v8 }
0x209d   : > { %7585 = vmatprep.subr.bf16.mxu0 %v9104_v36 }
0x20a0   : > { %7587 = vmatpush1.bf16.msra.mxu0 %v9111_v60 }
0x20a1   : > { %7589 = vmatprep.subr.bf16.mxu0 %v9115_v6 }
0x20a4   : > { %7591 = vmatpush1.bf16.msra.mxu0 %v9118_v23 }
0x20a5   : > { %7593 = vmatprep.subr.bf16.mxu0 %v9121_v29 }
0x20a8   : > { %7595 = vmatpush1.bf16.msra.mxu0 %v9124_v40 }
0x20a9   : > { %7615 = vmatprep.subr.bf16.mxu0 %v9085_v54 }
0x20ab   : > { %6213 = vmatmul.mubr.msk.f32.vlgmr.msra.gmra.mrb[20].mxu0 %vm405_vm1, %v3485_v51 }
0x20ac   : > { %7617 = vmatpush1.bf16.msra.mxu0 %v9087_v62  ;;  %4073 = vmatprep.mubr.f32.mxu0 %v8371_v8 }
0x20ad   : > { %7619 = vmatprep.subr.bf16.mxu0 %v9089_v0 }
0x20b0   : > { %7621 = vmatpush1.bf16.msra.mxu0 %v9093_v14 }
0x20b1   : > { %7623 = vmatprep.subr.bf16.mxu0 %v9096_v19 }
0x217e   : > { %v3797_v27 = vpop.f32.mrb[20].mxu0 }
0x217f   : > { %v3799_v21 = vpop.f32.mrb[21].mxu0  ;;  %v7886_v38 = vadd.f32 %v3797_v27, %v9143_v1 }
0x2180   : > { %v7887_v30 = vadd.f32 %v3799_v21, %v9137_v46 }
0x2181   : > { %v6214_v25 = vmul.f32 -1.442695, %v7886_v38 }
0x2182   : > { %8178 = vtanh.f32 %v7887_v30  ;;  %v6215_v43 = vmul.f32 -1.442695, %v7887_v30 }
0x2183   : > { %8180 = vpow2.f32 %v6214_v25 }
0x218c   : > { %v8179_v63 = vpop.eup %8178 }
0x218d   : > { %3819 = vrot.lane.b32.xlu1 %v8179_v63, %s8372_s9  ;;  %v8181_v50 = vpop.eup %8180 }
0x218e   : > { %v3810_v44 = vadd.f32 1.0, %v8181_v50 }
0x2190   : > { %8182 = vrcp.f32 %v3810_v44 }
0x219a   : > { %v8183_v33 = vpop.eup %8182 }
0x219b   : > { %v3817_v13 = vmul.f32 %v8183_v33, %v9163_v3 }
0x21ff   : > { %v3820_v5 = vpop.permute.xlu1 %3819 }
0x2200   : > { %v3822_v57 = vmul.f32 %v8183_v33, %v3820_v5 }
0x2202   : > { %3824 = vrot.lane.b32.xlu0 %v3822_v57, %s8372_s9 }
0x2274   : > { %v3825_v32 = vpop.permute.xlu0 %3824 }
0x2275   : > { %v9223_v20 = vadd.f32 %v3825_v32, %v3817_v13 }
0x2277   : > { %8184 = vtanh.f32 %v9223_v20 }
0x2278   : > { %8186 = vpow2.f32 %v6215_v43 }
0x2281   : > { %v8185_v42 = vpop.eup %8184 }
0x2282   : > { %3830 = vrot.lane.b32.xlu1 %v8185_v42, %s8372_s9  ;;  %v8187_v31 = vpop.eup %8186 }
0x2283   : > { %v3811_v11 = vadd.f32 1.0, %v8187_v31 }
0x2285   : > { %8188 = vrcp.f32 %v3811_v11 }
0x228f   : > { %v8189_v51 = vpop.eup %8188 }
0x22f4   : > { %v3831_v39 = vpop.permute.xlu1 %3830 }
0x22f5   : > { %v3833_v45 = vmul.f32 %v8189_v51, %v3831_v39 }
0x22f7   : > { %6808 = vmatmul.mubr.msk.f32.vlgmr.msra.gmra.mrb[22].mxu1 %vm405_vm1, %v3833_v45 }
0x22f8   : > { %7610 = vmatpush3.bf16.msra.mxu1 %v9061_v16  ;;  %6818 = vmatprep.mubr.msk.f32.mxu1 %vm8374_vm0, %v8371_v8 }
0x22f9   : > { %7611 = vmatprep.subr.bf16.mxu1 %v8373_v55 }
0x22fc   : > { %7613 = vmatpush3.bf16.msra.mxu1 %v9065_v28 }
0x22fd   : > { %7638 = vmatprep.subr.bf16.mxu1 %v8373_v55 }
0x22ff   : > { %6819 = vmatmul.mubr.msk.f32.vlgmr.msra.gmra.mrb[24].mxu1 %vm585_vm2, %v3657_v18 }
0x2300   : > { %7640 = vmatpush3.bf16.msra.mxu1 %v9147_v4  ;;  %6837 = vmatprep.mubr.msk.f32.mxu1 %vm8374_vm0, %v8371_v8 }
0x2301   : > { %7641 = vmatprep.subr.bf16.mxu1 %v8373_v55 }
0x2304   : > { %7643 = vmatpush3.bf16.msra.mxu1 %v9150_v37 }
0x2305   : > { %7644 = vmatprep.subr.bf16.mxu1 %v8373_v55 }
0x2308   : > { %7646 = vmatpush3.bf16.msra.mxu1 %v9154_v61 }
0x2309   : > { %7647 = vmatprep.subr.bf16.mxu1 %v8373_v55 }
0x230c   : > { %7649 = vmatpush3.bf16.msra.mxu1 %v9158_v10 }
0x230d   : > { %7650 = vmatprep.subr.bf16.mxu1 %v8373_v55 }
0x23ca   : > { %v3903_v3 = vpop.f32.mrb[22].mxu1 }
0x23cb   : > { %v3904_v48 = vadd.f32 %v3903_v3, %v9186_v56  ;;  %v6809_v49 = vpop.f32.mrb[23].mxu1 }
0x23cd   : > { %6217 = vst [vmem:[%s9190_s24 + $0x8] sm:$0xff] %v3904_v48 }
0x23d2   : > { %v3975_v12 = vpop.f32.mrb[24].mxu1 }
0x23d3   : > { %v3979_v17 = vadd.f32 %v3975_v12, %v9077_v53  ;;  %v6820_v22 = vpop.f32.mrb[25].mxu1 }
0x23d5   : > { %8190 = vtanh.f32 %v3979_v17  ;;  %v6219_v35 = vmul.f32 -1.442695, %v3979_v17 }
0x23d7   : > { %8192 = vpow2.f32 %v6219_v35 }
0x23df   : > { %v8191_v34 = vpop.eup %8190 }
0x23e0   : > { %3989 = vrot.lane.b32.xlu0 %v8191_v34, %s8375_s19 }
0x23e1   : > { %v8193_v41 = vpop.eup %8192 }
0x23e2   : > { %v3983_v47 = vadd.f32 1.0, %v8193_v41 }
0x23e4   : > { %8194 = vrcp.f32 %v3983_v47 }
0x23ee   : > { %v8195_v52 = vpop.eup %8194 }
0x23ef   : > { %v3987_v2 = vmul.f32 %v8195_v52, %v9197_v7 }
0x2452   : > { %v3990_v58 = vpop.permute.xlu0 %3989 }
0x2453   : > { %v3992_v59 = vmul.f32 %v8195_v52, %v3990_v58 }
0x2455   : > { %3994 = vrot.lane.b32.xlu1 %v3992_v59, %s8375_s19 }
0x24c7   : > { %v3995_v9 = vpop.permute.xlu1 %3994 }
0x24c8   : > { %v9251_v15 = vadd.f32 %v3995_v9, %v3987_v2 }
0x24ca   : > { %8196 = vtanh.f32 %v9251_v15 }
0x24d4   : > { %v8197_v26 = vpop.eup %8196 }
0x24d5   : > { %4000 = vrot.lane.b32.xlu0 %v8197_v26, %s8375_s19 }
0x2547   : > { %v4001_v18 = vpop.permute.xlu0 %4000 }
0x2548   : > { %v4003_v27 = vmul.f32 %v8195_v52, %v4001_v18 }
0x254a   : > { %4005 = vrot.lane.b32.xlu1 %v4003_v27, %s8372_s9 }
0x25bc   : > { %v4006_v21 = vpop.permute.xlu1 %4005 }
0x25bd   : > { %6220 = vmatmul.mubr.msk.f32.vlgmr.msra.gmra.mrb[22].mxu0 %vm585_vm2, %v4006_v21 }
0x25be   : > { %7625 = vmatpush1.bf16.msra.mxu0 %v9102_v24  ;;  %4144 = vmatprep.mubr.f32.mxu0 %v8371_v8 }
0x25bf   : > { %7627 = vmatprep.subr.bf16.mxu0 %v9104_v36 }
0x25c2   : > { %7629 = vmatpush1.bf16.msra.mxu0 %v9111_v60 }
0x25c3   : > { %7631 = vmatprep.subr.bf16.mxu0 %v9115_v6 }
0x25c6   : > { %7633 = vmatpush1.bf16.msra.mxu0 %v9118_v23 }
0x25c7   : > { %7635 = vmatprep.subr.bf16.mxu0 %v9121_v29 }
0x25ca   : > { %7637 = vmatpush1.bf16.msra.mxu0 %v9124_v40 }
0x25cb   : > { %7657 = vmatprep.subr.bf16.mxu0 %v9085_v54 }
0x25cd   : > { %6221 = vmatmul.mubr.msk.f32.vlgmr.msra.gmra.mrb[22].mxu0 %vm405_vm1, %v3833_v45 }
0x25ce   : > { %7659 = vmatpush1.bf16.msra.mxu0 %v9087_v62  ;;  %4422 = vmatprep.mubr.f32.mxu0 %v8371_v8 }
0x25cf   : > { %7661 = vmatprep.subr.bf16.mxu0 %v9089_v0 }
0x25d2   : > { %7663 = vmatpush1.bf16.msra.mxu0 %v9093_v14 }
0x25d3   : > { %7665 = vmatprep.subr.bf16.mxu0 %v9096_v19 }
0x26a0   : > { %v4146_v7 = vpop.f32.mrb[22].mxu0 }
0x26a1   : > { %v4148_v30 = vpop.f32.mrb[23].mxu0  ;;  %v7888_v25 = vadd.f32 %v4146_v7, %v9143_v1 }
0x26a2   : > { %v7889_v63 = vadd.f32 %v4148_v30, %v9137_v46 }
0x26a3   : > { %v6222_v50 = vmul.f32 -1.442695, %v7888_v25 }
0x26a4   : > { %8198 = vtanh.f32 %v7889_v63  ;;  %v6223_v11 = vmul.f32 -1.442695, %v7889_v63 }
0x26a5   : > { %8200 = vpow2.f32 %v6222_v50 }
0x26ae   : > { %v8199_v38 = vpop.eup %8198 }
0x26af   : > { %4168 = vrot.lane.b32.xlu0 %v8199_v38, %s8372_s9  ;;  %v8201_v44 = vpop.eup %8200 }
0x26b0   : > { %v4159_v33 = vadd.f32 1.0, %v8201_v44 }
0x26b2   : > { %8202 = vrcp.f32 %v4159_v33 }
0x26bc   : > { %v8203_v5 = vpop.eup %8202 }
0x26bd   : > { %v4166_v32 = vmul.f32 %v8203_v5, %v9223_v20 }
0x2721   : > { %v4169_v57 = vpop.permute.xlu0 %4168 }
0x2722   : > { %v4171_v13 = vmul.f32 %v8203_v5, %v4169_v57 }
0x2724   : > { %4173 = vrot.lane.b32.xlu1 %v4171_v13, %s8372_s9 }
0x2796   : > { %v4174_v42 = vpop.permute.xlu1 %4173 }
0x2797   : > { %v9277_v43 = vadd.f32 %v4174_v42, %v4166_v32 }
0x2799   : > { %8204 = vtanh.f32 %v9277_v43 }
0x279a   : > { %8206 = vpow2.f32 %v6223_v11 }
0x27a3   : > { %v8205_v31 = vpop.eup %8204 }
0x27a4   : > { %4179 = vrot.lane.b32.xlu0 %v8205_v31, %s8372_s9  ;;  %v8207_v51 = vpop.eup %8206 }
0x27a5   : > { %v4160_v39 = vadd.f32 1.0, %v8207_v51 }
0x27a7   : > { %8208 = vrcp.f32 %v4160_v39 }
0x27b1   : > { %v8209_v45 = vpop.eup %8208 }
0x2816   : > { %v4180_v3 = vpop.permute.xlu0 %4179 }
0x2817   : > { %v4182_v48 = vmul.f32 %v8209_v45, %v4180_v3 }
0x2819   : > { %6838 = vmatmul.mubr.msk.f32.vlgmr.msra.gmra.mrb[26].mxu1 %vm405_vm1, %v4182_v48 }
0x281a   : > { %7652 = vmatpush3.bf16.msra.mxu1 %v9061_v16  ;;  %6848 = vmatprep.mubr.msk.f32.mxu1 %vm8374_vm0, %v8371_v8 }
0x281b   : > { %7653 = vmatprep.subr.bf16.mxu1 %v8373_v55 }
0x281e   : > { %7655 = vmatpush3.bf16.msra.mxu1 %v9065_v28 }
0x281f   : > { %7680 = vmatprep.subr.bf16.mxu1 %v8373_v55 }
0x2821   : > { %6849 = vmatmul.mubr.msk.f32.vlgmr.msra.gmra.mrb[28].mxu1 %vm585_vm2, %v4006_v21 }
0x2822   : > { %7682 = vmatpush3.bf16.msra.mxu1 %v9147_v4  ;;  %6867 = vmatprep.mubr.msk.f32.mxu1 %vm8374_vm0, %v8371_v8 }
0x2823   : > { %7683 = vmatprep.subr.bf16.mxu1 %v8373_v55 }
0x2826   : > { %7685 = vmatpush3.bf16.msra.mxu1 %v9150_v37 }
0x2827   : > { %7686 = vmatprep.subr.bf16.mxu1 %v8373_v55 }
0x282a   : > { %7688 = vmatpush3.bf16.msra.mxu1 %v9154_v61 }
0x282b   : > { %7689 = vmatprep.subr.bf16.mxu1 %v8373_v55 }
0x282e   : > { %7691 = vmatpush3.bf16.msra.mxu1 %v9158_v10 }
0x282f   : > { %7692 = vmatprep.subr.bf16.mxu1 %v8373_v55 }
0x28ec   : > { %v4252_v20 = vpop.f32.mrb[26].mxu1 }
0x28ed   : > { %v4253_v49 = vadd.f32 %v4252_v20, %v9186_v56  ;;  %v6839_v12 = vpop.f32.mrb[27].mxu1 }
0x28ef   : > { %6225 = vst [vmem:[%s9190_s24 + $0x10] sm:$0xff] %v4253_v49 }
0x28f4   : > { %v4324_v17 = vpop.f32.mrb[28].mxu1 }
0x28f5   : > { %v4328_v22 = vadd.f32 %v4324_v17, %v9077_v53  ;;  %v6850_v34 = vpop.f32.mrb[29].mxu1 }
0x28f7   : > { %8210 = vtanh.f32 %v4328_v22  ;;  %v6227_v41 = vmul.f32 -1.442695, %v4328_v22 }
0x28f9   : > { %8212 = vpow2.f32 %v6227_v41 }
0x2901   : > { %v8211_v35 = vpop.eup %8210 }
0x2902   : > { %4338 = vrot.lane.b32.xlu1 %v8211_v35, %s8375_s19 }
0x2903   : > { %v8213_v47 = vpop.eup %8212 }
0x2904   : > { %v4332_v52 = vadd.f32 1.0, %v8213_v47 }
0x2906   : > { %8214 = vrcp.f32 %v4332_v52 }
0x2910   : > { %v8215_v58 = vpop.eup %8214 }
0x2911   : > { %v4336_v9 = vmul.f32 %v8215_v58, %v9251_v15 }
0x2974   : > { %v4339_v59 = vpop.permute.xlu1 %4338 }
0x2975   : > { %v4341_v2 = vmul.f32 %v8215_v58, %v4339_v59 }
0x2977   : > { %4343 = vrot.lane.b32.xlu0 %v4341_v2, %s8375_s19 }
0x29e9   : > { %v4344_v26 = vpop.permute.xlu0 %4343 }
0x29ea   : > { %v9305_v18 = vadd.f32 %v4344_v26, %v4336_v9 }
0x29ec   : > { %8216 = vtanh.f32 %v9305_v18 }
0x29f6   : > { %v8217_v27 = vpop.eup %8216 }
0x29f7   : > { %4349 = vrot.lane.b32.xlu1 %v8217_v27, %s8375_s19 }
0x2a69   : > { %v4350_v21 = vpop.permute.xlu1 %4349 }
0x2a6a   : > { %v4352_v7 = vmul.f32 %v8215_v58, %v4350_v21 }
0x2a6c   : > { %4354 = vrot.lane.b32.xlu0 %v4352_v7, %s8372_s9 }
0x2ade   : > { %v4355_v30 = vpop.permute.xlu0 %4354 }
0x2adf   : > { %6228 = vmatmul.mubr.msk.f32.vlgmr.msra.gmra.mrb[24].mxu0 %vm585_vm2, %v4355_v30 }
0x2ae0   : > { %7667 = vmatpush1.bf16.msra.mxu0 %v9102_v24  ;;  %4493 = vmatprep.mubr.f32.mxu0 %v8371_v8 }
0x2ae1   : > { %7669 = vmatprep.subr.bf16.mxu0 %v9104_v36 }
0x2ae4   : > { %7671 = vmatpush1.bf16.msra.mxu0 %v9111_v60 }
0x2ae5   : > { %7673 = vmatprep.subr.bf16.mxu0 %v9115_v6 }
0x2ae8   : > { %7675 = vmatpush1.bf16.msra.mxu0 %v9118_v23 }
0x2ae9   : > { %7677 = vmatprep.subr.bf16.mxu0 %v9121_v29 }
0x2aec   : > { %7679 = vmatpush1.bf16.msra.mxu0 %v9124_v40 }
0x2aed   : > { %7699 = vmatprep.subr.bf16.mxu0 %v9085_v54 }
0x2aef   : > { %6229 = vmatmul.mubr.msk.f32.vlgmr.msra.gmra.mrb[24].mxu0 %vm405_vm1, %v4182_v48 }
0x2af0   : > { %7701 = vmatpush1.bf16.msra.mxu0 %v9087_v62  ;;  %4771 = vmatprep.mubr.f32.mxu0 %v8371_v8 }
0x2af1   : > { %7703 = vmatprep.subr.bf16.mxu0 %v9089_v0 }
0x2af4   : > { %7705 = vmatpush1.bf16.msra.mxu0 %v9093_v14 }
0x2af5   : > { %7707 = vmatprep.subr.bf16.mxu0 %v9096_v19 }
0x2bc2   : > { %v4495_v15 = vpop.f32.mrb[24].mxu0 }
0x2bc3   : > { %v4497_v63 = vpop.f32.mrb[25].mxu0  ;;  %v7890_v50 = vadd.f32 %v4495_v15, %v9143_v1 }
0x2bc4   : > { %v7891_v38 = vadd.f32 %v4497_v63, %v9137_v46 }
0x2bc5   : > { %v6230_v44 = vmul.f32 -1.442695, %v7890_v50 }
0x2bc6   : > { %8218 = vtanh.f32 %v7891_v38  ;;  %v6231_v39 = vmul.f32 -1.442695, %v7891_v38 }
0x2bc7   : > { %8220 = vpow2.f32 %v6230_v44 }
0x2bd0   : > { %v8219_v25 = vpop.eup %8218 }
0x2bd1   : > { %4517 = vrot.lane.b32.xlu1 %v8219_v25, %s8372_s9  ;;  %v8221_v33 = vpop.eup %8220 }
0x2bd2   : > { %v4508_v5 = vadd.f32 1.0, %v8221_v33 }
0x2bd4   : > { %8222 = vrcp.f32 %v4508_v5 }
0x2bde   : > { %v8223_v57 = vpop.eup %8222 }
0x2bdf   : > { %v4515_v42 = vmul.f32 %v8223_v57, %v9277_v43 }
0x2c43   : > { %v4518_v13 = vpop.permute.xlu1 %4517 }
0x2c44   : > { %v4520_v32 = vmul.f32 %v8223_v57, %v4518_v13 }
0x2c46   : > { %4522 = vrot.lane.b32.xlu0 %v4520_v32, %s8372_s9 }
0x2cb8   : > { %v4523_v31 = vpop.permute.xlu0 %4522 }
0x2cb9   : > { %v9331_v11 = vadd.f32 %v4523_v31, %v4515_v42 }
0x2cbb   : > { %8224 = vtanh.f32 %v9331_v11 }
0x2cbc   : > { %8226 = vpow2.f32 %v6231_v39 }
0x2cc5   : > { %v8225_v51 = vpop.eup %8224 }
0x2cc6   : > { %4528 = vrot.lane.b32.xlu1 %v8225_v51, %s8372_s9  ;;  %v8227_v45 = vpop.eup %8226 }
0x2cc7   : > { %v4509_v3 = vadd.f32 1.0, %v8227_v45 }
0x2cc9   : > { %8228 = vrcp.f32 %v4509_v3 }
0x2cd3   : > { %v8229_v48 = vpop.eup %8228 }
0x2d38   : > { %v4529_v20 = vpop.permute.xlu1 %4528 }
0x2d39   : > { %v4531_v49 = vmul.f32 %v8229_v48, %v4529_v20 }
0x2d3b   : > { %6868 = vmatmul.mubr.msk.f32.vlgmr.msra.gmra.mrb[30].mxu1 %vm405_vm1, %v4531_v49 }
0x2d3c   : > { %7694 = vmatpush3.bf16.msra.mxu1 %v9061_v16  ;;  %6878 = vmatprep.mubr.msk.f32.mxu1 %vm8374_vm0, %v8371_v8 }
0x2d3d   : > { %7695 = vmatprep.subr.bf16.mxu1 %v8373_v55 }
0x2d40   : > { %7697 = vmatpush3.bf16.msra.mxu1 %v9065_v28 }
0x2d41   : > { %7722 = vmatprep.subr.bf16.mxu1 %v8373_v55 }
0x2d43   : > { %6879 = vmatmul.mubr.msk.f32.vlgmr.msra.gmra.mrb[32].mxu1 %vm585_vm2, %v4355_v30 }
0x2d44   : > { %7724 = vmatpush3.bf16.msra.mxu1 %v9147_v4  ;;  %6897 = vmatprep.mubr.msk.f32.mxu1 %vm8374_vm0, %v8371_v8 }
0x2d45   : > { %7725 = vmatprep.subr.bf16.mxu1 %v8373_v55 }
0x2d48   : > { %7727 = vmatpush3.bf16.msra.mxu1 %v9150_v37 }
0x2d49   : > { %7728 = vmatprep.subr.bf16.mxu1 %v8373_v55 }
0x2d4c   : > { %7730 = vmatpush3.bf16.msra.mxu1 %v9154_v61 }
0x2d4d   : > { %7731 = vmatprep.subr.bf16.mxu1 %v8373_v55 }
0x2d50   : > { %7733 = vmatpush3.bf16.msra.mxu1 %v9158_v10 }
0x2d51   : > { %7734 = vmatprep.subr.bf16.mxu1 %v8373_v55 }
0x2e0e   : > { %v4601_v43 = vpop.f32.mrb[30].mxu1 }
0x2e0f   : > { %v4602_v12 = vadd.f32 %v4601_v43, %v9186_v56  ;;  %v6869_v17 = vpop.f32.mrb[31].mxu1 }
0x2e11   : > { %6233 = vst [vmem:[%s9190_s24 + $0x18] sm:$0xff] %v4602_v12 }
0x2e16   : > { %v4673_v22 = vpop.f32.mrb[32].mxu1 }
0x2e17   : > { %v4677_v34 = vadd.f32 %v4673_v22, %v9077_v53  ;;  %v6880_v35 = vpop.f32.mrb[33].mxu1 }
0x2e19   : > { %8230 = vtanh.f32 %v4677_v34  ;;  %v6235_v47 = vmul.f32 -1.442695, %v4677_v34 }
0x2e1b   : > { %8232 = vpow2.f32 %v6235_v47 }
0x2e23   : > { %v8231_v41 = vpop.eup %8230 }
0x2e24   : > { %4687 = vrot.lane.b32.xlu0 %v8231_v41, %s8375_s19 }
0x2e25   : > { %v8233_v52 = vpop.eup %8232 }
0x2e26   : > { %v4681_v58 = vadd.f32 1.0, %v8233_v52 }
0x2e28   : > { %8234 = vrcp.f32 %v4681_v58 }
0x2e32   : > { %v8235_v59 = vpop.eup %8234 }
0x2e33   : > { %v4685_v26 = vmul.f32 %v8235_v59, %v9305_v18 }
0x2e96   : > { %v4688_v2 = vpop.permute.xlu0 %4687 }
0x2e97   : > { %v4690_v9 = vmul.f32 %v8235_v59, %v4688_v2 }
0x2e99   : > { %4692 = vrot.lane.b32.xlu1 %v4690_v9, %s8375_s19 }
0x2f0b   : > { %v4693_v27 = vpop.permute.xlu1 %4692 }
0x2f0c   : > { %v9359_v21 = vadd.f32 %v4693_v27, %v4685_v26 }
0x2f0e   : > { %8236 = vtanh.f32 %v9359_v21 }
0x2f18   : > { %v8237_v7 = vpop.eup %8236 }
0x2f19   : > { %4698 = vrot.lane.b32.xlu0 %v8237_v7, %s8375_s19 }
0x2f8b   : > { %v4699_v30 = vpop.permute.xlu0 %4698 }
0x2f8c   : > { %v4701_v15 = vmul.f32 %v8235_v59, %v4699_v30 }
0x2f8e   : > { %4703 = vrot.lane.b32.xlu1 %v4701_v15, %s8372_s9 }
0x3000   : > { %v4704_v63 = vpop.permute.xlu1 %4703 }
0x3001   : > { %6236 = vmatmul.mubr.msk.f32.vlgmr.msra.gmra.mrb[26].mxu0 %vm585_vm2, %v4704_v63 }
0x3002   : > { %7709 = vmatpush1.bf16.msra.mxu0 %v9102_v24  ;;  %4842 = vmatprep.mubr.f32.mxu0 %v8371_v8 }
0x3003   : > { %7711 = vmatprep.subr.bf16.mxu0 %v9104_v36 }
0x3006   : > { %7713 = vmatpush1.bf16.msra.mxu0 %v9111_v60 }
0x3007   : > { %7715 = vmatprep.subr.bf16.mxu0 %v9115_v6 }
0x300a   : > { %7717 = vmatpush1.bf16.msra.mxu0 %v9118_v23 }
0x300b   : > { %7719 = vmatprep.subr.bf16.mxu0 %v9121_v29 }
0x300e   : > { %7721 = vmatpush1.bf16.msra.mxu0 %v9124_v40 }
0x300f   : > { %7741 = vmatprep.subr.bf16.mxu0 %v9085_v54 }
0x3011   : > { %6237 = vmatmul.mubr.msk.f32.vlgmr.msra.gmra.mrb[26].mxu0 %vm405_vm1, %v4531_v49 }
0x3012   : > { %7743 = vmatpush1.bf16.msra.mxu0 %v9087_v62  ;;  %5120 = vmatprep.mubr.f32.mxu0 %v8371_v8 }
0x3013   : > { %7745 = vmatprep.subr.bf16.mxu0 %v9089_v0 }
0x3016   : > { %7747 = vmatpush1.bf16.msra.mxu0 %v9093_v14 }
0x3017   : > { %7749 = vmatprep.subr.bf16.mxu0 %v9096_v19 }
0x30e4   : > { %v4844_v18 = vpop.f32.mrb[26].mxu0 }
0x30e5   : > { %v4846_v38 = vpop.f32.mrb[27].mxu0  ;;  %v7892_v44 = vadd.f32 %v4844_v18, %v9143_v1 }
0x30e6   : > { %v7893_v25 = vadd.f32 %v4846_v38, %v9137_v46 }
0x30e7   : > { %v6238_v33 = vmul.f32 -1.442695, %v7892_v44 }
0x30e8   : > { %8238 = vtanh.f32 %v7893_v25  ;;  %v6239_v3 = vmul.f32 -1.442695, %v7893_v25 }
0x30e9   : > { %8240 = vpow2.f32 %v6238_v33 }
0x30f2   : > { %v8239_v50 = vpop.eup %8238 }
0x30f3   : > { %4866 = vrot.lane.b32.xlu0 %v8239_v50, %s8372_s9  ;;  %v8241_v5 = vpop.eup %8240 }
0x30f4   : > { %v4857_v57 = vadd.f32 1.0, %v8241_v5 }
0x30f6   : > { %8242 = vrcp.f32 %v4857_v57 }
0x3100   : > { %v8243_v13 = vpop.eup %8242 }
0x3101   : > { %v4864_v31 = vmul.f32 %v8243_v13, %v9331_v11 }
0x3165   : > { %v4867_v32 = vpop.permute.xlu0 %4866 }
0x3166   : > { %v4869_v42 = vmul.f32 %v8243_v13, %v4867_v32 }
0x3168   : > { %4871 = vrot.lane.b32.xlu1 %v4869_v42, %s8372_s9 }
0x31da   : > { %v4872_v51 = vpop.permute.xlu1 %4871 }
0x31db   : > { %v9385_v39 = vadd.f32 %v4872_v51, %v4864_v31 }
0x31dd   : > { %8244 = vtanh.f32 %v9385_v39 }
0x31de   : > { %8246 = vpow2.f32 %v6239_v3 }
0x31e7   : > { %v8245_v45 = vpop.eup %8244 }
0x31e8   : > { %4877 = vrot.lane.b32.xlu0 %v8245_v45, %s8372_s9  ;;  %v8247_v48 = vpop.eup %8246 }
0x31e9   : > { %v4858_v20 = vadd.f32 1.0, %v8247_v48 }
0x31eb   : > { %8248 = vrcp.f32 %v4858_v20 }
0x31f5   : > { %v8249_v49 = vpop.eup %8248 }
0x325a   : > { %v4878_v43 = vpop.permute.xlu0 %4877 }
0x325b   : > { %v4880_v12 = vmul.f32 %v8249_v49, %v4878_v43 }
0x325d   : > { %6898 = vmatmul.mubr.msk.f32.vlgmr.msra.gmra.mrb[34].mxu1 %vm405_vm1, %v4880_v12 }
0x325e   : > { %7736 = vmatpush3.bf16.msra.mxu1 %v9061_v16  ;;  %6908 = vmatprep.mubr.msk.f32.mxu1 %vm8374_vm0, %v8371_v8 }
0x325f   : > { %7737 = vmatprep.subr.bf16.mxu1 %v8373_v55 }
0x3262   : > { %7739 = vmatpush3.bf16.msra.mxu1 %v9065_v28 }
0x3263   : > { %7764 = vmatprep.subr.bf16.mxu1 %v8373_v55 }
0x3265   : > { %6909 = vmatmul.mubr.msk.f32.vlgmr.msra.gmra.mrb[36].mxu1 %vm585_vm2, %v4704_v63 }
0x3266   : > { %7766 = vmatpush3.bf16.msra.mxu1 %v9147_v4  ;;  %6927 = vmatprep.mubr.msk.f32.mxu1 %vm8374_vm0, %v8371_v8 }
0x3267   : > { %7767 = vmatprep.subr.bf16.mxu1 %v8373_v55 }
0x326a   : > { %7769 = vmatpush3.bf16.msra.mxu1 %v9150_v37 }
0x326b   : > { %7770 = vmatprep.subr.bf16.mxu1 %v8373_v55 }
0x326e   : > { %7772 = vmatpush3.bf16.msra.mxu1 %v9154_v61 }
0x326f   : > { %7773 = vmatprep.subr.bf16.mxu1 %v8373_v55 }
0x3272   : > { %7775 = vmatpush3.bf16.msra.mxu1 %v9158_v10 }
0x3273   : > { %7776 = vmatprep.subr.bf16.mxu1 %v8373_v55 }
0x3330   : > { %v4950_v11 = vpop.f32.mrb[34].mxu1 }
0x3331   : > { %v4951_v17 = vadd.f32 %v4950_v11, %v9186_v56  ;;  %v6899_v22 = vpop.f32.mrb[35].mxu1 }
0x3333   : > { %6241 = vst [vmem:[%s9190_s24 + $0x20] sm:$0xff] %v4951_v17 }
0x3338   : > { %v5022_v34 = vpop.f32.mrb[36].mxu1 }
0x3339   : > { %v5026_v35 = vadd.f32 %v5022_v34, %v9077_v53  ;;  %v6910_v41 = vpop.f32.mrb[37].mxu1 }
0x333b   : > { %8250 = vtanh.f32 %v5026_v35  ;;  %v6243_v52 = vmul.f32 -1.442695, %v5026_v35 }
0x333d   : > { %8252 = vpow2.f32 %v6243_v52 }
0x3345   : > { %v8251_v47 = vpop.eup %8250 }
0x3346   : > { %5036 = vrot.lane.b32.xlu1 %v8251_v47, %s8375_s19 }
0x3347   : > { %v8253_v58 = vpop.eup %8252 }
0x3348   : > { %v5030_v59 = vadd.f32 1.0, %v8253_v58 }
0x334a   : > { %8254 = vrcp.f32 %v5030_v59 }
0x3354   : > { %v8255_v2 = vpop.eup %8254 }
0x3355   : > { %v5034_v27 = vmul.f32 %v8255_v2, %v9359_v21 }
0x33b8   : > { %v5037_v9 = vpop.permute.xlu1 %5036 }
0x33b9   : > { %v5039_v26 = vmul.f32 %v8255_v2, %v5037_v9 }
0x33bb   : > { %5041 = vrot.lane.b32.xlu0 %v5039_v26, %s8375_s19 }
0x342d   : > { %v5042_v7 = vpop.permute.xlu0 %5041 }
0x342e   : > { %v9413_v30 = vadd.f32 %v5042_v7, %v5034_v27 }
0x3430   : > { %8256 = vtanh.f32 %v9413_v30 }
0x343a   : > { %v8257_v15 = vpop.eup %8256 }
0x343b   : > { %5047 = vrot.lane.b32.xlu1 %v8257_v15, %s8375_s19 }
0x34ad   : > { %v5048_v63 = vpop.permute.xlu1 %5047 }
0x34ae   : > { %v5050_v18 = vmul.f32 %v8255_v2, %v5048_v63 }
0x34b0   : > { %5052 = vrot.lane.b32.xlu0 %v5050_v18, %s8372_s9 }
0x3522   : > { %v5053_v38 = vpop.permute.xlu0 %5052 }
0x3523   : > { %6244 = vmatmul.mubr.msk.f32.vlgmr.msra.gmra.mrb[28].mxu0 %vm585_vm2, %v5053_v38 }
0x3524   : > { %7751 = vmatpush1.bf16.msra.mxu0 %v9102_v24  ;;  %5191 = vmatprep.mubr.f32.mxu0 %v8371_v8 }
0x3525   : > { %7753 = vmatprep.subr.bf16.mxu0 %v9104_v36 }
0x3528   : > { %7755 = vmatpush1.bf16.msra.mxu0 %v9111_v60 }
0x3529   : > { %7757 = vmatprep.subr.bf16.mxu0 %v9115_v6 }
0x352c   : > { %7759 = vmatpush1.bf16.msra.mxu0 %v9118_v23 }
0x352d   : > { %7761 = vmatprep.subr.bf16.mxu0 %v9121_v29 }
0x3530   : > { %7763 = vmatpush1.bf16.msra.mxu0 %v9124_v40 }
0x3531   : > { %7783 = vmatprep.subr.bf16.mxu0 %v9085_v54 }
0x3533   : > { %6245 = vmatmul.mubr.msk.f32.vlgmr.msra.gmra.mrb[28].mxu0 %vm405_vm1, %v4880_v12 }
0x3534   : > { %7785 = vmatpush1.bf16.msra.mxu0 %v9087_v62  ;;  %5469 = vmatprep.mubr.f32.mxu0 %v8371_v8 }
0x3535   : > { %7787 = vmatprep.subr.bf16.mxu0 %v9089_v0 }
0x3538   : > { %7789 = vmatpush1.bf16.msra.mxu0 %v9093_v14 }
0x3539   : > { %7791 = vmatprep.subr.bf16.mxu0 %v9096_v19 }
0x3606   : > { %v5193_v21 = vpop.f32.mrb[28].mxu0 }
0x3607   : > { %v5195_v25 = vpop.f32.mrb[29].mxu0  ;;  %v7894_v33 = vadd.f32 %v5193_v21, %v9143_v1 }
0x3608   : > { %v7895_v50 = vadd.f32 %v5195_v25, %v9137_v46 }
0x3609   : > { %v6246_v5 = vmul.f32 -1.442695, %v7894_v33 }
0x360a   : > { %8258 = vtanh.f32 %v7895_v50  ;;  %v6247_v20 = vmul.f32 -1.442695, %v7895_v50 }
0x360b   : > { %8260 = vpow2.f32 %v6246_v5 }
0x3614   : > { %v8259_v44 = vpop.eup %8258 }
0x3615   : > { %5215 = vrot.lane.b32.xlu1 %v8259_v44, %s8372_s9  ;;  %v8261_v57 = vpop.eup %8260 }
0x3616   : > { %v5206_v13 = vadd.f32 1.0, %v8261_v57 }
0x3618   : > { %8262 = vrcp.f32 %v5206_v13 }
0x3622   : > { %v8263_v32 = vpop.eup %8262 }
0x3623   : > { %v5213_v51 = vmul.f32 %v8263_v32, %v9385_v39 }
0x3687   : > { %v5216_v42 = vpop.permute.xlu1 %5215 }
0x3688   : > { %v5218_v31 = vmul.f32 %v8263_v32, %v5216_v42 }
0x368a   : > { %5220 = vrot.lane.b32.xlu0 %v5218_v31, %s8372_s9 }
0x36fc   : > { %v5221_v45 = vpop.permute.xlu0 %5220 }
0x36fd   : > { %v9439_v3 = vadd.f32 %v5221_v45, %v5213_v51 }
0x36ff   : > { %8264 = vtanh.f32 %v9439_v3 }
0x3700   : > { %8266 = vpow2.f32 %v6247_v20 }
0x3709   : > { %v8265_v48 = vpop.eup %8264 }
0x370a   : > { %5226 = vrot.lane.b32.xlu1 %v8265_v48, %s8372_s9  ;;  %v8267_v49 = vpop.eup %8266 }
0x370b   : > { %v5207_v43 = vadd.f32 1.0, %v8267_v49 }
0x370d   : > { %8268 = vrcp.f32 %v5207_v43 }
0x3717   : > { %v8269_v12 = vpop.eup %8268 }
0x377c   : > { %v5227_v11 = vpop.permute.xlu1 %5226 }
0x377d   : > { %v5229_v17 = vmul.f32 %v8269_v12, %v5227_v11 }
0x377f   : > { %6928 = vmatmul.mubr.msk.f32.vlgmr.msra.gmra.mrb[38].mxu1 %vm405_vm1, %v5229_v17 }
0x3780   : > { %7778 = vmatpush3.bf16.msra.mxu1 %v9061_v16  ;;  %6938 = vmatprep.mubr.msk.f32.mxu1 %vm8374_vm0, %v8371_v8 }
0x3781   : > { %7779 = vmatprep.subr.bf16.mxu1 %v8373_v55 }
0x3784   : > { %7781 = vmatpush3.bf16.msra.mxu1 %v9065_v28 }
0x3785   : > { %7806 = vmatprep.subr.bf16.mxu1 %v8373_v55 }
0x3787   : > { %6939 = vmatmul.mubr.msk.f32.vlgmr.msra.gmra.mrb[40].mxu1 %vm585_vm2, %v5053_v38 }
0x3788   : > { %7808 = vmatpush3.bf16.msra.mxu1 %v9147_v4  ;;  %6957 = vmatprep.mubr.msk.f32.mxu1 %vm8374_vm0, %v8371_v8 }
0x3789   : > { %7809 = vmatprep.subr.bf16.mxu1 %v8373_v55 }
0x378c   : > { %7811 = vmatpush3.bf16.msra.mxu1 %v9150_v37 }
0x378d   : > { %7812 = vmatprep.subr.bf16.mxu1 %v8373_v55 }
0x3790   : > { %7814 = vmatpush3.bf16.msra.mxu1 %v9154_v61 }
0x3791   : > { %7815 = vmatprep.subr.bf16.mxu1 %v8373_v55 }
0x3794   : > { %7817 = vmatpush3.bf16.msra.mxu1 %v9158_v10 }
0x3795   : > { %7818 = vmatprep.subr.bf16.mxu1 %v8373_v55 }
0x3852   : > { %v5299_v39 = vpop.f32.mrb[38].mxu1 }
0x3853   : > { %v5300_v22 = vadd.f32 %v5299_v39, %v9186_v56  ;;  %v6929_v34 = vpop.f32.mrb[39].mxu1 }
0x3855   : > { %6249 = vst [vmem:[%s9190_s24 + $0x28] sm:$0xff] %v5300_v22 }
0x385a   : > { %v5371_v35 = vpop.f32.mrb[40].mxu1 }
0x385b   : > { %v5375_v41 = vadd.f32 %v5371_v35, %v9077_v53  ;;  %v6940_v47 = vpop.f32.mrb[41].mxu1 }
0x385d   : > { %8270 = vtanh.f32 %v5375_v41  ;;  %v6251_v58 = vmul.f32 -1.442695, %v5375_v41 }
0x385f   : > { %8272 = vpow2.f32 %v6251_v58 }
0x3867   : > { %v8271_v52 = vpop.eup %8270 }
0x3868   : > { %5385 = vrot.lane.b32.xlu0 %v8271_v52, %s8375_s19 }
0x3869   : > { %v8273_v59 = vpop.eup %8272 }
0x386a   : > { %v5379_v2 = vadd.f32 1.0, %v8273_v59 }
0x386c   : > { %8274 = vrcp.f32 %v5379_v2 }
0x3876   : > { %v8275_v9 = vpop.eup %8274 }
0x3877   : > { %v5383_v56 = vmul.f32 %v8275_v9, %v9413_v30 }
0x38da   : > { %v5386_v26 = vpop.permute.xlu0 %5385 }
0x38db   : > { %v5388_v27 = vmul.f32 %v8275_v9, %v5386_v26 }
0x38dd   : > { %5390 = vrot.lane.b32.xlu1 %v5388_v27, %s8375_s19 }
0x394f   : > { %v5391_v7 = vpop.permute.xlu1 %5390 }
0x3950   : > { %v9467_v15 = vadd.f32 %v5391_v7, %v5383_v56 }
0x3952   : > { %8276 = vtanh.f32 %v9467_v15 }
0x395c   : > { %v8277_v63 = vpop.eup %8276 }
0x395d   : > { %5396 = vrot.lane.b32.xlu0 %v8277_v63, %s8375_s19 }
0x39cf   : > { %v5397_v18 = vpop.permute.xlu0 %5396 }
0x39d0   : > { %v5399_v38 = vmul.f32 %v8275_v9, %v5397_v18 }
0x39d2   : > { %5401 = vrot.lane.b32.xlu1 %v5399_v38, %s8372_s9 }
0x3a44   : > { %v5402_v21 = vpop.permute.xlu1 %5401 }
0x3a45   : > { %6252 = vmatmul.mubr.msk.f32.vlgmr.msra.gmra.mrb[30].mxu0 %vm585_vm2, %v5402_v21 }
0x3a46   : > { %7793 = vmatpush1.bf16.msra.mxu0 %v9102_v24  ;;  %5540 = vmatprep.mubr.f32.mxu0 %v8371_v8 }
0x3a47   : > { %7795 = vmatprep.subr.bf16.mxu0 %v9104_v36 }
0x3a4a   : > { %7797 = vmatpush1.bf16.msra.mxu0 %v9111_v60 }
0x3a4b   : > { %7799 = vmatprep.subr.bf16.mxu0 %v9115_v6 }
0x3a4e   : > { %7801 = vmatpush1.bf16.msra.mxu0 %v9118_v23 }
0x3a4f   : > { %7803 = vmatprep.subr.bf16.mxu0 %v9121_v29 }
0x3a52   : > { %7805 = vmatpush1.bf16.msra.mxu0 %v9124_v40 }
0x3a53   : > { %7825 = vmatprep.subr.bf16.mxu0 %v9085_v54 }
0x3a55   : > { %6253 = vmatmul.mubr.msk.f32.vlgmr.msra.gmra.mrb[30].mxu0 %vm405_vm1, %v5229_v17 }
0x3a56   : > { %7827 = vmatpush1.bf16.msra.mxu0 %v9087_v62  ;;  %5818 = vmatprep.mubr.f32.mxu0 %v8371_v8 }
0x3a57   : > { %7829 = vmatprep.subr.bf16.mxu0 %v9089_v0 }
0x3a5a   : > { %7831 = vmatpush1.bf16.msra.mxu0 %v9093_v14 }
0x3a5b   : > { %7833 = vmatprep.subr.bf16.mxu0 %v9096_v19 }
0x3b28   : > { %v5542_v30 = vpop.f32.mrb[30].mxu0 }
0x3b29   : > { %v5544_v25 = vpop.f32.mrb[31].mxu0  ;;  %v7896_v54 = vadd.f32 %v5542_v30, %v9143_v1 }
0x3b2a   : > { %v7897_v50 = vadd.f32 %v5544_v25, %v9137_v46 }
0x3b2b   : > { %v6254_v33 = vmul.f32 -1.442695, %v7896_v54  ;;  %v6057_v54 = vld [vmem:[%s9190_s24 + $0x10] sm:$0xff] (%p9580_p9) }
0x3b2c   : > { %8278 = vtanh.f32 %v7897_v50  ;;  %v6255_v31 = vmul.f32 -1.442695, %v7897_v50  ;;  %v6053_v50 = vld [vmem:[%s9190_s24] sm:$0xff] (%p9580_p9)  ;;  %6058 = vst [vmem:[%s6011_s28 + $0x20] sm:$0xff] (%p9580_p9), %v6057_v54 }
0x3b2d   : > { %8280 = vpow2.f32 %v6254_v33  ;;  %v6059_v33 = vld [vmem:[%s9190_s24 + $0x18] sm:$0xff] (%p9580_p9)  ;;  %6054 = vst [vmem:[%s6011_s28] sm:$0xff] (%p9580_p9), %v6053_v50 }
0x3b2e   : > { %6060 = vst [vmem:[%s6011_s28 + $0x30] sm:$0xff] (%p9580_p9), %v6059_v33 }
0x3b36   : > { %v8279_v44 = vpop.eup %8278 }
0x3b37   : > { %5564 = vrot.lane.b32.xlu0 %v8279_v44, %s8372_s9  ;;  %v8281_v62 = vpop.eup %8280  ;;  %v6055_v44 = vld [vmem:[%s9190_s24 + $0x8] sm:$0xff] (%p9580_p9) }
0x3b38   : > { %v5555_v5 = vadd.f32 1.0, %v8281_v62  ;;  %v6061_v62 = vld [vmem:[%s9190_s24 + $0x20] sm:$0xff] (%p9580_p9)  ;;  %6056 = vst [vmem:[%s6011_s28 + $0x10] sm:$0xff] (%p9580_p9), %v6055_v44 }
0x3b39   : > { %6062 = vst [vmem:[%s6011_s28 + $0x40] sm:$0xff] (%p9580_p9), %v6061_v62 }
0x3b3a   : > { %8282 = vrcp.f32 %v5555_v5  ;;  %v6063_v5 = vld [vmem:[%s9190_s24 + $0x28] sm:$0xff] (%p9580_p9) }
0x3b3b   : > { %6064 = vst [vmem:[%s6011_s28 + $0x50] sm:$0xff] (%p9580_p9), %v6063_v5 }
0x3b44   : > { %v8283_v0 = vpop.eup %8282 }
0x3b45   : > { %v5562_v19 = vmul.f32 %v8283_v0, %v9439_v3 }
0x3ba9   : > { %v5565_v57 = vpop.permute.xlu0 %5564 }
0x3baa   : > { %v5567_v14 = vmul.f32 %v8283_v0, %v5565_v57 }
0x3bac   : > { %5569 = vrot.lane.b32.xlu1 %v5567_v14, %s8372_s9 }
0x3c1e   : > { %v5570_v13 = vpop.permute.xlu1 %5569 }
0x3c1f   : > { %v9493_v32 = vadd.f32 %v5570_v13, %v5562_v19 }
0x3c21   : > { %8284 = vtanh.f32 %v9493_v32 }
0x3c22   : > { %8286 = vpow2.f32 %v6255_v31 }
0x3c2b   : > { %v8285_v42 = vpop.eup %8284 }
0x3c2c   : > { %5575 = vrot.lane.b32.xlu0 %v8285_v42, %s8372_s9  ;;  %v8287_v51 = vpop.eup %8286 }
0x3c2d   : > { %v5556_v45 = vadd.f32 1.0, %v8287_v51 }
0x3c2f   : > { %8288 = vrcp.f32 %v5556_v45 }
0x3c39   : > { %v8289_v48 = vpop.eup %8288 }
0x3c9e   : > { %v5576_v20 = vpop.permute.xlu0 %5575 }
0x3c9f   : > { %v5578_v49 = vmul.f32 %v8289_v48, %v5576_v20 }
0x3ca1   : > { %6958 = vmatmul.mubr.msk.f32.vlgmr.msra.gmra.mrb[42].mxu1 %vm405_vm1, %v5578_v49 }
0x3ca2   : > { %7820 = vmatpush3.bf16.msra.mxu1 %v9061_v16  ;;  %6968 = vmatprep.mubr.msk.f32.mxu1 %vm8374_vm0, %v8371_v8 }
0x3ca3   : > { %7821 = vmatprep.subr.bf16.mxu1 %v8373_v55 }
0x3ca6   : > { %7823 = vmatpush3.bf16.msra.mxu1 %v9065_v28  ;;  %v9514_v28 = vld [vmem:[#allocation3 + $0x440] ss:$0 sm:$0xff] }
0x3ca7   : > { %7848 = vmatprep.subr.bf16.mxu1 %v8373_v55 }
0x3ca9   : > { %6969 = vmatmul.mubr.msk.f32.vlgmr.msra.gmra.mrb[44].mxu1 %vm585_vm2, %v5402_v21 }
0x3caa   : > { %7850 = vmatpush3.bf16.msra.mxu1 %v9147_v4  ;;  %6987 = vmatprep.mubr.msk.f32.mxu1 %vm8374_vm0, %v8371_v8 }
0x3cab   : > { %7851 = vmatprep.subr.bf16.mxu1 %v8373_v55 }
0x3cae   : > { %7853 = vmatpush3.bf16.msra.mxu1 %v9150_v37 }
0x3caf   : > { %7854 = vmatprep.subr.bf16.mxu1 %v8373_v55 }
0x3cb2   : > { %7856 = vmatpush3.bf16.msra.mxu1 %v9154_v61 }
0x3cb3   : > { %7857 = vmatprep.subr.bf16.mxu1 %v8373_v55 }
0x3cb6   : > { %7859 = vmatpush3.bf16.msra.mxu1 %v9158_v10 }
0x3d74   : > { %v5648_v16 = vpop.f32.mrb[42].mxu1 }
0x3d75   : > { %v5649_v4 = vadd.f32 %v9514_v28, %v5648_v16  ;;  %v6959_v3 = vpop.f32.mrb[43].mxu1 }
0x3d77   : > { %6257 = vst [vmem:[%s9190_s24 + $0x30] sm:$0xff] %v5649_v4 }
0x3d7c   : > { %v5720_v43 = vpop.f32.mrb[44].mxu1 }
0x3d7d   : > { %v5724_v12 = vadd.f32 %v5720_v43, %v9077_v53  ;;  %v6970_v11 = vpop.f32.mrb[45].mxu1 }
0x3d7e   : > { %v6065_v0 = vld [vmem:[%s9190_s24 + $0x30] sm:$0xff] (%p9580_p9) }
0x3d7f   : > { %8290 = vtanh.f32 %v5724_v12  ;;  %v6259_v61 = vmul.f32 -1.442695, %v5724_v12  ;;  %6066 = vst [vmem:[%s6011_s28 + $0x60] sm:$0xff] (%p9580_p9), %v6065_v0 }
0x3d81   : > { %8292 = vpow2.f32 %v6259_v61 }
0x3d89   : > { %v8291_v37 = vpop.eup %8290 }
0x3d8a   : > { %5734 = vrot.lane.b32.xlu1 %v8291_v37, %s8375_s19 }
0x3d8b   : > { %v8293_v55 = vpop.eup %8292 }
0x3d8c   : > { %v5728_v17 = vadd.f32 1.0, %v8293_v55 }
0x3d8e   : > { %8294 = vrcp.f32 %v5728_v17 }
0x3d98   : > { %v8295_v10 = vpop.eup %8294 }
0x3d99   : > { %v5732_v34 = vmul.f32 %v8295_v10, %v9467_v15 }
0x3dfc   : > { %v5735_v39 = vpop.permute.xlu1 %5734 }
0x3dfd   : > { %v5737_v22 = vmul.f32 %v8295_v10, %v5735_v39 }
0x3dff   : > { %5739 = vrot.lane.b32.xlu0 %v5737_v22, %s8375_s19 }
0x3e71   : > { %v5740_v35 = vpop.permute.xlu0 %5739 }
0x3e72   : > { %v5742_v41 = vadd.f32 %v5740_v35, %v5732_v34 }
0x3e74   : > { %8296 = vtanh.f32 %v5742_v41 }
0x3e7e   : > { %v8297_v53 = vpop.eup %8296 }
0x3e7f   : > { %5745 = vrot.lane.b32.xlu1 %v8297_v53, %s8375_s19 }
0x3ef1   : > { %v5746_v47 = vpop.permute.xlu1 %5745 }
0x3ef2   : > { %v5748_v52 = vmul.f32 %v8295_v10, %v5746_v47 }
0x3ef4   : > { %5750 = vrot.lane.b32.xlu0 %v5748_v52, %s8372_s9 }
0x3f66   : > { %v5751_v58 = vpop.permute.xlu0 %5750 }
0x3f67   : > { %6260 = vmatmul.mubr.msk.f32.vlgmr.msra.gmra.mrb[32].mxu0 %vm585_vm2, %v5751_v58 }
0x3f68   : > { %7835 = vmatpush1.bf16.msra.mxu0 %v9102_v24  ;;  %5889 = vmatprep.mubr.f32.mxu0 %v8371_v8 }
0x3f69   : > { %7837 = vmatprep.subr.bf16.mxu0 %v9104_v36 }
0x3f6c   : > { %7839 = vmatpush1.bf16.msra.mxu0 %v9111_v60 }
0x3f6d   : > { %7841 = vmatprep.subr.bf16.mxu0 %v9115_v6 }
0x3f70   : > { %7843 = vmatpush1.bf16.msra.mxu0 %v9118_v23 }
0x3f71   : > { %7845 = vmatprep.subr.bf16.mxu0 %v9121_v29 }
0x3f74   : > { %7847 = vmatpush1.bf16.msra.mxu0 %v9124_v40 }
0x3f77   : > { %6261 = vmatmul.mubr.msk.f32.vlgmr.msra.gmra.mrb[32].mxu0 %vm405_vm1, %v5578_v49 }
0x404a   : > { %v5891_v59 = vpop.f32.mrb[32].mxu0 }
0x404b   : > { %v5893_v2 = vpop.f32.mrb[33].mxu0  ;;  %v7898_v36 = vadd.f32 %v5891_v59, %v9143_v1 }
0x404c   : > { %v7899_v24 = vadd.f32 %v5893_v2, %v9137_v46 }
0x404d   : > { %v6262_v60 = vmul.f32 -1.442695, %v7898_v36 }
0x404e   : > { %8298 = vtanh.f32 %v7899_v24  ;;  %v6263_v1 = vmul.f32 -1.442695, %v7899_v24 }
0x404f   : > { %8300 = vpow2.f32 %v6262_v60 }
0x4058   : > { %v8299_v8 = vpop.eup %8298 }
0x4059   : > { %5913 = vrot.lane.b32.xlu1 %v8299_v8, %s8372_s9  ;;  %v8301_v6 = vpop.eup %8300 }
0x405a   : > { %v5904_v23 = vadd.f32 1.0, %v8301_v6 }
0x405c   : > { %8302 = vrcp.f32 %v5904_v23 }
0x4066   : > { %v8303_v29 = vpop.eup %8302 }
0x4067   : > { %v5911_v26 = vmul.f32 %v8303_v29, %v9493_v32 }
0x40cb   : > { %v5914_v9 = vpop.permute.xlu1 %5913 }
0x40cc   : > { %v5916_v40 = vmul.f32 %v8303_v29, %v5914_v9 }
0x40ce   : > { %5918 = vrot.lane.b32.xlu0 %v5916_v40, %s8372_s9 }
0x4140   : > { %v5919_v27 = vpop.permute.xlu0 %5918 }
0x4141   : > { %v5921_v46 = vadd.f32 %v5919_v27, %v5911_v26 }
0x4143   : > { %8304 = vtanh.f32 %v5921_v46 }
0x4144   : > { %8306 = vpow2.f32 %v6263_v1 }
0x414d   : > { %v8305_v56 = vpop.eup %8304 }
0x414e   : > { %5924 = vrot.lane.b32.xlu1 %v8305_v56, %s8372_s9  ;;  %v8307_v7 = vpop.eup %8306 }
0x414f   : > { %v5905_v15 = vadd.f32 1.0, %v8307_v7 }
0x4151   : > { %8308 = vrcp.f32 %v5905_v15 }
0x415b   : > { %v8309_v63 = vpop.eup %8308 }
0x41c0   : > { %v5925_v18 = vpop.permute.xlu1 %5924 }
0x41c1   : > { %v5927_v38 = vmul.f32 %v8309_v63, %v5925_v18 }
0x41c3   : > { %6988 = vmatmul.mubr.msk.f32.vlgmr.msra.gmra.mrb[46].mxu1 %vm405_vm1, %v5927_v38 }
0x4293   : > { %6009 = sbr.rel (!%p9580_p9) target bundleno = 17058 (0x42a2), region = 74 }
0x4296   : > { %v5997_v21 = vpop.f32.mrb[46].mxu1 }
0x4297   : > { %v5998_v30 = vadd.f32 %v9514_v28, %v5997_v21  ;;  %v6989_v25 = vpop.f32.mrb[47].mxu1 }
0x4299   : > { %6265 = vst [vmem:[%s9190_s24 + $0x38] sm:$0xff] %v5998_v30 }
0x42a0   : > { %v6067_v57 = vld [vmem:[%s9190_s24 + $0x38] sm:$0xff] }
0x42a1   : > { %6068 = vst [vmem:[%s6011_s28 + $0x70] sm:$0xff] %v6067_v57 }
0x42a2 PF: > { %p10_p11 = scmp.ge.s32.totalorder %s8410_s13, 4   ;;  %s9581_s9 = smov %s8362_s10 }
0x42a3   : > { %s9582_s10 = smov %s8420_s16  ;;  %s9583_s11 = smov %s8410_s13 }
0x42a4   :  { %12 = sbr.rel (!%p10_p11) target bundleno = 2 (0x2), region = 160 }
0x42ab   :  { %6084 = vsyncpa [#allocation4], 1 }
0x42ac   :  { %6086 = vsyncpa [#allocation4 + $0x1], 1 }

</bundles_post_ra>
